<compile_context>
chip_gen: v5e
topology: v5e:2x2
jax: 0.10.0
libtpu: 0.0.40
codegen_flags: <defaults>
</compile_context>

<pallas_src>
import functools

import jax
import jax.numpy as jnp
from jax.experimental import pallas as pl
from jax.experimental.pallas import tpu as pltpu

HIDDEN = 128


def actor_critic_kernel(x_ref, w1_ref, b1_ref, w2_ref, b2_ref, out_ref, *, out_dim):
    x = x_ref[...]                                    # (TB, in_dim), in_dim tiny (4)
    w1 = w1_ref[...]                                  # (in_dim, 2*HIDDEN)

    # Fused layer 1 for both heads as in_dim broadcast-FMAs on the VPU
    # (K = in_dim = 4 is ~3% of MXU contraction depth and would need a layout
    # shuffle to land K on lanes; the VPU slot is otherwise idle here).
    h = b1_ref[...]                                   # (1, 2*HIDDEN)
    for k in range(x.shape[1]):                       # unrolled at trace time
        h = h + x[:, k:k + 1] * w1[k:k + 1, :]        # (TB, 2*HIDDEN)
    h = jnp.maximum(h, 0.0)

    # Fused layer 2: block-diagonal weight -> logits in lanes [0:out_dim],
    # critic value in lane out_dim, exact zeros in the remaining padded lanes.
    fused = jnp.dot(h, w2_ref[...], preferred_element_type=jnp.float32) + b2_ref[...]

    lane = jax.lax.broadcasted_iota(jnp.int32, fused.shape, 1)   # (TB, OUT_W)
    is_logit = lane < out_dim

    # Masked softmax over the logical logit lanes only; exact normalization
    # (denom is a single (TB, 1) column, so the exact divide is essentially free).
    masked = jnp.where(is_logit, fused, -jnp.inf)
    m = jnp.max(masked, axis=-1, keepdims=True)
    e = jnp.where(is_logit, jnp.exp(masked - m), 0.0)
    denom = jnp.sum(e, axis=-1, keepdims=True)
    probs = e / denom

    # Single narrow lane-group store: probs | value | zeros.
    out_ref[...] = jnp.where(lane == out_dim, fused, probs)


def _round_up(x, m):
    return ((x + m - 1) // m) * m


def _choose_tile(batch):
    """Batch tile size: one grid step for small batches, >=2 big tiles for rollouts."""
    b8 = _round_up(batch, 8)
    if b8 <= 1024:
        return b8                                   # single grid step
    return min(2048, _round_up((b8 + 1) // 2, 8))   # >=2 "parallel" steps (v7x: 2 TCs)


def fuse_params(p):
    """One-time host-side fusion of actor/critic weights into the packed layout."""
    in_dim, _ = p["w1a"].shape
    out_dim = p["w2a"].shape[1]
    out_w = _round_up(out_dim + 1, 8)               # narrow lane-group output width

    w1 = jnp.concatenate([p["w1a"], p["w1c"]], axis=1)            # (in, 2H)
    b1 = jnp.concatenate([p["b1a"], p["b1c"]], axis=1)            # (1, 2H)
    w2 = jnp.zeros((2 * HIDDEN, out_w), jnp.float32)
    w2 = w2.at[:HIDDEN, :out_dim].set(p["w2a"])
    w2 = w2.at[HIDDEN:, out_dim:out_dim + 1].set(p["w2c"])
    b2 = jnp.zeros((1, out_w), jnp.float32)
    b2 = b2.at[:, :out_dim].set(p["b2a"])
    b2 = b2.at[:, out_dim:out_dim + 1].set(p["b2c"])
    return (w1, b1, w2, b2)


@functools.partial(jax.jit, static_argnames=("out_dim",))
def actor_critic_forward(state, fused, *, out_dim):
    """state: (B, input_dim) f32. Returns (probs (B, out_dim), value (B, 1))."""
    w1, b1, w2, b2 = fused
    B, in_dim = state.shape
    out_w = w2.shape[1]

    TB = _choose_tile(B)
    B_pad = _round_up(B, TB)
    if B_pad != B:
        state = jnp.pad(state, ((0, B_pad - B), (0, 0)))   # zero rows; sliced off below
    grid = (B_pad // TB,)

    out = pl.pallas_call(
        functools.partial(actor_critic_kernel, out_dim=out_dim),
        out_shape=jax.ShapeDtypeStruct((B_pad, out_w), jnp.float32),
        grid=grid,
        in_specs=[
            pl.BlockSpec((TB, in_dim), lambda i: (i, 0)),   # state tile advances
            pl.BlockSpec(w1.shape, lambda i: (0, 0)),       # fused weights stay resident
            pl.BlockSpec(b1.shape, lambda i: (0, 0)),
            pl.BlockSpec(w2.shape, lambda i: (0, 0)),
            pl.BlockSpec(b2.shape, lambda i: (0, 0)),
        ],
        out_specs=pl.BlockSpec((TB, out_w), lambda i: (i, 0)),
        compiler_params=pltpu.CompilerParams(
            dimension_semantics=("parallel",)),              # 2 TCs on v7x when grid >= 2
    )(state, w1, b1, w2, b2)

    # Slices stay inside the jit (fused by XLA); only (B_pad, out_w) leaves the kernel.
    # TODO(synk): fuse downstream categorical sampling into the kernel with pltpu.prng_*
    # so only sampled actions / log-probs ever leave HBM in the A2C actor loop.
    probs = out[:B, :out_dim]
    value = out[:B, out_dim:out_dim + 1]
    return probs, value


def init_params(key, input_dim, output_dim, hidden=HIDDEN):
    """Deterministic PyTorch-style uniform(-1/sqrt(fan_in), 1/sqrt(fan_in)) init."""
    ks = jax.random.split(key, 8)

    def linear(kw, kb, fan_in, fan_out):
        bound = 1.0 / jnp.sqrt(jnp.float32(fan_in))
        w = jax.random.uniform(kw, (fan_in, fan_out), jnp.float32, -bound, bound)
        b = jax.random.uniform(kb, (1, fan_out), jnp.float32, -bound, bound)
        return w, b

    w1a, b1a = linear(ks[0], ks[1], input_dim, hidden)
    w2a, b2a = linear(ks[2], ks[3], hidden, output_dim)
    w1c, b1c = linear(ks[4], ks[5], input_dim, hidden)
    w2c, b2c = linear(ks[6], ks[7], hidden, 1)
    return dict(w1a=w1a, b1a=b1a, w2a=w2a, b2a=b2a,
                w1c=w1c, b1c=b1c, w2c=w2c, b2c=b2c)


def reference_forward(state, p):
    h_a = jnp.maximum(state @ p["w1a"] + p["b1a"], 0.0)
    probs = jax.nn.softmax(h_a @ p["w2a"] + p["b2a"], axis=-1)
    h_c = jnp.maximum(state @ p["w1c"] + p["b1c"], 0.0)
    value = h_c @ p["w2c"] + p["b2c"]
    return probs, value


if __name__ == "__main__":
    key = jax.random.PRNGKey(0)
    k_param, k_state = jax.random.split(key)

    batch = 250        # deliberately NOT a multiple of 8: exercises the pad + slice path
    input_dim = 4      # CartPole observation dim
    output_dim = 2     # CartPole action dim

    params = init_params(k_param, input_dim, output_dim)
    fused = fuse_params(params)        # one-time weight packing, outside the rollout loop

    state = jax.random.normal(k_state, (batch, input_dim), jnp.float32)

    probs, value = actor_critic_forward(state, fused, out_dim=output_dim)
    jax.block_until_ready((probs, value))

    probs_ref, value_ref = reference_forward(state, params)
    assert probs.shape == (batch, output_dim) and value.shape == (batch, 1)
    # Value path: block-diagonal fused matmul adds exact zeros -> only f32
    # accumulation-order noise vs. the reference.
    assert jnp.allclose(value, value_ref, atol=1e-4, rtol=1e-4)
    # Probs path: exact softmax normalization now.
    assert jnp.allclose(probs, probs_ref, atol=1e-4, rtol=1e-4)
    assert jnp.allclose(jnp.sum(probs, axis=-1), 1.0, atol=1e-5)

    print("KERNEL_OK")
</pallas_src>

<mosaic_0001>
module attributes {stable_mosaic.version = 11 : i64} {
  func.func @actor_critic_kernel(%arg0: i32, %arg1: memref<256x4xf32, #tpu.memory_space<vmem>>, %arg2: memref<4x256xf32, #tpu.memory_space<vmem>>, %arg3: memref<1x256xf32, #tpu.memory_space<vmem>>, %arg4: memref<256x8xf32, #tpu.memory_space<vmem>>, %arg5: memref<1x8xf32, #tpu.memory_space<vmem>>, %arg6: memref<256x8xf32, #tpu.memory_space<vmem>>) attributes {dimension_semantics = [#tpu.dimension_semantics<parallel>], iteration_bounds = array<i64: 1>, scalar_prefetch = 0 : i64, scratch_operands = 0 : i64, tpu.core_type = #tpu.core_type<tc>, window_params = [{transform_indices = @transform_0, window_bounds = array<i64: 256, 4>}, {pipeline_mode = #tpu.pipeline_mode<synchronous>, transform_indices = @transform_1, window_bounds = array<i64: 4, 256>}, {pipeline_mode = #tpu.pipeline_mode<synchronous>, transform_indices = @transform_2, window_bounds = array<i64: 1, 256>}, {pipeline_mode = #tpu.pipeline_mode<synchronous>, transform_indices = @transform_3, window_bounds = array<i64: 256, 8>}, {pipeline_mode = #tpu.pipeline_mode<synchronous>, transform_indices = @transform_4, window_bounds = array<i64: 1, 8>}, {transform_indices = @transform_5, window_bounds = array<i64: 256, 8>}]} {
    %c0 = arith.constant 0 : index
    %c0_0 = arith.constant 0 : index
    %0 = vector.load %arg1[%c0, %c0_0] : memref<256x4xf32, #tpu.memory_space<vmem>>, vector<256x4xf32>
    %c0_1 = arith.constant 0 : index
    %c0_2 = arith.constant 0 : index
    %1 = vector.load %arg2[%c0_1, %c0_2] : memref<4x256xf32, #tpu.memory_space<vmem>>, vector<4x256xf32>
    %c0_3 = arith.constant 0 : index
    %c0_4 = arith.constant 0 : index
    %2 = vector.load %arg3[%c0_3, %c0_4] : memref<1x256xf32, #tpu.memory_space<vmem>>, vector<1x256xf32>
    %3 = vector.extract_strided_slice %0 {offsets = [0, 0], sizes = [256, 1], strides = [1, 1]} : vector<256x4xf32> to vector<256x1xf32>
    %4 = vector.extract_strided_slice %1 {offsets = [0, 0], sizes = [1, 256], strides = [1, 1]} : vector<4x256xf32> to vector<1x256xf32>
    %5 = vector.broadcast %3 : vector<256x1xf32> to vector<256x256xf32>
    %6 = vector.broadcast %4 : vector<1x256xf32> to vector<256x256xf32>
    %7 = arith.mulf %5, %6 : vector<256x256xf32>
    %8 = vector.broadcast %2 : vector<1x256xf32> to vector<256x256xf32>
    %9 = arith.addf %8, %7 : vector<256x256xf32>
    %10 = vector.extract_strided_slice %0 {offsets = [0, 1], sizes = [256, 1], strides = [1, 1]} : vector<256x4xf32> to vector<256x1xf32>
    %11 = vector.extract_strided_slice %1 {offsets = [1, 0], sizes = [1, 256], strides = [1, 1]} : vector<4x256xf32> to vector<1x256xf32>
    %12 = vector.broadcast %10 : vector<256x1xf32> to vector<256x256xf32>
    %13 = vector.broadcast %11 : vector<1x256xf32> to vector<256x256xf32>
    %14 = arith.mulf %12, %13 : vector<256x256xf32>
    %15 = arith.addf %9, %14 : vector<256x256xf32>
    %16 = vector.extract_strided_slice %0 {offsets = [0, 2], sizes = [256, 1], strides = [1, 1]} : vector<256x4xf32> to vector<256x1xf32>
    %17 = vector.extract_strided_slice %1 {offsets = [2, 0], sizes = [1, 256], strides = [1, 1]} : vector<4x256xf32> to vector<1x256xf32>
    %18 = vector.broadcast %16 : vector<256x1xf32> to vector<256x256xf32>
    %19 = vector.broadcast %17 : vector<1x256xf32> to vector<256x256xf32>
    %20 = arith.mulf %18, %19 : vector<256x256xf32>
    %21 = arith.addf %15, %20 : vector<256x256xf32>
    %22 = vector.extract_strided_slice %0 {offsets = [0, 3], sizes = [256, 1], strides = [1, 1]} : vector<256x4xf32> to vector<256x1xf32>
    %23 = vector.extract_strided_slice %1 {offsets = [3, 0], sizes = [1, 256], strides = [1, 1]} : vector<4x256xf32> to vector<1x256xf32>
    %24 = vector.broadcast %22 : vector<256x1xf32> to vector<256x256xf32>
    %25 = vector.broadcast %23 : vector<1x256xf32> to vector<256x256xf32>
    %26 = arith.mulf %24, %25 : vector<256x256xf32>
    %27 = arith.addf %21, %26 : vector<256x256xf32>
    %cst = arith.constant 0.000000e+00 : f32
    %28 = vector.broadcast %cst : f32 to vector<256x256xf32>
    %29 = arith.maximumf %27, %28 : vector<256x256xf32>
    %c0_5 = arith.constant 0 : index
    %c0_6 = arith.constant 0 : index
    %30 = vector.load %arg4[%c0_5, %c0_6] : memref<256x8xf32, #tpu.memory_space<vmem>>, vector<256x8xf32>
    %cst_7 = arith.constant dense<0.000000e+00> : vector<256x8xf32>
    %31 = tpu.matmul %29, %30, %cst_7 {dimension_numbers = #tpu.dot_dimension_numbers<[1], [0], [0], [1], [0, 0, 1, 1], [], []>} : vector<256x256xf32>, vector<256x8xf32>, vector<256x8xf32> -> vector<256x8xf32>
    %c0_8 = arith.constant 0 : index
    %c0_9 = arith.constant 0 : index
    %32 = vector.load %arg5[%c0_8, %c0_9] : memref<1x8xf32, #tpu.memory_space<vmem>>, vector<1x8xf32>
    %33 = vector.broadcast %32 : vector<1x8xf32> to vector<256x8xf32>
    %34 = arith.addf %31, %33 : vector<256x8xf32>
    %35 = tpu.iota {dimensions = array<i32: 1>} : vector<256x8xi32>
    %c2_i32 = arith.constant 2 : i32
    %36 = vector.broadcast %c2_i32 : i32 to vector<256x8xi32>
    %37 = arith.cmpi slt, %35, %36 : vector<256x8xi32>
    %cst_10 = arith.constant 0xFF800000 : f32
    %38 = vector.broadcast %cst_10 : f32 to vector<256x8xf32>
    %39 = arith.select %37, %34, %38 : vector<256x8xi1>, vector<256x8xf32>
    %cst_11 = arith.constant dense<0xFF800000> : vector<256xf32>
    %40 = vector.multi_reduction <maximumf>, %39, %cst_11 [1] : vector<256x8xf32> to vector<256xf32>
    %41 = vector.shape_cast %40 : vector<256xf32> to vector<256x1xf32>
    %42 = vector.broadcast %41 : vector<256x1xf32> to vector<256x8xf32>
    %43 = arith.subf %39, %42 : vector<256x8xf32>
    %44 = math.exp %43 : vector<256x8xf32>
    %cst_12 = arith.constant 0.000000e+00 : f32
    %45 = vector.broadcast %cst_12 : f32 to vector<256x8xf32>
    %46 = arith.select %37, %44, %45 : vector<256x8xi1>, vector<256x8xf32>
    %cst_13 = arith.constant dense<0.000000e+00> : vector<256xf32>
    %47 = vector.multi_reduction <add>, %46, %cst_13 [1] : vector<256x8xf32> to vector<256xf32>
    %48 = vector.shape_cast %47 : vector<256xf32> to vector<256x1xf32>
    %49 = vector.broadcast %48 : vector<256x1xf32> to vector<256x8xf32>
    %50 = arith.divf %46, %49 : vector<256x8xf32>
    %c2_i32_14 = arith.constant 2 : i32
    %51 = vector.broadcast %c2_i32_14 : i32 to vector<256x8xi32>
    %52 = arith.cmpi eq, %35, %51 : vector<256x8xi32>
    %53 = arith.select %52, %34, %50 : vector<256x8xi1>, vector<256x8xf32>
    %c0_15 = arith.constant 0 : index
    %c0_16 = arith.constant 0 : index
    %54 = vector.load %arg6[%c0_15, %c0_16] : memref<256x8xf32, #tpu.memory_space<vmem>>, vector<256x8xf32>
    tpu.vector_store %arg6[%c0_15, %c0_16], %53 {strides = array<i32>} : memref<256x8xf32, #tpu.memory_space<vmem>>, vector<256x8xf32>,
    return
  }
  func.func @transform_0(%arg0: i32) -> (i32, i32) {
    %c0_i32 = arith.constant 0 : i32
    %c0_i32_0 = arith.constant 0 : i32
    return %arg0, %c0_i32 : i32, i32
  }
  func.func @transform_1(%arg0: i32) -> (i32, i32) {
    %c0_i32 = arith.constant 0 : i32
    %c0_i32_0 = arith.constant 0 : i32
    %c0_i32_1 = arith.constant 0 : i32
    return %c0_i32, %c0_i32_0 : i32, i32
  }
  func.func @transform_2(%arg0: i32) -> (i32, i32) {
    %c0_i32 = arith.constant 0 : i32
    %c0_i32_0 = arith.constant 0 : i32
    %c0_i32_1 = arith.constant 0 : i32
    return %c0_i32, %c0_i32_0 : i32, i32
  }
  func.func @transform_3(%arg0: i32) -> (i32, i32) {
    %c0_i32 = arith.constant 0 : i32
    %c0_i32_0 = arith.constant 0 : i32
    %c0_i32_1 = arith.constant 0 : i32
    return %c0_i32, %c0_i32_0 : i32, i32
  }
  func.func @transform_4(%arg0: i32) -> (i32, i32) {
    %c0_i32 = arith.constant 0 : i32
    %c0_i32_0 = arith.constant 0 : i32
    %c0_i32_1 = arith.constant 0 : i32
    return %c0_i32, %c0_i32_0 : i32, i32
  }
  func.func @transform_5(%arg0: i32) -> (i32, i32) {
    %c0_i32 = arith.constant 0 : i32
    %c0_i32_0 = arith.constant 0 : i32
    return %arg0, %c0_i32 : i32, i32
  }
}

</mosaic_0001>

<bundles_post_ra>
// kernel: actor_critic_forward.1
= control target key start
LH: loop header
LB: loop body
LE: loop exit
PB: predicated region body
PF: predicated region fallthrough
CT: control target
= control target key end

     0   :  { %v2550_v0 = vmov 0   ;;  %v2551_v33 = vmov 1   ;;  %v4962_v58 = vmov 2   ;;  %vm1501_vm1 = vcmask 64512   ;;  %s4955_s0 = inlined_call_operand.vmem [shape: f32[256,4], index: 0, kind: input, shape index: {}]   ;;  %s4956_s3 = inlined_call_operand.vmem [shape: f32[256,8], index: 3, kind: input, shape index: {}]   ;;  %s4957_s1 = inlined_call_operand.vmem [shape: f32[4,256], index: 1, kind: input, shape index: {}]   ;;  %s4958_s2 = inlined_call_operand.vmem [shape: f32[1,256], index: 2, kind: input, shape index: {}]   ;;  %s4959_s4 = inlined_call_operand.vmem [shape: f32[1,8], index: 4, kind: input, shape index: {}]   ;;  %s4960_s5 = inlined_call_operand.vmem [shape: f32[256,8], index: 5, kind: output, shape index: {}]  }
   0x1   :  { %2409 = vset.pattern.permute.xlu2 %v2550_v0  ;;  %2408 = vset.pattern.permute.xlu1 %v2550_v0  ;;  %v2587_v1 = vld [vmem:[%s4955_s0 + $0x20] sm:$0xff]  ;;  %v2592_v2 = vld [vmem:[%s4955_s0 + $0x10] sm:$0xff]  ;;  %v2605_v4 = vld [vmem:[%s4955_s0 + $0x28] sm:$0xff] }
   0x2   :  { %v2597_v3 = vld [vmem:[%s4955_s0] sm:$0xff]  ;;  %2407 = vset.pattern.permute.xlu0 %v2550_v0  ;;  %76 = vperm.xlu2 %2409, %v2587_v1   ;;  %v2610_v5 = vld [vmem:[%s4955_s0 + $0x18] sm:$0xff]  ;;  %v2615_v6 = vld [vmem:[%s4955_s0 + $0x8] sm:$0xff] }
   0x3   :  { %66 = vperm.xlu1 %2408, %v2592_v2   ;;  %56 = vperm.xlu0 %2407, %v2597_v3   ;;  %v2623_v7 = vld [vmem:[%s4955_s0 + $0x40] sm:$0xff]  ;;  %v2628_v8 = vld [vmem:[%s4955_s0 + $0x38] sm:$0xff]  ;;  %v2633_v9 = vld [vmem:[%s4955_s0 + $0x30] sm:$0xff] }
   0x4   :  { %v2641_v10 = vld [vmem:[%s4955_s0 + $0x58] sm:$0xff]  ;;  %v2646_v11 = vld [vmem:[%s4955_s0 + $0x50] sm:$0xff]  ;;  %v2651_v12 = vld [vmem:[%s4955_s0 + $0x48] sm:$0xff] }
   0x5   :  { %v2659_v13 = vld [vmem:[%s4955_s0 + $0x70] sm:$0xff]  ;;  %v2664_v14 = vld [vmem:[%s4955_s0 + $0x68] sm:$0xff]  ;;  %v2669_v15 = vld [vmem:[%s4955_s0 + $0x60] sm:$0xff] }
   0x6   :  { %v2677_v16 = vld [vmem:[%s4955_s0 + $0x88] sm:$0xff]  ;;  %v2682_v17 = vld [vmem:[%s4955_s0 + $0x80] sm:$0xff]  ;;  %v2687_v18 = vld [vmem:[%s4955_s0 + $0x78] sm:$0xff] }
   0x7   :  { %v2695_v19 = vld [vmem:[%s4955_s0 + $0xa0] sm:$0xff]  ;;  %v2700_v20 = vld [vmem:[%s4955_s0 + $0x98] sm:$0xff]  ;;  %v2705_v21 = vld [vmem:[%s4955_s0 + $0x90] sm:$0xff] }
   0x8   :  { %v2713_v22 = vld [vmem:[%s4955_s0 + $0xb8] sm:$0xff]  ;;  %v2718_v23 = vld [vmem:[%s4955_s0 + $0xb0] sm:$0xff]  ;;  %v2723_v24 = vld [vmem:[%s4955_s0 + $0xa8] sm:$0xff] }
   0x9   :  { %v2731_v25 = vld [vmem:[%s4955_s0 + $0xd0] sm:$0xff]  ;;  %v2736_v26 = vld [vmem:[%s4955_s0 + $0xc8] sm:$0xff]  ;;  %v2741_v27 = vld [vmem:[%s4955_s0 + $0xc0] sm:$0xff] }
   0xa   :  { %81 = vperm.xlu2 %2409, %v2605_v4   ;;  %v2749_v28 = vld [vmem:[%s4955_s0 + $0xe8] sm:$0xff]  ;;  %v2754_v29 = vld [vmem:[%s4955_s0 + $0xe0] sm:$0xff]  ;;  %v2759_v30 = vld [vmem:[%s4955_s0 + $0xd8] sm:$0xff] }
   0xb   :  { %71 = vperm.xlu1 %2408, %v2610_v5   ;;  %61 = vperm.xlu0 %2407, %v2615_v6   ;;  %v2767_v31 = vld [vmem:[%s4955_s0 + $0xf8] sm:$0xff]  ;;  %v2772_v32 = vld [vmem:[%s4955_s0 + $0xf0] sm:$0xff] }
  0x12   :  { %96 = vperm.xlu2 %2409, %v2623_v7  }
  0x13   :  { %91 = vperm.xlu1 %2408, %v2628_v8   ;;  %86 = vperm.xlu0 %2407, %v2633_v9  }
  0x1a   :  { %111 = vperm.xlu2 %2409, %v2641_v10  }
  0x1b   :  { %106 = vperm.xlu1 %2408, %v2646_v11   ;;  %101 = vperm.xlu0 %2407, %v2651_v12  }
  0x22   :  { %126 = vperm.xlu2 %2409, %v2659_v13  }
  0x23   :  { %121 = vperm.xlu1 %2408, %v2664_v14   ;;  %116 = vperm.xlu0 %2407, %v2669_v15  }
  0x2a   :  { %141 = vperm.xlu2 %2409, %v2677_v16  }
  0x2b   :  { %136 = vperm.xlu1 %2408, %v2682_v17   ;;  %131 = vperm.xlu0 %2407, %v2687_v18  }
  0x32   :  { %156 = vperm.xlu2 %2409, %v2695_v19  }
  0x33   :  { %151 = vperm.xlu1 %2408, %v2700_v20   ;;  %146 = vperm.xlu0 %2407, %v2705_v21  }
  0x3a   :  { %171 = vperm.xlu2 %2409, %v2713_v22  }
  0x3b   :  { %166 = vperm.xlu1 %2408, %v2718_v23   ;;  %161 = vperm.xlu0 %2407, %v2723_v24  }
  0x42   :  { %186 = vperm.xlu2 %2409, %v2731_v25  }
  0x43   :  { %181 = vperm.xlu1 %2408, %v2736_v26   ;;  %176 = vperm.xlu0 %2407, %v2741_v27  }
  0x4a   :  { %201 = vperm.xlu2 %2409, %v2749_v28  }
  0x4b   :  { %196 = vperm.xlu1 %2408, %v2754_v29   ;;  %191 = vperm.xlu0 %2407, %v2759_v30  }
  0x52   :  { %2410 = vset.pattern.permute.xlu2 %v2551_v33 }
  0x53   :  { %211 = vperm.xlu1 %2408, %v2767_v31   ;;  %206 = vperm.xlu0 %2407, %v2772_v32  }
  0x54   :  { %355 = vperm.xlu2 %2410, %v2597_v3  }
  0x5b   :  { %2412 = vset.pattern.permute.xlu1 %v2551_v33  ;;  %2411 = vset.pattern.permute.xlu0 %v2551_v33 }
  0x5c   :  { %363 = vperm.xlu1 %2412, %v2592_v2   ;;  %367 = vperm.xlu2 %2410, %v2610_v5   ;;  %v2779_v34 = vpop.permute.xlu2 %76 }
  0x5d   :  { %5042 = vst [vmem:[#allocation2_spill] sm:$0xff] %v2779_v34  ;;  %359 = vperm.xlu0 %2411, %v2615_v6  }
  0x64   :  { %371 = vperm.xlu1 %2412, %v2587_v1   ;;  %375 = vperm.xlu2 %2410, %v2605_v4   ;;  %v2784_v35 = vpop.permute.xlu2 %81 }
  0x65   :  { %5043 = vst [vmem:[#allocation3_spill] sm:$0xff] %v2784_v35  ;;  %379 = vperm.xlu0 %2411, %v2633_v9  }
  0x6c   :  { %383 = vperm.xlu1 %2412, %v2628_v8   ;;  %387 = vperm.xlu2 %2410, %v2623_v7   ;;  %v2789_v36 = vpop.permute.xlu2 %96 }
  0x6d   :  { %5044 = vst [vmem:[#allocation4_spill] sm:$0xff] %v2789_v36  ;;  %391 = vperm.xlu0 %2411, %v2651_v12  }
  0x74   :  { %395 = vperm.xlu1 %2412, %v2646_v11   ;;  %399 = vperm.xlu2 %2410, %v2641_v10   ;;  %v2794_v37 = vpop.permute.xlu2 %111 }
  0x75   :  { %5045 = vst [vmem:[#allocation5_spill] sm:$0xff] %v2794_v37  ;;  %403 = vperm.xlu0 %2411, %v2669_v15   ;;  %v2797_v38 = vpop.permute.xlu1 %66  ;;  %v2799_v39 = vpop.permute.xlu0 %56 }
  0x7c   :  { %407 = vperm.xlu1 %2412, %v2664_v14   ;;  %411 = vperm.xlu2 %2410, %v2659_v13   ;;  %v2803_v40 = vpop.permute.xlu2 %126 }
  0x7d   :  { %5046 = vst [vmem:[#allocation6_spill] sm:$0xff] %v2803_v40  ;;  %415 = vperm.xlu0 %2411, %v2687_v18   ;;  %v2806_v41 = vpop.permute.xlu1 %71  ;;  %v2808_v42 = vpop.permute.xlu0 %61 }
  0x7e   :  { %5047 = vst [vmem:[#allocation7_spill] sm:$0xff] %v2806_v41 }
  0x84   :  { %419 = vperm.xlu1 %2412, %v2682_v17   ;;  %423 = vperm.xlu2 %2410, %v2677_v16   ;;  %v2812_v43 = vpop.permute.xlu2 %141 }
  0x85   :  { %5048 = vst [vmem:[#allocation8_spill] sm:$0xff] %v2812_v43  ;;  %427 = vperm.xlu0 %2411, %v2705_v21   ;;  %v2815_v44 = vpop.permute.xlu1 %91  ;;  %v2817_v45 = vpop.permute.xlu0 %86 }
  0x86   :  { %5049 = vst [vmem:[#allocation9_spill] sm:$0xff] %v2815_v44 }
  0x87   :  { %5050 = vst [vmem:[#allocation10_spill] sm:$0xff] %v2817_v45 }
  0x8c   :  { %431 = vperm.xlu1 %2412, %v2700_v20   ;;  %435 = vperm.xlu2 %2410, %v2695_v19   ;;  %v2821_v46 = vpop.permute.xlu2 %156 }
  0x8d   :  { %439 = vperm.xlu0 %2411, %v2723_v24   ;;  %v2824_v47 = vpop.permute.xlu1 %106  ;;  %v2826_v48 = vpop.permute.xlu0 %101 }
  0x8e   :  { %5051 = vst [vmem:[#allocation11_spill] sm:$0xff] %v2824_v47 }
  0x94   :  { %443 = vperm.xlu1 %2412, %v2718_v23   ;;  %447 = vperm.xlu2 %2410, %v2713_v22   ;;  %v2830_v49 = vpop.permute.xlu2 %171 }
  0x95   :  { %451 = vperm.xlu0 %2411, %v2741_v27   ;;  %v2833_v50 = vpop.permute.xlu1 %121  ;;  %v2835_v51 = vpop.permute.xlu0 %116 }
  0x96   :  { %5052 = vst [vmem:[#allocation12_spill] sm:$0xff] %v2833_v50 }
  0x9c   :  { %455 = vperm.xlu1 %2412, %v2736_v26   ;;  %459 = vperm.xlu2 %2410, %v2731_v25   ;;  %v2839_v52 = vpop.permute.xlu2 %186 }
  0x9d   :  { %463 = vperm.xlu0 %2411, %v2759_v30   ;;  %v2842_v53 = vpop.permute.xlu1 %136  ;;  %v2844_v54 = vpop.permute.xlu0 %131 }
  0xa4   :  { %467 = vperm.xlu1 %2412, %v2754_v29   ;;  %471 = vperm.xlu2 %2410, %v2749_v28   ;;  %v2848_v55 = vpop.permute.xlu2 %201 }
  0xa5   :  { %5053 = vst [vmem:[#allocation13_spill] sm:$0xff] %v2848_v55  ;;  %475 = vperm.xlu0 %2411, %v2772_v32   ;;  %v2851_v56 = vpop.permute.xlu1 %151  ;;  %v2853_v57 = vpop.permute.xlu0 %146 }
  0xa6   :  { %5054 = vst [vmem:[#allocation14_spill] sm:$0xff] %v2851_v56 }
  0xa7   :  { %5055 = vst [vmem:[#allocation15_spill] sm:$0xff] %v2853_v57 }
  0xac   :  { %479 = vperm.xlu1 %2412, %v2767_v31   ;;  %2413 = vset.pattern.permute.xlu2 %v4962_v58 }
  0xad   :  { %2414 = vset.pattern.permute.xlu0 %v4962_v58  ;;  %v2858_v59 = vpop.permute.xlu1 %166  ;;  %617 = vperm.xlu2 %2413, %v2597_v3   ;;  %v2861_v60 = vpop.permute.xlu0 %161 }
  0xae   :  { %5056 = vst [vmem:[#allocation16_spill] sm:$0xff] %v2858_v59  ;;  %621 = vperm.xlu0 %2414, %v2615_v6   ;;  %v2864_v61 = vpop.permute.xlu2 %355 }
  0xb4   :  { %2415 = vset.pattern.permute.xlu1 %v4962_v58 }
  0xb5   :  { %625 = vperm.xlu1 %2415, %v2592_v2   ;;  %v2868_v62 = vpop.permute.xlu1 %181  ;;  %629 = vperm.xlu2 %2413, %v2610_v5   ;;  %v2871_v63 = vpop.permute.xlu0 %176 }
  0xb6   :  { %641 = vperm.xlu0 %2414, %v2633_v9   ;;  %v2874_v0 = vpop.permute.xlu2 %367 }
  0xb7   :  { %5057 = vst [vmem:[#allocation17_spill] sm:$0xff] %v2874_v0 }
  0xbd   :  { %633 = vperm.xlu1 %2415, %v2587_v1   ;;  %v2877_v33 = vpop.permute.xlu1 %196  ;;  %637 = vperm.xlu2 %2413, %v2605_v4   ;;  %v2880_v55 = vpop.permute.xlu0 %191 }
  0xbe   :  { %5058 = vst [vmem:[#allocation18_spill] sm:$0xff] %v2877_v33  ;;  %653 = vperm.xlu0 %2414, %v2651_v12   ;;  %v2883_v58 = vpop.permute.xlu2 %375 }
  0xbf   :  { %5059 = vst [vmem:[#allocation19_spill] sm:$0xff] %v2883_v58 }
  0xc5   :  { %645 = vperm.xlu1 %2415, %v2628_v8   ;;  %v2886_v50 = vpop.permute.xlu1 %211  ;;  %649 = vperm.xlu2 %2413, %v2623_v7   ;;  %v2889_v40 = vpop.permute.xlu0 %206 }
  0xc6   :  { %5060 = vst [vmem:[#allocation20_spill] sm:$0xff] %v2886_v50  ;;  %665 = vperm.xlu0 %2414, %v2669_v15   ;;  %v2892_v37 = vpop.permute.xlu2 %387 }
  0xc7   :  { %5061 = vst [vmem:[#allocation21_spill] sm:$0xff] %v2889_v40 }
  0xc8   :  { %5062 = vst [vmem:[#allocation22_spill] sm:$0xff] %v2892_v37 }
  0xcd   :  { %657 = vperm.xlu1 %2415, %v2646_v11   ;;  %661 = vperm.xlu2 %2413, %v2641_v10  }
  0xce   :  { %677 = vperm.xlu0 %2414, %v2687_v18   ;;  %v2897_v47 = vpop.permute.xlu1 %363  ;;  %v2899_v36 = vpop.permute.xlu2 %399 }
  0xcf   :  { %5063 = vst [vmem:[#allocation23_spill] sm:$0xff] %v2897_v47  ;;  %v2901_v59 = vpop.permute.xlu0 %359 }
  0xd0   :  { %5064 = vst [vmem:[#allocation24_spill] sm:$0xff] %v2899_v36 }
  0xd1   :  { %5065 = vst [vmem:[#allocation25_spill] sm:$0xff] %v2901_v59 }
  0xd5   :  { %669 = vperm.xlu1 %2415, %v2664_v14   ;;  %673 = vperm.xlu2 %2413, %v2659_v13  }
  0xd6   :  { %689 = vperm.xlu0 %2414, %v2705_v21   ;;  %v2906_v50 = vpop.permute.xlu1 %371  ;;  %v2908_v40 = vpop.permute.xlu2 %411 }
  0xd7   :  { %5066 = vst [vmem:[#allocation26_spill] sm:$0xff] %v2906_v50  ;;  %v2910_v37 = vpop.permute.xlu0 %379 }
  0xd8   :  { %5067 = vst [vmem:[#allocation27_spill] sm:$0xff] %v2908_v40 }
  0xd9   :  { %5068 = vst [vmem:[#allocation28_spill] sm:$0xff] %v2910_v37 }
  0xdd   :  { %681 = vperm.xlu1 %2415, %v2682_v17   ;;  %685 = vperm.xlu2 %2413, %v2677_v16  }
  0xde   :  { %701 = vperm.xlu0 %2414, %v2723_v24   ;;  %v2915_v36 = vpop.permute.xlu1 %383  ;;  %v2917_v45 = vpop.permute.xlu2 %423 }
  0xdf   :  { %5069 = vst [vmem:[#allocation29_spill] sm:$0xff] %v2915_v36  ;;  %v2919_v44 = vpop.permute.xlu0 %391 }
  0xe0   :  { %5070 = vst [vmem:[#allocation30_spill] sm:$0xff] %v2917_v45  ;;  %v1230_v45 = vld [vmem:[%s4956_s3 + $0xd0] sm:$0xff] }
  0xe5   :  { %693 = vperm.xlu1 %2415, %v2700_v20   ;;  %697 = vperm.xlu2 %2413, %v2695_v19  }
  0xe6   :  { %713 = vperm.xlu0 %2414, %v2741_v27   ;;  %v2924_v40 = vpop.permute.xlu1 %395  ;;  %v2926_v37 = vpop.permute.xlu2 %435 }
  0xe7   :  { %5071 = vst [vmem:[#allocation31_spill] sm:$0xff] %v2924_v40  ;;  %v2928_v58 = vpop.permute.xlu0 %403  ;;  %v4990_v40 = vmov 3  }
  0xed   :  { %705 = vperm.xlu1 %2415, %v2718_v23   ;;  %709 = vperm.xlu2 %2413, %v2713_v22  }
  0xee   :  { %725 = vperm.xlu0 %2414, %v2759_v30   ;;  %v2933_v36 = vpop.permute.xlu1 %407  ;;  %v2935_v35 = vpop.permute.xlu2 %447 }
  0xef   :  { %5072 = vst [vmem:[#allocation32_spill] sm:$0xff] %v2933_v36  ;;  %v2937_v50 = vpop.permute.xlu0 %415 }
  0xf5   :  { %717 = vperm.xlu1 %2415, %v2736_v26   ;;  %721 = vperm.xlu2 %2413, %v2731_v25  }
  0xf6   :  { %2417 = vset.pattern.permute.xlu0 %v4990_v40  ;;  %v2942_v0 = vpop.permute.xlu1 %419  ;;  %v2944_v34 = vpop.permute.xlu2 %459 }
  0xf7   :  { %879 = vperm.xlu0 %2417, %v2597_v3   ;;  %v2947_v56 = vpop.permute.xlu0 %427 }
  0xf8   :  { %5073 = vst [vmem:[#allocation33_spill] sm:$0xff] %v2947_v56 }
  0xfd   :  { %729 = vperm.xlu1 %2415, %v2754_v29   ;;  %2416 = vset.pattern.permute.xlu2 %v4990_v40 }
  0xfe   :  { %v2951_v36 = vpop.permute.xlu1 %431  ;;  %943 = vperm.xlu2 %2416, %v2682_v17   ;;  %v2954_v41 = vpop.permute.xlu2 %471 }
  0xff   :  { %5074 = vst [vmem:[#allocation34_spill] sm:$0xff] %v2951_v36  ;;  %955 = vperm.xlu0 %2417, %v2700_v20   ;;  %v2957_v57 = vpop.permute.xlu0 %439 }
 0x100   :  { %5075 = vst [vmem:[#allocation35_spill] sm:$0xff] %v2954_v41 }
 0x105   :  { %2418 = vset.pattern.permute.xlu1 %v4990_v40  ;;  %v1217_v40 = vld [vmem:[%s4956_s3 + $0x68] sm:$0xff] }
 0x106   :  { %947 = vperm.xlu1 %2418, %v2677_v16   ;;  %v2961_v3 = vpop.permute.xlu1 %443  ;;  %883 = vperm.xlu2 %2416, %v2615_v6  }
 0x107   :  { %5076 = vst [vmem:[#allocation36_spill] sm:$0xff] %v2961_v3  ;;  %895 = vperm.xlu0 %2417, %v2587_v1   ;;  %v2965_v56 = vpop.permute.xlu0 %451  ;;  %v2967_v36 = vpop.permute.xlu2 %617 }
 0x108   :  { %5077 = vst [vmem:[#allocation37_spill] sm:$0xff] %v2967_v36 }
 0x10e   :  { %951 = vperm.xlu1 %2418, %v2705_v21   ;;  %v2970_v17 = vpop.permute.xlu1 %455  ;;  %887 = vperm.xlu2 %2416, %v2592_v2  }
 0x10f   :  { %5078 = vst [vmem:[#allocation38_spill] sm:$0xff] %v2970_v17  ;;  %967 = vperm.xlu0 %2417, %v2718_v23   ;;  %v2974_v20 = vpop.permute.xlu0 %463  ;;  %v2976_v16 = vpop.permute.xlu2 %629  ;;  %v3219_v17 = vld [vmem:[%s4956_s3 + $0x10] sm:$0xff] }
 0x110   :  { %5079 = vst [vmem:[#allocation39_spill] sm:$0xff] %v2976_v16 }
 0x116   :  { %891 = vperm.xlu1 %2418, %v2610_v5   ;;  %v2979_v6 = vpop.permute.xlu1 %467  ;;  %959 = vperm.xlu2 %2416, %v2695_v19   ;;  %v1235_v19 = vld [vmem:[%s4956_s3 + $0xf8] sm:$0xff] }
 0x117   :  { %5080 = vst [vmem:[#allocation40_spill] sm:$0xff] %v2979_v6  ;;  %907 = vperm.xlu0 %2417, %v2628_v8   ;;  %v2983_v1 = vpop.permute.xlu0 %475  ;;  %v2985_v21 = vpop.permute.xlu2 %637  ;;  %v1219_v8 = vld [vmem:[%s4956_s3 + $0x78] sm:$0xff]  ;;  %2387 = vmatpush.msra.mxu3 %v1235_v19  ;;  %v3074_v6 = vld [vmem:[%s4956_s3 + $0x48] sm:$0xff] }
 0x118   :  { %5081 = vst [vmem:[#allocation41_spill] sm:$0xff] %v2983_v1  ;;  %2371 = vmatpush.msra.mxu2 %v1219_v8  ;;  %1240 = vmatpush.msra.mxu0 %v1219_v8  ;;  %v1233_v1 = vld [vmem:[%s4956_s3 + $0xe8] sm:$0xff]  ;;  %v1216_v8 = vld [vmem:[%s4956_s3 + $0x60] sm:$0xff] }
 0x119   :  { %5082 = vst [vmem:[#allocation42_spill] sm:$0xff] %v2985_v21  ;;  %1353 = vmatpush.msra.mxu1 %v1235_v19  ;;  %v1232_v19 = vld [vmem:[%s4956_s3 + $0xe0] sm:$0xff] }
 0x11e   :  { %963 = vperm.xlu1 %2418, %v2723_v24   ;;  %v2988_v2 = vpop.permute.xlu1 %479  ;;  %899 = vperm.xlu2 %2416, %v2605_v4   ;;  %v3005_v24 = vld [vmem:[%s4957_s1] sm:$0xff]  ;;  %v1218_v4 = vld [vmem:[%s4956_s3 + $0x70] sm:$0xff] }
 0x11f   :  { %5083 = vst [vmem:[#allocation43_spill] sm:$0xff] %v2988_v2  ;;  %979 = vperm.xlu0 %2417, %v2736_v26   ;;  %v2992_v23 = vpop.permute.xlu2 %649  ;;  %v1234_v26 = vld [vmem:[%s4956_s3 + $0xf0] sm:$0xff]  ;;  %2372 = vmatpush.msra.mxu2 %v1218_v4  ;;  %v215_v2 = vperm.slane %v3005_v24, 0  ;;  %v216_v41 = vperm.slane %v3005_v24, 4  ;;  %v745_v43 = vperm.slane %v3005_v24, 6 }
 0x120   :  { %5084 = vst [vmem:[#allocation44_spill] sm:$0xff] %v2992_v23  ;;  %v2994_v5 = vpop.permute.xlu0 %621  ;;  %2388 = vmatpush.msra.mxu3 %v1234_v26  ;;  %1241 = vmatpush.msra.mxu0 %v1218_v4  ;;  %v482_v23 = vperm.slane %v3005_v24, 1  ;;  %v483_v4 = vperm.slane %v3005_v24, 5 }
 0x121   :  { %5085 = vst [vmem:[#allocation45_spill] sm:$0xff] %v2994_v5  ;;  %2373 = vmatpush.msra.mxu2 %v1217_v40  ;;  %1354 = vmatpush.msra.mxu1 %v1234_v26  ;;  %v3036_v26 = vperm.slane %v215_v2, 0  ;;  %v3096_v33 = vperm.slane %v745_v43, 2  ;;  %v3113_v43 = vld [vmem:[%s4956_s3 + $0x38] sm:$0xff] }
 0x122   :  { %2389 = vmatpush.msra.mxu3 %v1233_v1  ;;  %1242 = vmatpush.msra.mxu0 %v1217_v40  ;;  %v3063_v47 = vperm.slane %v483_v4, 1  ;;  %v744_v40 = vperm.slane %v3005_v24, 2 }
 0x123   :  { %2374 = vmatpush.msra.mxu2 %v1216_v8  ;;  %v239_v2 = vmul.f32 %v3036_v26, %v2826_v48  ;;  %1355 = vmatpush.msra.mxu1 %v1233_v1  ;;  %v3083_v1 = vld [vmem:[%s4956_s3 + $0xc8] sm:$0xff] }
 0x124   :  { %2390 = vmatpush.msra.mxu3 %v1232_v19  ;;  %1243 = vmatpush.msra.mxu0 %v1216_v8  ;;  %v507_v4 = vmul.f32 %v3063_v47, %v2919_v44  ;;  %v3091_v8 = vld [vmem:[%s4956_s3 + $0x40] sm:$0xff] }
 0x125   :  { %1356 = vmatpush.msra.mxu1 %v1232_v19 }
 0x126   :  { %903 = vperm.xlu1 %2418, %v2633_v9   ;;  %971 = vperm.xlu2 %2416, %v2713_v22   ;;  %v1215_v9 = vld [vmem:[%s4956_s3 + $0x58] sm:$0xff] }
 0x127   :  { %919 = vperm.xlu0 %2417, %v2646_v11   ;;  %v3032_v3 = vpop.permute.xlu1 %625  ;;  %v3034_v21 = vpop.permute.xlu2 %661  ;;  %v1231_v22 = vld [vmem:[%s4956_s3 + $0xd8] sm:$0xff]  ;;  %v53_v11 = vld [vmem:[%s4958_s2] sm:$0x3]  ;;  %2375 = vmatpush.msra.mxu2 %v1215_v9 }
 0x128   :  { %5086 = vst [vmem:[#allocation46_spill] sm:$0xff] %v3032_v3  ;;  %v3038_v16 = vpop.permute.xlu0 %641  ;;  %v3049_v3 = vperm.slane %v216_v41, 0  ;;  %2391 = vmatpush.msra.mxu3 %v1231_v22  ;;  %1244 = vmatpush.msra.mxu0 %v1215_v9 }
 0x129   :  { %5087 = vst [vmem:[#allocation47_spill] sm:$0xff] %v3034_v21  ;;  %v3053_v21 = vperm.slane %v482_v23, 1  ;;  %v3067_v23 = vperm.slane %v53_v11, 0  ;;  %1357 = vmatpush.msra.mxu1 %v1231_v22  ;;  %v3152_v22 = vld [vmem:[%s4956_s3 + $0x28] sm:$0xff] }
 0x12a   :  { %5088 = vst [vmem:[#allocation48_spill] sm:$0xff] %v3038_v16  ;;  %v1214_v16 = vld [vmem:[%s4956_s3 + $0x50] sm:$0xff]  ;;  %v240_v41 = vmul.f32 %v3049_v3, %v2826_v48  ;;  %v3076_v48 = vperm.slane %v53_v11, 1  ;;  %2392 = vmatpush.msra.mxu3 %v1230_v45  ;;  %v3094_v11 = vperm.slane %v744_v40, 2 }
 0x12b   :  { %v506_v5 = vmul.f32 %v3053_v21, %v2919_v44  ;;  %2376 = vmatpush.msra.mxu2 %v1214_v16  ;;  %v308_v59 = vadd.f32 %v3067_v23, %v239_v2  ;;  %v512_v9 = vmul.f32 %v3053_v21, %v2928_v58  ;;  %1245 = vmatpush.msra.mxu0 %v1214_v16  ;;  %v3160_v16 = vld [vmem:[%s4956_s3 + $0xa8] sm:$0xff] }
 0x12c   :  { %v309_v44 = vadd.f32 %v3076_v48, %v240_v41  ;;  %2393 = vmatpush.msra.mxu3 %v3083_v1  ;;  %1358 = vmatpush.msra.mxu1 %v1230_v45 }
 0x12d   :  { %2377 = vmatpush.msra.mxu2 %v3074_v6  ;;  %1246 = vmatpush.msra.mxu0 %v3074_v6 }
 0x12e   :  { %975 = vperm.xlu1 %2418, %v2741_v27   ;;  %911 = vperm.xlu2 %2416, %v2623_v7   ;;  %v3107_v7 = vld [vmem:[%s4956_s3 + $0xc0] sm:$0xff]  ;;  %v570_v27 = vadd.f32 %v506_v5, %v308_v59  ;;  %v245_v59 = vmul.f32 %v3036_v26, %v2835_v51  ;;  %v3129_v5 = vld [vmem:[%s4956_s3 + $0x30] sm:$0xff] }
 0x12f   :  { %991 = vperm.xlu0 %2417, %v2754_v29   ;;  %v3099_v19 = vpop.permute.xlu1 %633  ;;  %v3101_v2 = vpop.permute.xlu2 %673  ;;  %v571_v29 = vadd.f32 %v507_v4, %v309_v44  ;;  %2378 = vmatpush.msra.mxu2 %v3091_v8 }
 0x130   :  { %5089 = vst [vmem:[#allocation49_spill] sm:$0xff] %v3099_v19  ;;  %v654_v36 = vpop.permute.xlu0 %653  ;;  %2394 = vmatpush.msra.mxu3 %v3107_v7  ;;  %v3144_v19 = vld [vmem:[%s4956_s3 + $0xb0] sm:$0xff]  ;;  %1359 = vmatpush.msra.mxu1 %v3083_v1  ;;  %v519_v1 = vmul.f32 %v3063_v47, %v2937_v50 }
 0x131   :  { %5090 = vst [vmem:[#allocation50_spill] sm:$0xff] %v3101_v2  ;;  %v768_v41 = vmul.f32 %v3094_v11, %v654_v36  ;;  %v769_v40 = vmul.f32 %v3096_v33, %v654_v36  ;;  %v3121_v2 = vld [vmem:[%s4956_s3 + $0xb8] sm:$0xff]  ;;  %v246_v36 = vmul.f32 %v3049_v3, %v2835_v51  ;;  %2379 = vmatpush.msra.mxu2 %v3113_v43 }
 0x132   :  { %2395 = vmatpush.msra.mxu3 %v3121_v2  ;;  %v513_v51 = vmul.f32 %v3063_v47, %v2928_v58  ;;  %1247 = vmatpush.msra.mxu0 %v3091_v8 }
 0x133   :  { %v3133_v4 = vadd.f32 %v768_v41, %v570_v27  ;;  %v3135_v44 = vadd.f32 %v769_v40, %v571_v29  ;;  %2380 = vmatpush.msra.mxu2 %v3129_v5  ;;  %v314_v27 = vadd.f32 %v3067_v23, %v245_v59  ;;  %v315_v58 = vadd.f32 %v3076_v48, %v246_v36  ;;  %v3180_v59 = vld [vmem:[%s4956_s3 + $0xa0] sm:$0xff] }
 0x134   :  { %2396 = vmatpush.msra.mxu3 %v3144_v19  ;;  %1360 = vmatpush.msra.mxu1 %v3107_v7 }
 0x135   :  { %5091 = vst [vmem:[#allocation51_spill] sm:$0xff] %v3133_v4  ;;  %v576_v45 = vadd.f32 %v512_v9, %v314_v27  ;;  %2381 = vmatpush.msra.mxu2 %v3152_v22  ;;  %v577_v36 = vadd.f32 %v513_v51, %v315_v58  ;;  %v262_v9 = vmul.f32 %v3049_v3, %v2821_v46  ;;  %v3201_v58 = vld [vmem:[%s4956_s3 + $0x98] sm:$0xff] }
 0x136   :  { %5092 = vst [vmem:[#allocation52_spill] sm:$0xff] %v3135_v44  ;;  %915 = vperm.xlu1 %2418, %v2651_v12   ;;  %983 = vperm.xlu2 %2416, %v2731_v25   ;;  %v3172_v12 = vld [vmem:[%s4956_s3 + $0x20] sm:$0xff]  ;;  %v261_v25 = vmul.f32 %v3036_v26, %v2821_v46  ;;  %v251_v27 = vmul.f32 %v3036_v26, %v2844_v54 }
 0x137   :  { %995 = vperm.xlu0 %2417, %v2749_v28   ;;  %v3164_v29 = vpop.permute.xlu1 %645  ;;  %v3166_v41 = vpop.permute.xlu2 %685  ;;  %2397 = vmatpush.msra.mxu3 %v3160_v16  ;;  %v252_v51 = vmul.f32 %v3049_v3, %v2844_v54  ;;  %v529_v46 = vmul.f32 %v3063_v47, %v2926_v37  ;;  %v518_v54 = vmul.f32 %v3053_v21, %v2937_v50  ;;  %v3239_v50 = vld [vmem:[%s4956_s3 + $0x8] sm:$0xff] }
 0x138   :  { %5093 = vst [vmem:[#allocation53_spill] sm:$0xff] %v3164_v29  ;;  %v666_v40 = vpop.permute.xlu0 %665  ;;  %v3188_v29 = vld [vmem:[%s4956_s3 + $0x18] sm:$0xff]  ;;  %2382 = vmatpush.msra.mxu2 %v3172_v12  ;;  %1248 = vmatpush.msra.mxu0 %v3113_v43  ;;  %v534_v43 = vmul.f32 %v3053_v21, %v2935_v35 }
 0x139   :  { %5094 = vst [vmem:[#allocation54_spill] sm:$0xff] %v3166_v41  ;;  %v774_v44 = vmul.f32 %v3094_v11, %v666_v40  ;;  %v775_v4 = vmul.f32 %v3096_v33, %v666_v40  ;;  %v528_v40 = vmul.f32 %v3053_v21, %v2926_v37  ;;  %2398 = vmatpush.msra.mxu3 %v3180_v59  ;;  %v3229_v37 = vld [vmem:[%s4956_s3 + $0x90] sm:$0xff] }
 0x13a   :  { %2383 = vmatpush.msra.mxu2 %v3188_v29  ;;  %v321_v8 = vadd.f32 %v3076_v48, %v252_v51  ;;  %1361 = vmatpush.msra.mxu1 %v3121_v2 }
 0x13b   :  { %v3205_v6 = vadd.f32 %v774_v44, %v576_v45  ;;  %v3207_v41 = vadd.f32 %v775_v4, %v577_v36  ;;  %v330_v4 = vadd.f32 %v3067_v23, %v261_v25  ;;  %2399 = vmatpush.msra.mxu3 %v3201_v58  ;;  %v331_v44 = vadd.f32 %v3076_v48, %v262_v9 }
 0x13c   :  { %v320_v45 = vadd.f32 %v3067_v23, %v251_v27  ;;  %2384 = vmatpush.msra.mxu2 %v3219_v17  ;;  %1249 = vmatpush.msra.mxu0 %v3129_v5 }
 0x13d   :  { %5095 = vst [vmem:[#allocation55_spill] sm:$0xff] %v3205_v6  ;;  %v592_v25 = vadd.f32 %v528_v40, %v330_v4  ;;  %2400 = vmatpush.msra.mxu3 %v3229_v37  ;;  %v3257_v40 = vld [vmem:[%s4956_s3] sm:$0xff]  ;;  %v583_v4 = vadd.f32 %v519_v1, %v321_v8  ;;  %1362 = vmatpush.msra.mxu1 %v3144_v19 }
 0x13e   :  { %5096 = vst [vmem:[#allocation56_spill] sm:$0xff] %v3207_v41  ;;  %987 = vperm.xlu1 %2418, %v2759_v30   ;;  %923 = vperm.xlu2 %2416, %v2641_v10   ;;  %v3249_v30 = vld [vmem:[%s4956_s3 + $0x88] sm:$0xff]  ;;  %v593_v10 = vadd.f32 %v529_v46, %v331_v44  ;;  %v582_v9 = vadd.f32 %v518_v54, %v320_v45  ;;  %v3265_v46 = vld [vmem:[%s4956_s3 + $0x80] sm:$0xff] }
 0x13f   :  { %999 = vperm.xlu0 %2417, %v2772_v32   ;;  %v3243_v36 = vpop.permute.xlu1 %657  ;;  %v698_v7 = vpop.permute.xlu2 %697  ;;  %2385 = vmatpush.msra.mxu2 %v3239_v50  ;;  %v267_v54 = vmul.f32 %v3036_v26, %v2830_v49  ;;  %v268_v44 = vmul.f32 %v3049_v3, %v2830_v49  ;;  %v535_v49 = vmul.f32 %v3063_v47, %v2935_v35 }
 0x140   :  { %5097 = vst [vmem:[#allocation57_spill] sm:$0xff] %v3243_v36  ;;  %v790_v27 = vmul.f32 %v3094_v11, %v698_v7  ;;  %v791_v41 = vmul.f32 %v3096_v33, %v698_v7  ;;  %v678_v51 = vpop.permute.xlu0 %677  ;;  %2401 = vmatpush.msra.mxu3 %v3249_v30  ;;  %1250 = vmatpush.msra.mxu0 %v3152_v22 }
 0x141   :  { %v780_v6 = vmul.f32 %v3094_v11, %v678_v51  ;;  %v781_v36 = vmul.f32 %v3096_v33, %v678_v51  ;;  %2386 = vmatpush.msra.mxu2 %v3257_v40  ;;  %1363 = vmatpush.msra.mxu1 %v3160_v16  ;;  %v264_v51 = vmul.f32 %v3049_v3, %v2861_v60 }
 0x142   :  { %v3272_v1 = vadd.f32 %v790_v27, %v592_v25  ;;  %v3274_v45 = vadd.f32 %v791_v41, %v593_v10  ;;  %2402 = vmatpush.msra.mxu3 %v3265_v46  ;;  %v336_v41 = vadd.f32 %v3067_v23, %v267_v54  ;;  %v5098_v25 = vmov 2   ;;  %1251 = vmatpush.msra.mxu0 %v3172_v12 }
 0x143   :  { %v3277_v8 = vadd.f32 %v780_v6, %v582_v9  ;;  %v3279_v7 = vadd.f32 %v781_v36, %v583_v4  ;;  %v337_v6 = vadd.f32 %v3076_v48, %v268_v44  ;;  %v274_v27 = vmul.f32 %v3049_v3, %v2839_v52  ;;  %1364 = vmatpush.msra.mxu1 %v3180_v59 }
 0x144   :  { %v598_v36 = vadd.f32 %v534_v43, %v336_v41  ;;  %v540_v22 = vmul.f32 %v3053_v21, %v2944_v34  ;;  %v530_v16 = vmul.f32 %v3053_v21, %v2957_v57  ;;  %1252 = vmatpush.msra.mxu0 %v3188_v29  ;;  %v253_v43 = vmul.f32 %v3036_v26, %v2842_v53 }
 0x145   :  { %v599_v10 = vadd.f32 %v535_v49, %v337_v6  ;;  %v343_v12 = vadd.f32 %v3076_v48, %v274_v27  ;;  %1365 = vmatpush.msra.mxu1 %v3201_v58  ;;  %v333_v49 = vadd.f32 %v3076_v48, %v264_v51  ;;  %v270_v29 = vmul.f32 %v3049_v3, %v2871_v63 }
 0x146   :  { %2419 = vset.pattern.permute.xlu1 %v5098_v25  ;;  %927 = vperm.xlu2 %2416, %v2669_v15   ;;  %v273_v15 = vmul.f32 %v3036_v26, %v2839_v52  ;;  %v541_v52 = vmul.f32 %v3063_v47, %v2944_v34  ;;  %v254_v34 = vmul.f32 %v3049_v3, %v2842_v53 }
 0x147   :  { %1003 = vperm.xlu0 %2417, %v2767_v31   ;;  %733 = vperm.xlu1 %2419, %v2749_v28   ;;  %v3296_v2 = vpop.permute.xlu1 %669  ;;  %v710_v35 = vpop.permute.xlu2 %709  ;;  %v263_v28 = vmul.f32 %v3036_v26, %v2861_v60  ;;  %v531_v60 = vmul.f32 %v3063_v47, %v2957_v57  ;;  %v269_v57 = vmul.f32 %v3036_v26, %v2871_v63 }
 0x148   :  { %v796_v5 = vmul.f32 %v3094_v11, %v710_v35  ;;  %v797_v19 = vmul.f32 %v3096_v33, %v710_v35  ;;  %v3300_v9 = vpop.permute.xlu0 %689  ;;  %v342_v44 = vadd.f32 %v3067_v23, %v273_v15  ;;  %1253 = vmatpush.msra.mxu0 %v3219_v17  ;;  %v605_v6 = vadd.f32 %v541_v52, %v343_v12 }
 0x149   :  { %v332_v59 = vadd.f32 %v3067_v23, %v263_v28  ;;  %1366 = vmatpush.msra.mxu1 %v3229_v37  ;;  %v595_v35 = vadd.f32 %v531_v60, %v333_v49  ;;  %v520_v37 = vmul.f32 %v3053_v21, %v2942_v0  ;;  %v323_v28 = vadd.f32 %v3076_v48, %v254_v34 }
 0x14a   :  { %v3312_v4 = vadd.f32 %v796_v5, %v598_v36  ;;  %v3314_v54 = vadd.f32 %v797_v19, %v599_v10  ;;  %v604_v41 = vadd.f32 %v540_v22, %v342_v44  ;;  %1254 = vmatpush.msra.mxu0 %v3239_v50  ;;  %v1006_v5 = vperm.slane %v3005_v24, 3 }
 0x14b   :  { %v594_v25 = vadd.f32 %v530_v16, %v332_v59  ;;  %1367 = vmatpush.msra.mxu1 %v3249_v30  ;;  %v521_v19 = vmul.f32 %v3063_v47, %v2942_v0  ;;  %v322_v50 = vadd.f32 %v3067_v23, %v253_v43  ;;  %v536_v30 = vmul.f32 %v3053_v21, %v2965_v56 }
 0x14c   :  { %1255 = vmatpush.msra.mxu0 %v3257_v40  ;;  %v537_v0 = vmul.f32 %v3063_v47, %v2965_v56  ;;  %v3374_v52 = vperm.slane %v1006_v5, 3  ;;  %v338_v60 = vadd.f32 %v3067_v23, %v269_v57  ;;  %v339_v44 = vadd.f32 %v3076_v48, %v270_v29 }
 0x14d   :  { %1368 = vmatpush.msra.mxu1 %v3265_v46  ;;  %v584_v12 = vadd.f32 %v520_v37, %v322_v50  ;;  %v585_v46 = vadd.f32 %v521_v19, %v323_v28  ;;  %v5099_v19 = vmov 3   ;;  %v221_v50 = vmul.f32 %v3036_v26, %v2799_v39 }
 0x14e   :  { %931 = vperm.xlu2 %2416, %v2664_v14   ;;  %v600_v56 = vadd.f32 %v536_v30, %v338_v60  ;;  %v601_v34 = vadd.f32 %v537_v0, %v339_v44  ;;  %v222_v28 = vmul.f32 %v3049_v3, %v2799_v39  ;;  %v223_v60 = vmul.f32 %v3036_v26, %v2808_v42 }
 0x14f   :  { %737 = vperm.xlu1 %2419, %v2772_v32   ;;  %v682_v53 = vpop.permute.xlu1 %681  ;;  %v722_v58 = vpop.permute.xlu2 %721  ;;  %v1007_v32 = vperm.slane %v3005_v24, 7  ;;  %v271_v44 = vmul.f32 %v3036_v26, %v2868_v62  ;;  %v488_v39 = vmul.f32 %v3053_v21, %v2864_v61 }
 0x150   :  { %v802_v36 = vmul.f32 %v3094_v11, %v722_v58  ;;  %v803_v10 = vmul.f32 %v3096_v33, %v722_v58  ;;  %v702_v14 = vpop.permute.xlu0 %701  ;;  %v782_v22 = vmul.f32 %v3094_v11, %v682_v53  ;;  %v783_v40 = vmul.f32 %v3096_v33, %v682_v53 }
 0x151   :  { %v792_v17 = vmul.f32 %v3094_v11, %v702_v14  ;;  %v793_v63 = vmul.f32 %v3096_v33, %v702_v14  ;;  %v3376_v16 = vperm.slane %v1007_v32, 3  ;;  %v542_v14 = vmul.f32 %v3053_v21, %v2974_v20 }
 0x152   :  { %v3356_v15 = vadd.f32 %v802_v36, %v604_v41  ;;  %v3358_v27 = vadd.f32 %v803_v10, %v605_v6  ;;  %v846_v59 = vadd.f32 %v782_v22, %v584_v12  ;;  %v847_v49 = vadd.f32 %v783_v40, %v585_v46 }
 0x153   :  { %v3363_v51 = vadd.f32 %v792_v17, %v594_v25  ;;  %v3365_v24 = vadd.f32 %v793_v63, %v595_v35  ;;  %v543_v17 = vmul.f32 %v3063_v47, %v2974_v20  ;;  %v272_v12 = vmul.f32 %v3049_v3, %v2868_v62 }
 0x156   :  { %935 = vperm.xlu2 %2416, %v2659_v13   ;;  %v275_v13 = vmul.f32 %v3036_v26, %v2880_v55 }
 0x157   :  { %741 = vperm.xlu1 %2419, %v2767_v31   ;;  %v3382_v43 = vpop.permute.xlu1 %693  ;;  %v276_v31 = vmul.f32 %v3049_v3, %v2880_v55 }
 0x158   :  { %v714_v41 = vpop.permute.xlu0 %713  ;;  %v944_v6 = vpop.permute.xlu2 %943  ;;  %v344_v32 = vadd.f32 %v3067_v23, %v275_v13  ;;  %v340_v13 = vadd.f32 %v3067_v23, %v271_v44 }
 0x159   :  { %v798_v53 = vmul.f32 %v3094_v11, %v714_v41  ;;  %v799_v57 = vmul.f32 %v3096_v33, %v714_v41  ;;  %v1044_v29 = vmul.f32 %v3374_v52, %v944_v6  ;;  %v1045_v58 = vmul.f32 %v3376_v16, %v944_v6 }
 0x15a   :  { %v345_v37 = vadd.f32 %v3076_v48, %v276_v31  ;;  %v606_v20 = vadd.f32 %v542_v14, %v344_v32  ;;  %v291_v6 = vadd.f32 %v3076_v48, %v222_v28  ;;  %v341_v31 = vadd.f32 %v3076_v48, %v272_v12  ;;  %v5102_v14 = vld [vmem:[#allocation18_spill] sm:$0xff] }
 0x15b   :  { %v3392_v25 = vadd.f32 %v798_v53, %v600_v56  ;;  %v3394_v35 = vadd.f32 %v799_v57, %v601_v34  ;;  %v1108_v36 = vadd.f32 %v1044_v29, %v846_v59  ;;  %v1109_v10 = vadd.f32 %v1045_v58, %v847_v49  ;;  %v5100_v49 = vld [vmem:[#allocation38_spill] sm:$0xff]  ;;  %v5101_v53 = vld [vmem:[#allocation37_spill] sm:$0xff] }
 0x15c   :  { %v607_v0 = vadd.f32 %v543_v17, %v345_v37  ;;  %v3428_v34 = vmul.f32 %v3036_v26, %v2797_v38  ;;  %v3432_v59 = vmul.f32 %v3049_v3, %v2797_v38  ;;  %v538_v62 = vmul.f32 %v3053_v21, %v5100_v49 }
 0x15d   :  { %v1172_v63 = vmax.f32 %v1108_v36, 0.0  ;;  %v1173_v5 = vmax.f32 %v1109_v10, 0.0  ;;  %v539_v41 = vmul.f32 %v3063_v47, %v5100_v49  ;;  %v750_v57 = vmul.f32 %v3094_v11, %v5101_v53  ;;  %v5104_v49 = vld [vmem:[#allocation40_spill] sm:$0xff] }
 0x15e   :  { %v751_v29 = vmul.f32 %v3096_v33, %v5101_v53  ;;  %v224_v38 = vmul.f32 %v3049_v3, %v2808_v42  ;;  %v292_v58 = vadd.f32 %v3067_v23, %v223_v60  ;;  %v277_v17 = vmul.f32 %v3036_v26, %v5102_v14  ;;  %v5106_v53 = vld [vmem:[#allocation8_spill] sm:$0xff] }
 0x15f   :  { %2420 = vset.pattern.permute.xlu1 %v5099_v19  ;;  %v3403_v55 = vpop.permute.xlu1 %705  ;;  %1304 = vmatmul.f32.vlgmr.msra.gmra.mxu2 %v1172_v63  ;;  %v278_v63 = vmul.f32 %v3049_v3, %v5102_v14  ;;  %v602_v32 = vadd.f32 %v538_v62, %v340_v13  ;;  %v603_v37 = vadd.f32 %v539_v41, %v341_v31 }
 0x160   :  { %1417 = vmatmul.f32.vlgmr.msra.gmra.mxu3 %v1173_v5  ;;  %v726_v30 = vpop.permute.xlu0 %725  ;;  %939 = vperm.xlu1 %2420, %v2687_v18   ;;  %v489_v18 = vmul.f32 %v3063_v47, %v2864_v61  ;;  %v290_v61 = vadd.f32 %v3067_v23, %v221_v50  ;;  %v5103_v50 = vld [vmem:[#allocation25_spill] sm:$0xff]  ;;  %v544_v62 = vmul.f32 %v3053_v21, %v5104_v49 }
 0x161   :  { %v804_v22 = vmul.f32 %v3094_v11, %v726_v30  ;;  %v805_v40 = vmul.f32 %v3096_v33, %v726_v30  ;;  %v490_v28 = vmul.f32 %v3053_v21, %v5103_v50  ;;  %v491_v30 = vmul.f32 %v3063_v47, %v5103_v50 }
 0x162   :  { %v552_v36 = vadd.f32 %v488_v39, %v290_v61  ;;  %v553_v10 = vadd.f32 %v489_v18, %v291_v6  ;;  %v293_v18 = vadd.f32 %v3076_v48, %v224_v38  ;;  %v545_v41 = vmul.f32 %v3063_v47, %v5104_v49  ;;  %v5105_v61 = vld [vmem:[#allocation45_spill] sm:$0xff] }
 0x163   :  { %v3422_v46 = vadd.f32 %v804_v22, %v606_v20  ;;  %v3424_v56 = vadd.f32 %v805_v40, %v607_v0  ;;  %v884_v22 = vpop.permute.xlu2 %883  ;;  %v752_v6 = vmul.f32 %v3094_v11, %v5105_v61  ;;  %v347_v38 = vadd.f32 %v3076_v48, %v278_v63 }
 0x164   :  { %v814_v20 = vadd.f32 %v750_v57, %v552_v36  ;;  %v815_v0 = vadd.f32 %v751_v29, %v553_v10  ;;  %v255_v57 = vmul.f32 %v3036_v26, %v5106_v53  ;;  %v753_v29 = vmul.f32 %v3096_v33, %v5105_v61  ;;  %v5108_v61 = vld [vmem:[#allocation30_spill] sm:$0xff] }
 0x165   :  { %v346_v36 = vadd.f32 %v3067_v23, %v277_v17  ;;  %v554_v10 = vadd.f32 %v490_v28, %v292_v58  ;;  %v555_v14 = vadd.f32 %v491_v30, %v293_v18  ;;  %v5107_v58 = vld [vmem:[#allocation23_spill] sm:$0xff] }
 0x166   :  { %v492_v28 = vmul.f32 %v3053_v21, %v5107_v58  ;;  %v493_v30 = vmul.f32 %v3063_v47, %v5107_v58 }
 0x167   :  { %v718_v5 = vpop.permute.xlu1 %717  ;;  %v608_v50 = vadd.f32 %v544_v62, %v346_v36  ;;  %v816_v49 = vadd.f32 %v752_v6, %v554_v10  ;;  %v294_v62 = vadd.f32 %v3067_v23, %v3428_v34  ;;  %v522_v6 = vmul.f32 %v3053_v21, %v5108_v61  ;;  %v5109_v36 = vld [vmem:[#allocation46_spill] sm:$0xff] }
 0x168   :  { %v800_v19 = vmul.f32 %v3094_v11, %v718_v5  ;;  %v801_v42 = vmul.f32 %v3096_v33, %v718_v5  ;;  %v1014_v5 = vmul.f32 %v3374_v52, %v884_v22  ;;  %v755_v34 = vmul.f32 %v3096_v33, %v5109_v36 }
 0x169   :  { %v880_v40 = vpop.permute.xlu0 %879  ;;  %v556_v10 = vadd.f32 %v492_v28, %v294_v62 }
 0x16a   :  { %v3459_v60 = vadd.f32 %v800_v19, %v602_v32  ;;  %v3461_v44 = vadd.f32 %v801_v42, %v603_v37  ;;  %v1012_v12 = vmul.f32 %v3374_v52, %v880_v40  ;;  %v1013_v39 = vmul.f32 %v3376_v16, %v880_v40 }
 0x16b   :  { %v1015_v32 = vmul.f32 %v3376_v16, %v884_v22  ;;  %v256_v42 = vmul.f32 %v3049_v3, %v5106_v53  ;;  %v609_v40 = vadd.f32 %v545_v41, %v347_v38  ;;  %v295_v41 = vadd.f32 %v3076_v48, %v3432_v59  ;;  %v5110_v59 = vld [vmem:[#allocation54_spill] sm:$0xff] }
 0x16c   :  { %v1076_v13 = vadd.f32 %v1012_v12, %v814_v20  ;;  %v1077_v31 = vadd.f32 %v1013_v39, %v815_v0  ;;  %v817_v0 = vadd.f32 %v753_v29, %v555_v14  ;;  %v1078_v39 = vadd.f32 %v1014_v5, %v816_v49  ;;  %v888_v29 = vpop.permute.xlu2 %887 }
 0x16d   :  { %v523_v53 = vmul.f32 %v3063_v47, %v5108_v61  ;;  %v754_v38 = vmul.f32 %v3094_v11, %v5109_v36  ;;  %v557_v14 = vadd.f32 %v493_v30, %v295_v41  ;;  %v784_v5 = vmul.f32 %v3094_v11, %v5110_v59  ;;  %v5112_v61 = vld [vmem:[#allocation33_spill] sm:$0xff] }
 0x16e   :  { %v1140_v37 = vmax.f32 %v1076_v13, 0.0  ;;  %v1141_v19 = vmax.f32 %v1077_v31, 0.0  ;;  %v1079_v18 = vadd.f32 %v1015_v32, %v817_v0  ;;  %v324_v13 = vadd.f32 %v3067_v23, %v255_v57 }
 0x16f   :  { %v730_v20 = vpop.permute.xlu1 %729  ;;  %v325_v31 = vadd.f32 %v3076_v48, %v256_v42  ;;  %v785_v32 = vmul.f32 %v3096_v33, %v5110_v59  ;;  %v1017_v57 = vmul.f32 %v3376_v16, %v888_v29 }
 0x170   :  { %v806_v17 = vmul.f32 %v3094_v11, %v730_v20  ;;  %v807_v63 = vmul.f32 %v3096_v33, %v730_v20  ;;  %1256 = vmatmul.f32.vlgmr.msra.gmra.mxu0 %v1140_v37  ;;  %1369 = vmatmul.f32.vlgmr.msra.gmra.mxu1 %v1141_v19  ;;  %v1016_v37 = vmul.f32 %v3374_v52, %v888_v29  ;;  %v1142_v19 = vmax.f32 %v1078_v39, 0.0 }
 0x171   :  { %v1143_v42 = vmax.f32 %v1079_v18, 0.0  ;;  %v586_v49 = vadd.f32 %v522_v6, %v324_v13  ;;  %v587_v20 = vadd.f32 %v523_v53, %v325_v31  ;;  %v524_v6 = vmul.f32 %v3053_v21, %v5112_v61  ;;  %v5113_v31 = vld [vmem:[#allocation7_spill] sm:$0xff] }
 0x172   :  { %v3488_v22 = vadd.f32 %v806_v17, %v608_v50  ;;  %v3490_v12 = vadd.f32 %v807_v63, %v609_v40  ;;  %v5111_v50 = vld [vmem:[#allocation15_spill] sm:$0xff]  ;;  %v818_v17 = vadd.f32 %v754_v38, %v556_v10  ;;  %v819_v63 = vadd.f32 %v755_v34, %v557_v14 }
 0x173   :  { %v257_v40 = vmul.f32 %v3036_v26, %v5111_v50  ;;  %v258_v0 = vmul.f32 %v3049_v3, %v5111_v50  ;;  %v848_v28 = vadd.f32 %v784_v5, %v586_v49  ;;  %v849_v30 = vadd.f32 %v785_v32, %v587_v20  ;;  %v5115_v50 = vld [vmem:[#allocation2_spill] sm:$0xff] }
 0x174   :  { %v1080_v18 = vadd.f32 %v1016_v37, %v818_v17  ;;  %v1081_v41 = vadd.f32 %v1017_v57, %v819_v63  ;;  %v525_v53 = vmul.f32 %v3063_v47, %v5112_v61  ;;  %v227_v36 = vmul.f32 %v3036_v26, %v5113_v31  ;;  %v5114_v37 = vld [vmem:[#allocation14_spill] sm:$0xff] }
 0x175   :  { %v326_v38 = vadd.f32 %v3067_v23, %v257_v40  ;;  %v327_v34 = vadd.f32 %v3076_v48, %v258_v0  ;;  %v786_v10 = vmul.f32 %v3094_v11, %v3300_v9  ;;  %v787_v14 = vmul.f32 %v3096_v33, %v3300_v9  ;;  %v5116_v17 = vld [vmem:[#allocation34_spill] sm:$0xff] }
 0x176   :  { %v228_v32 = vmul.f32 %v3049_v3, %v5113_v31  ;;  %v259_v57 = vmul.f32 %v3036_v26, %v5114_v37  ;;  %v229_v40 = vmul.f32 %v3036_v26, %v5115_v50  ;;  %v296_v0 = vadd.f32 %v3067_v23, %v227_v36 }
 0x177   :  { %v588_v49 = vadd.f32 %v524_v6, %v326_v38  ;;  %v589_v20 = vadd.f32 %v525_v53, %v327_v34  ;;  %v260_v9 = vmul.f32 %v3049_v3, %v5114_v37  ;;  %v526_v63 = vmul.f32 %v3053_v21, %v5116_v17  ;;  %v5117_v6 = vld [vmem:[#allocation17_spill] sm:$0xff] }
 0x178   :  { %1259 = vmatmul.f32.gmra.mxu0 %v1142_v19  ;;  %1372 = vmatmul.f32.gmra.mxu1 %v1143_v42  ;;  %v948_v58 = vpop.permute.xlu1 %947  ;;  %v1144_v19 = vmax.f32 %v1080_v18, 0.0  ;;  %v1145_v42 = vmax.f32 %v1081_v41, 0.0  ;;  %v297_v41 = vadd.f32 %v3076_v48, %v228_v32  ;;  %v328_v61 = vadd.f32 %v3067_v23, %v259_v57 }
 0x179   :  { %v1046_v62 = vmul.f32 %v3374_v52, %v948_v58  ;;  %v1047_v39 = vmul.f32 %v3376_v16, %v948_v58  ;;  %v956_v58 = vpop.permute.xlu0 %955  ;;  %v494_v53 = vmul.f32 %v3053_v21, %v5117_v6  ;;  %v788_v31 = vmul.f32 %v3094_v11, %v3382_v43 }
 0x17a   :  { %v329_v34 = vadd.f32 %v3076_v48, %v260_v9  ;;  %v1050_v37 = vmul.f32 %v3374_v52, %v956_v58  ;;  %v1051_v9 = vmul.f32 %v3376_v16, %v956_v58 }
 0x17b   :  { %v1110_v29 = vadd.f32 %v1046_v62, %v848_v28  ;;  %v1111_v13 = vadd.f32 %v1047_v39, %v849_v30  ;;  %v850_v30 = vadd.f32 %v786_v10, %v588_v49  ;;  %v851_v62 = vadd.f32 %v787_v14, %v589_v20  ;;  %v5118_v14 = vld [vmem:[#allocation39_spill] sm:$0xff] }
 0x17c   :  { %v590_v10 = vadd.f32 %v526_v63, %v328_v61  ;;  %v757_v32 = vmul.f32 %v3096_v33, %v5118_v14  ;;  %v558_v49 = vadd.f32 %v494_v53, %v296_v0  ;;  %v298_v53 = vadd.f32 %v3067_v23, %v229_v40 }
 0x17d   :  { %v1174_v59 = vmax.f32 %v1110_v29, 0.0  ;;  %v1175_v5 = vmax.f32 %v1111_v13, 0.0  ;;  %v527_v29 = vmul.f32 %v3063_v47, %v5116_v17  ;;  %v495_v13 = vmul.f32 %v3063_v47, %v5117_v6 }
 0x17e   :  { %v852_v63 = vadd.f32 %v788_v31, %v590_v10  ;;  %v5120_v31 = vld [vmem:[#allocation3_spill] sm:$0xff] }
 0x17f   :  { %1307 = vmatmul.f32.gmra.mxu2 %v1174_v59  ;;  %1420 = vmatmul.f32.gmra.mxu3 %v1175_v5  ;;  %v756_v59 = vmul.f32 %v3094_v11, %v5118_v14  ;;  %v789_v5 = vmul.f32 %v3096_v33, %v3382_v43  ;;  %v591_v20 = vadd.f32 %v527_v29, %v329_v34 }
 0x180   :  { %1262 = vmatmul.f32.gmra.mxu0 %v1144_v19  ;;  %1375 = vmatmul.f32.gmra.mxu1 %v1145_v42  ;;  %v952_v28 = vpop.permute.xlu1 %951  ;;  %v230_v42 = vmul.f32 %v3049_v3, %v5115_v50  ;;  %v559_v17 = vadd.f32 %v495_v13, %v297_v41  ;;  %v1114_v0 = vadd.f32 %v1050_v37, %v852_v63 }
 0x181   :  { %v1048_v39 = vmul.f32 %v3374_v52, %v952_v28  ;;  %v1049_v18 = vmul.f32 %v3376_v16, %v952_v28  ;;  %v5119_v28 = vld [vmem:[#allocation26_spill] sm:$0xff]  ;;  %v896_v29 = vpop.permute.xlu0 %895 }
 0x182   :  { %v496_v43 = vmul.f32 %v3053_v21, %v5119_v28  ;;  %v821_v61 = vadd.f32 %v757_v32, %v559_v17  ;;  %v299_v58 = vadd.f32 %v3076_v48, %v230_v42  ;;  %v497_v41 = vmul.f32 %v3063_v47, %v5119_v28  ;;  %v5122_v28 = vld [vmem:[#allocation19_spill] sm:$0xff] }
 0x183   :  { %v1112_v36 = vadd.f32 %v1048_v39, %v850_v30  ;;  %v1113_v38 = vadd.f32 %v1049_v18, %v851_v62  ;;  %v820_v30 = vadd.f32 %v756_v59, %v558_v49  ;;  %v853_v62 = vadd.f32 %v789_v5, %v591_v20  ;;  %v960_v39 = vpop.permute.xlu2 %959 }
 0x184   :  { %v232_v59 = vmul.f32 %v3049_v3, %v5120_v31  ;;  %v560_v5 = vadd.f32 %v496_v43, %v298_v53  ;;  %v1052_v32 = vmul.f32 %v3374_v52, %v960_v39  ;;  %v1020_v37 = vmul.f32 %v3374_v52, %v896_v29 }
 0x185   :  { %v1176_v57 = vmax.f32 %v1112_v36, 0.0  ;;  %v1177_v19 = vmax.f32 %v1113_v38, 0.0  ;;  %v1115_v13 = vadd.f32 %v1051_v9, %v853_v62  ;;  %v231_v36 = vmul.f32 %v3036_v26, %v5120_v31  ;;  %v5121_v38 = vld [vmem:[#allocation49_spill] sm:$0xff]  ;;  %v5124_v31 = vld [vmem:[#allocation10_spill] sm:$0xff] }
 0x186   :  { %v758_v34 = vmul.f32 %v3094_v11, %v5121_v38  ;;  %v759_v40 = vmul.f32 %v3096_v33, %v5121_v38  ;;  %v561_v49 = vadd.f32 %v497_v41, %v299_v58  ;;  %v1053_v20 = vmul.f32 %v3376_v16, %v960_v39 }
 0x187   :  { %1310 = vmatmul.f32.gmra.mxu2 %v1176_v57  ;;  %1423 = vmatmul.f32.gmra.mxu3 %v1177_v19  ;;  %v1178_v19 = vmax.f32 %v1114_v0, 0.0  ;;  %v1021_v9 = vmul.f32 %v3376_v16, %v896_v29  ;;  %v1179_v17 = vmax.f32 %v1115_v13, 0.0  ;;  %v498_v43 = vmul.f32 %v3053_v21, %v5122_v28  ;;  %v5123_v0 = vld [vmem:[#allocation9_spill] sm:$0xff] }
 0x188   :  { %v892_v18 = vpop.permute.xlu1 %891  ;;  %v822_v63 = vadd.f32 %v758_v34, %v560_v5  ;;  %v823_v62 = vadd.f32 %v759_v40, %v561_v49  ;;  %v301_v39 = vadd.f32 %v3076_v48, %v232_v59  ;;  %v3593_v53 = vmul.f32 %v3036_v26, %v5123_v0  ;;  %v5125_v34 = vld [vmem:[#allocation16_spill] sm:$0xff] }
 0x189   :  { %v1018_v6 = vmul.f32 %v3374_v52, %v892_v18  ;;  %v1019_v50 = vmul.f32 %v3376_v16, %v892_v18  ;;  %v3597_v58 = vmul.f32 %v3049_v3, %v5123_v0  ;;  %v1117_v13 = vadd.f32 %v1053_v20, %v3274_v45 }
 0x18a   :  { %v1085_v29 = vadd.f32 %v1021_v9, %v823_v62  ;;  %v234_v38 = vmul.f32 %v3049_v3, %v5124_v31  ;;  %v266_v59 = vmul.f32 %v3049_v3, %v5125_v34 }
 0x18b   :  { %v1082_v10 = vadd.f32 %v1018_v6, %v820_v30  ;;  %v1083_v14 = vadd.f32 %v1019_v50, %v821_v61  ;;  %v499_v30 = vmul.f32 %v3063_v47, %v5122_v28  ;;  %v300_v61 = vadd.f32 %v3067_v23, %v231_v36  ;;  %v900_v41 = vpop.permute.xlu2 %899 }
 0x18c   :  { %v1084_v6 = vadd.f32 %v1020_v37, %v822_v63  ;;  %v1116_v50 = vadd.f32 %v1052_v32, %v3272_v1  ;;  %v233_v36 = vmul.f32 %v3036_v26, %v5124_v31  ;;  %v265_v1 = vmul.f32 %v3036_v26, %v5125_v34 }
 0x18d   :  { %v1146_v57 = vmax.f32 %v1082_v10, 0.0  ;;  %v1147_v42 = vmax.f32 %v1083_v14, 0.0  ;;  %v5126_v10 = vld [vmem:[#allocation42_spill] sm:$0xff]  ;;  %v562_v5 = vadd.f32 %v498_v43, %v300_v61  ;;  %v563_v40 = vadd.f32 %v499_v30, %v301_v39  ;;  %v5128_v30 = vld [vmem:[#allocation36_spill] sm:$0xff] }
 0x18e   :  { %v760_v14 = vmul.f32 %v3094_v11, %v5126_v10  ;;  %v761_v45 = vmul.f32 %v3096_v33, %v5126_v10  ;;  %v1022_v32 = vmul.f32 %v3374_v52, %v900_v41  ;;  %v1149_v20 = vmax.f32 %v1085_v29, 0.0 }
 0x18f   :  { %1265 = vmatmul.f32.gmra.mxu0 %v1146_v57  ;;  %1313 = vmatmul.f32.gmra.mxu2 %v1178_v19  ;;  %v1148_v57 = vmax.f32 %v1084_v6, 0.0  ;;  %v1180_v19 = vmax.f32 %v1116_v50, 0.0  ;;  %v1181_v9 = vmax.f32 %v1117_v13, 0.0  ;;  %v532_v62 = vmul.f32 %v3053_v21, %v5128_v30  ;;  %v968_v6 = vpop.permute.xlu0 %967 }
 0x190   :  { %1378 = vmatmul.f32.gmra.mxu1 %v1147_v42  ;;  %1426 = vmatmul.f32.gmra.mxu3 %v1179_v17  ;;  %v964_v18 = vpop.permute.xlu1 %963  ;;  %v1023_v42 = vmul.f32 %v3376_v16, %v900_v41  ;;  %v5127_v17 = vld [vmem:[#allocation28_spill] sm:$0xff]  ;;  %v824_v43 = vadd.f32 %v760_v14, %v562_v5  ;;  %v533_v61 = vmul.f32 %v3063_v47, %v5128_v30 }
 0x191   :  { %v1054_v37 = vmul.f32 %v3374_v52, %v964_v18  ;;  %v1055_v49 = vmul.f32 %v3376_v16, %v964_v18  ;;  %v500_v63 = vmul.f32 %v3053_v21, %v5127_v17  ;;  %v501_v28 = vmul.f32 %v3063_v47, %v5127_v17  ;;  %v5130_v17 = vld [vmem:[#allocation29_spill] sm:$0xff] }
 0x192   :  { %v825_v39 = vadd.f32 %v761_v45, %v563_v40  ;;  %v302_v18 = vadd.f32 %v3067_v23, %v233_v36  ;;  %v303_v50 = vadd.f32 %v3076_v48, %v234_v38  ;;  %v1086_v0 = vadd.f32 %v1022_v32, %v824_v43  ;;  %v5129_v40 = vld [vmem:[#allocation48_spill] sm:$0xff] }
 0x193   :  { %v1118_v41 = vadd.f32 %v1054_v37, %v3363_v51  ;;  %v334_v29 = vadd.f32 %v3067_v23, %v265_v1  ;;  %v335_v13 = vadd.f32 %v3076_v48, %v266_v59  ;;  %v1119_v10 = vadd.f32 %v1055_v49, %v3365_v24  ;;  %v972_v59 = vpop.permute.xlu2 %971 }
 0x194   :  { %v1087_v34 = vadd.f32 %v1023_v42, %v825_v39  ;;  %v564_v14 = vadd.f32 %v500_v63, %v302_v18  ;;  %v565_v5 = vadd.f32 %v501_v28, %v303_v50  ;;  %v762_v45 = vmul.f32 %v3094_v11, %v5129_v40 }
 0x195   :  { %v794_v36 = vmul.f32 %v3094_v11, %v3403_v55  ;;  %v596_v38 = vadd.f32 %v532_v62, %v334_v29  ;;  %v597_v32 = vadd.f32 %v533_v61, %v335_v13  ;;  %v763_v51 = vmul.f32 %v3096_v33, %v5129_v40  ;;  %v5131_v29 = vld [vmem:[#allocation4_spill] sm:$0xff] }
 0x196   :  { %v795_v1 = vmul.f32 %v3096_v33, %v3403_v55  ;;  %v1056_v37 = vmul.f32 %v3374_v52, %v968_v6  ;;  %v1057_v42 = vmul.f32 %v3376_v16, %v968_v6  ;;  %v502_v63 = vmul.f32 %v3053_v21, %v5130_v17 }
 0x197   :  { %1268 = vmatmul.f32.gmra.mxu0 %v1148_v57  ;;  %1316 = vmatmul.f32.gmra.mxu2 %v1180_v19  ;;  %v1150_v57 = vmax.f32 %v1086_v0, 0.0  ;;  %v1182_v19 = vmax.f32 %v1118_v41, 0.0  ;;  %v826_v28 = vadd.f32 %v762_v45, %v564_v14  ;;  %v858_v43 = vadd.f32 %v794_v36, %v596_v38  ;;  %v908_v50 = vpop.permute.xlu0 %907 }
 0x198   :  { %1381 = vmatmul.f32.gmra.mxu1 %v1149_v20  ;;  %1429 = vmatmul.f32.gmra.mxu3 %v1181_v9  ;;  %v904_v31 = vpop.permute.xlu1 %903  ;;  %v1151_v20 = vmax.f32 %v1087_v34, 0.0  ;;  %v1183_v9 = vmax.f32 %v1119_v10, 0.0  ;;  %v503_v55 = vmul.f32 %v3063_v47, %v5130_v17  ;;  %v827_v30 = vadd.f32 %v763_v51, %v565_v5 }
 0x199   :  { %v1024_v24 = vmul.f32 %v3374_v52, %v904_v31  ;;  %v1025_v49 = vmul.f32 %v3376_v16, %v904_v31  ;;  %v859_v62 = vadd.f32 %v795_v1, %v597_v32  ;;  %v1120_v39 = vadd.f32 %v1056_v37, %v858_v43  ;;  %v5132_v31 = vld [vmem:[#allocation53_spill] sm:$0xff] }
 0x19a   :  { %v304_v6 = vadd.f32 %v3067_v23, %v3593_v53  ;;  %v305_v18 = vadd.f32 %v3076_v48, %v3597_v58  ;;  %v237_v13 = vmul.f32 %v3036_v26, %v5131_v29  ;;  %v764_v34 = vmul.f32 %v3094_v11, %v5132_v31 }
 0x19b   :  { %v1088_v61 = vadd.f32 %v1024_v24, %v826_v28  ;;  %v1089_v0 = vadd.f32 %v1025_v49, %v827_v30  ;;  %v1121_v41 = vadd.f32 %v1057_v42, %v859_v62  ;;  %v238_v10 = vmul.f32 %v3049_v3, %v5131_v29 }
 0x19c   :  { %v566_v14 = vadd.f32 %v502_v63, %v304_v6  ;;  %v567_v5 = vadd.f32 %v503_v55, %v305_v18  ;;  %v765_v53 = vmul.f32 %v3096_v33, %v5132_v31  ;;  %v1058_v40 = vmul.f32 %v3374_v52, %v972_v59  ;;  %v5134_v55 = vld [vmem:[#allocation44_spill] sm:$0xff] }
 0x19d   :  { %v1026_v58 = vmul.f32 %v3374_v52, %v908_v50  ;;  %v1152_v45 = vmax.f32 %v1088_v61, 0.0  ;;  %v1184_v36 = vmax.f32 %v1120_v39, 0.0  ;;  %v1059_v38 = vmul.f32 %v3376_v16, %v972_v59 }
 0x19e   :  { %v1027_v32 = vmul.f32 %v3376_v16, %v908_v50  ;;  %v1153_v1 = vmax.f32 %v1089_v0, 0.0  ;;  %v1185_v37 = vmax.f32 %v1121_v41, 0.0  ;;  %v828_v24 = vadd.f32 %v764_v34, %v566_v14 }
 0x19f   :  { %1271 = vmatmul.f32.gmra.mxu0 %v1150_v57  ;;  %1319 = vmatmul.f32.gmra.mxu2 %v1182_v19  ;;  %v912_v57 = vpop.permute.xlu2 %911  ;;  %v5133_v19 = vld [vmem:[#allocation22_spill] sm:$0xff]  ;;  %v1122_v59 = vadd.f32 %v1058_v40, %v3312_v4  ;;  %v306_v17 = vadd.f32 %v3067_v23, %v237_v13  ;;  %v307_v63 = vadd.f32 %v3076_v48, %v238_v10  ;;  %v980_v34 = vpop.permute.xlu0 %979 }
 0x1a0   :  { %1384 = vmatmul.f32.gmra.mxu1 %v1151_v20  ;;  %1432 = vmatmul.f32.gmra.mxu3 %v1183_v9  ;;  %v976_v51 = vpop.permute.xlu1 %975  ;;  %v504_v42 = vmul.f32 %v3053_v21, %v5133_v19  ;;  %v505_v49 = vmul.f32 %v3063_v47, %v5133_v19  ;;  %v829_v20 = vadd.f32 %v765_v53, %v567_v5 }
 0x1a1   :  { %v1090_v9 = vadd.f32 %v1026_v58, %v828_v24  ;;  %v1123_v43 = vadd.f32 %v1059_v38, %v3314_v54  ;;  %v766_v30 = vmul.f32 %v3094_v11, %v5134_v55  ;;  %v767_v39 = vmul.f32 %v3096_v33, %v5134_v55  ;;  %v5138_v55 = vld [vmem:[#allocation52_spill] sm:$0xff] }
 0x1a2   :  { %v1091_v28 = vadd.f32 %v1027_v32, %v829_v20  ;;  %v568_v62 = vadd.f32 %v504_v42, %v306_v17  ;;  %v569_v61 = vadd.f32 %v505_v49, %v307_v63  ;;  %v1028_v6 = vmul.f32 %v3374_v52, %v912_v57  ;;  %v5137_v20 = vld [vmem:[#allocation51_spill] sm:$0xff] }
 0x1a3   :  { %v1060_v18 = vmul.f32 %v3374_v52, %v976_v51  ;;  %v1154_v4 = vmax.f32 %v1090_v9, 0.0  ;;  %v1186_v50 = vmax.f32 %v1122_v59, 0.0  ;;  %v1029_v0 = vmul.f32 %v3376_v16, %v912_v57 }
 0x1a4   :  { %v1061_v41 = vmul.f32 %v3376_v16, %v976_v51  ;;  %v1155_v29 = vmax.f32 %v1091_v28, 0.0  ;;  %v1187_v54 = vmax.f32 %v1123_v43, 0.0  ;;  %v830_v13 = vadd.f32 %v766_v30, %v568_v62 }
 0x1a5   :  { %v831_v31 = vadd.f32 %v767_v39, %v569_v61  ;;  %v1124_v53 = vadd.f32 %v1060_v18, %v3392_v25  ;;  %v1062_v32 = vmul.f32 %v3374_v52, %v980_v34  ;;  %v1063_v24 = vmul.f32 %v3376_v16, %v980_v34  ;;  %v5139_v61 = vld [vmem:[#allocation5_spill] sm:$0xff] }
 0x1a6   :  { %v1092_v5 = vadd.f32 %v1028_v6, %v830_v13  ;;  %v1125_v58 = vadd.f32 %v1061_v41, %v3394_v35  ;;  %v5136_v35 = vld [vmem:[#allocation31_spill] sm:$0xff]  ;;  %v243_v39 = vmul.f32 %v3036_v26, %v5139_v61  ;;  %v5140_v6 = vld [vmem:[#allocation57_spill] sm:$0xff] }
 0x1a7   :  { %1274 = vmatmul.f32.gmra.mxu0 %v1152_v45  ;;  %1322 = vmatmul.f32.gmra.mxu2 %v1184_v36  ;;  %v984_v14 = vpop.permute.xlu2 %983  ;;  %v1093_v40 = vadd.f32 %v1029_v0, %v831_v31  ;;  %v5135_v45 = vld [vmem:[#allocation11_spill] sm:$0xff]  ;;  %v508_v42 = vmul.f32 %v3053_v21, %v5136_v35  ;;  %v509_v49 = vmul.f32 %v3063_v47, %v5136_v35  ;;  %v920_v28 = vpop.permute.xlu0 %919 }
 0x1a8   :  { %1387 = vmatmul.f32.gmra.mxu1 %v1153_v1  ;;  %1435 = vmatmul.f32.gmra.mxu3 %v1185_v37  ;;  %v916_v10 = vpop.permute.xlu1 %915  ;;  %v241_v36 = vmul.f32 %v3036_v26, %v5135_v45  ;;  %v242_v38 = vmul.f32 %v3049_v3, %v5135_v45  ;;  %v1156_v1 = vmax.f32 %v1092_v5, 0.0  ;;  %v1188_v37 = vmax.f32 %v1124_v53, 0.0 }
 0x1a9   :  { %v1030_v51 = vmul.f32 %v3374_v52, %v916_v10  ;;  %v1031_v57 = vmul.f32 %v3376_v16, %v916_v10  ;;  %v1157_v25 = vmax.f32 %v1093_v40, 0.0  ;;  %v1189_v19 = vmax.f32 %v1125_v58, 0.0  ;;  %v5141_v40 = vld [vmem:[#allocation24_spill] sm:$0xff] }
 0x1aa   :  { %v1126_v59 = vadd.f32 %v1062_v32, %v3459_v60  ;;  %v310_v17 = vadd.f32 %v3067_v23, %v241_v36  ;;  %v311_v63 = vadd.f32 %v3076_v48, %v242_v38  ;;  %v1127_v62 = vadd.f32 %v1063_v24, %v3461_v44  ;;  %v5142_v24 = vld [vmem:[#allocation47_spill] sm:$0xff] }
 0x1ab   :  { %v1094_v9 = vadd.f32 %v1030_v51, %v5137_v20  ;;  %v1095_v30 = vadd.f32 %v1031_v57, %v5138_v55  ;;  %v770_v18 = vmul.f32 %v3094_v11, %v5140_v6  ;;  %v244_v60 = vmul.f32 %v3049_v3, %v5139_v61 }
 0x1ac   :  { %v573_v0 = vadd.f32 %v509_v49, %v311_v63  ;;  %v771_v41 = vmul.f32 %v3096_v33, %v5140_v6  ;;  %v1190_v13 = vmax.f32 %v1126_v59, 0.0  ;;  %v1065_v31 = vmul.f32 %v3376_v16, %v984_v14  ;;  %v5144_v6 = vld [vmem:[#allocation12_spill] sm:$0xff] }
 0x1ad   :  { %v1158_v44 = vmax.f32 %v1094_v9, 0.0  ;;  %v1033_v34 = vmul.f32 %v3376_v16, %v920_v28  ;;  %v1159_v10 = vmax.f32 %v1095_v30, 0.0  ;;  %v1191_v5 = vmax.f32 %v1127_v62, 0.0  ;;  %v5143_v30 = vld [vmem:[#allocation6_spill] sm:$0xff] }
 0x1ae   :  { %v510_v58 = vmul.f32 %v3053_v21, %v5141_v40  ;;  %v511_v45 = vmul.f32 %v3063_v47, %v5141_v40  ;;  %v835_v36 = vadd.f32 %v771_v41, %v573_v0  ;;  %v313_v51 = vadd.f32 %v3076_v48, %v244_v60 }
 0x1af   :  { %1277 = vmatmul.f32.gmra.mxu0 %v1154_v4  ;;  %1325 = vmatmul.f32.gmra.mxu2 %v1186_v50  ;;  %v924_v4 = vpop.permute.xlu2 %923  ;;  %v572_v50 = vadd.f32 %v508_v42, %v310_v17  ;;  %v772_v57 = vmul.f32 %v3094_v11, %v5142_v24  ;;  %v773_v35 = vmul.f32 %v3096_v33, %v5142_v24  ;;  %v992_v63 = vpop.permute.xlu0 %991 }
 0x1b0   :  { %1390 = vmatmul.f32.gmra.mxu1 %v1155_v29  ;;  %1438 = vmatmul.f32.gmra.mxu3 %v1187_v54  ;;  %v988_v43 = vpop.permute.xlu1 %987  ;;  %v1064_v29 = vmul.f32 %v3374_v52, %v984_v14  ;;  %v1032_v54 = vmul.f32 %v3374_v52, %v920_v28  ;;  %v312_v14 = vadd.f32 %v3067_v23, %v243_v39 }
 0x1b1   :  { %v834_v53 = vadd.f32 %v770_v18, %v572_v50  ;;  %v1034_v49 = vmul.f32 %v3374_v52, %v924_v4  ;;  %v1035_v17 = vmul.f32 %v3376_v16, %v924_v4  ;;  %v249_v62 = vmul.f32 %v3036_v26, %v5143_v30 }
 0x1b2   :  { %v1128_v32 = vadd.f32 %v1064_v29, %v3356_v15  ;;  %v1066_v15 = vmul.f32 %v3374_v52, %v988_v43  ;;  %v250_v61 = vmul.f32 %v3049_v3, %v5143_v30  ;;  %v247_v18 = vmul.f32 %v3036_v26, %v5144_v6 }
 0x1b3   :  { %v1096_v38 = vadd.f32 %v1032_v54, %v834_v53  ;;  %v248_v4 = vmul.f32 %v3049_v3, %v5144_v6  ;;  %v3737_v29 = vadd.f32 %v3067_v23, %v249_v62  ;;  %v5145_v54 = vld [vmem:[#allocation13_spill] sm:$0xff]  ;;  %v1068_v53 = vmul.f32 %v3374_v52, %v992_v63 }
 0x1b4   :  { %v1192_v59 = vmax.f32 %v1128_v32, 0.0  ;;  %v1130_v50 = vadd.f32 %v1066_v15, %v3422_v46  ;;  %v5146_v46 = vld [vmem:[#allocation21_spill] sm:$0xff] }
 0x1b5   :  { %v1160_v9 = vmax.f32 %v1096_v38, 0.0  ;;  %v282_v15 = vmul.f32 %v3049_v3, %v5146_v46 }
 0x1b7   :  { %1280 = vmatmul.f32.gmra.mxu0 %v1156_v1  ;;  %1328 = vmatmul.f32.gmra.mxu2 %v1188_v37  ;;  %v1097_v1 = vadd.f32 %v1033_v34, %v835_v36  ;;  %v1129_v37 = vadd.f32 %v1065_v31, %v3358_v27  ;;  %v928_v20 = vpop.permute.xlu2 %927  ;;  %v1067_v27 = vmul.f32 %v3376_v16, %v988_v43 }
 0x1b8   :  { %1393 = vmatmul.f32.gmra.mxu1 %v1157_v25  ;;  %1441 = vmatmul.f32.gmra.mxu3 %v1189_v19  ;;  %v574_v25 = vadd.f32 %v510_v58, %v312_v14  ;;  %v575_v19 = vadd.f32 %v511_v45, %v313_v51  ;;  %v3744_v31 = vadd.f32 %v3076_v48, %v250_v61  ;;  %v1194_v58 = vmax.f32 %v1130_v50, 0.0  ;;  %v5151_v61 = vld [vmem:[#allocation27_spill] sm:$0xff] }
 0x1b9   :  { %v734_v42 = vpop.permute.xlu1 %733  ;;  %v1161_v28 = vmax.f32 %v1097_v1, 0.0  ;;  %v1193_v55 = vmax.f32 %v1129_v37, 0.0  ;;  %v1131_v41 = vadd.f32 %v1067_v27, %v3424_v56  ;;  %v316_v34 = vadd.f32 %v3067_v23, %v247_v18  ;;  %v5147_v37 = vld [vmem:[#allocation35_spill] sm:$0xff] }
 0x1ba   :  { %v836_v39 = vadd.f32 %v772_v57, %v574_v25  ;;  %v837_v60 = vadd.f32 %v773_v35, %v575_v19  ;;  %v1036_v56 = vmul.f32 %v3374_v52, %v928_v20  ;;  %v1037_v45 = vmul.f32 %v3376_v16, %v928_v20  ;;  %v5148_v25 = vld [vmem:[#allocation32_spill] sm:$0xff]  ;;  %v996_v20 = vpop.permute.xlu0 %995 }
 0x1bb   :  { %v1069_v36 = vmul.f32 %v3376_v16, %v992_v63  ;;  %v1195_v14 = vmax.f32 %v1131_v41, 0.0  ;;  %v546_v24 = vmul.f32 %v3053_v21, %v5147_v37  ;;  %v514_v19 = vmul.f32 %v3053_v21, %v5148_v25 }
 0x1bc   :  { %v1098_v43 = vadd.f32 %v1034_v49, %v836_v39  ;;  %v1099_v0 = vadd.f32 %v1035_v17, %v837_v60  ;;  %v515_v35 = vmul.f32 %v3063_v47, %v5148_v25  ;;  %v547_v49 = vmul.f32 %v3063_v47, %v5147_v37 }
 0x1bd   :  { %v1132_v63 = vadd.f32 %v1068_v53, %v3488_v22  ;;  %v1133_v62 = vadd.f32 %v1069_v36, %v3490_v12  ;;  %v516_v39 = vmul.f32 %v3053_v21, %v5151_v61  ;;  %v517_v6 = vmul.f32 %v3063_v47, %v5151_v61 }
 0x1be   :  { %v1162_v40 = vmax.f32 %v1098_v43, 0.0  ;;  %v1163_v32 = vmax.f32 %v1099_v0, 0.0  ;;  %v578_v60 = vadd.f32 %v514_v19, %v316_v34  ;;  %v1070_v34 = vmul.f32 %v3374_v52, %v996_v20 }
 0x1bf   :  { %1283 = vmatmul.f32.gmra.mxu0 %v1158_v44  ;;  %1331 = vmatmul.f32.gmra.mxu2 %v1190_v13  ;;  %v279_v44 = vmul.f32 %v3036_v26, %v5145_v54  ;;  %v280_v13 = vmul.f32 %v3049_v3, %v5145_v54  ;;  %v932_v57 = vpop.permute.xlu2 %931  ;;  %v1196_v41 = vmax.f32 %v1132_v63, 0.0  ;;  %v351_v37 = vadd.f32 %v3076_v48, %v282_v15 }
 0x1c0   :  { %1396 = vmatmul.f32.gmra.mxu1 %v1159_v10  ;;  %1444 = vmatmul.f32.gmra.mxu3 %v1191_v5  ;;  %v317_v10 = vadd.f32 %v3076_v48, %v248_v4  ;;  %v281_v5 = vmul.f32 %v3036_v26, %v5146_v46  ;;  %v776_v4 = vmul.f32 %v3094_v11, %v3296_v2  ;;  %v1197_v46 = vmax.f32 %v1133_v62, 0.0 }
 0x1c1   :  { %v738_v38 = vpop.permute.xlu1 %737  ;;  %v348_v51 = vadd.f32 %v3067_v23, %v279_v44  ;;  %v349_v1 = vadd.f32 %v3076_v48, %v280_v13  ;;  %v1038_v50 = vmul.f32 %v3374_v52, %v932_v57  ;;  %v1039_v54 = vmul.f32 %v3376_v16, %v932_v57 }
 0x1c2   :  { %v350_v27 = vadd.f32 %v3067_v23, %v281_v5  ;;  %v579_v22 = vadd.f32 %v515_v35, %v317_v10  ;;  %v5152_v5 = vld [vmem:[#allocation41_spill] sm:$0xff]  ;;  %v840_v53 = vadd.f32 %v776_v4, %v578_v60  ;;  %v811_v57 = vmul.f32 %v3096_v33, %v738_v38  ;;  %v5154_v35 = vld [vmem:[#allocation20_spill] sm:$0xff]  ;;  %v5155_v4 = vld [vmem:[#allocation43_spill] sm:$0xff] }
 0x1c3   :  { %v610_v18 = vadd.f32 %v546_v24, %v348_v51  ;;  %v611_v43 = vadd.f32 %v547_v49, %v349_v1  ;;  %v1000_v24 = vpop.permute.xlu0 %999  ;;  %v283_v49 = vmul.f32 %v3036_v26, %v5154_v35 }
 0x1c4   :  { %v1102_v51 = vadd.f32 %v1038_v50, %v840_v53  ;;  %v1073_v60 = vmul.f32 %v3376_v16, %v1000_v24 }
 0x1c7   :  { %1286 = vmatmul.f32.gmra.mxu0 %v1160_v9  ;;  %1334 = vmatmul.f32.gmra.mxu2 %v1192_v59  ;;  %v808_v9 = vmul.f32 %v3094_v11, %v734_v42  ;;  %v5149_v59 = vld [vmem:[#allocation55_spill] sm:$0xff] }
 0x1c8   :  { %1399 = vmatmul.f32.gmra.mxu1 %v1161_v28  ;;  %1447 = vmatmul.f32.gmra.mxu3 %v1193_v55  ;;  %v1100_v17 = vadd.f32 %v1036_v56, %v5149_v59  ;;  %v809_v28 = vmul.f32 %v3096_v33, %v734_v42  ;;  %v5150_v55 = vld [vmem:[#allocation56_spill] sm:$0xff]  ;;  %v777_v42 = vmul.f32 %v3096_v33, %v3296_v2 }
 0x1c9   :  { %v1101_v30 = vadd.f32 %v1037_v45, %v5150_v55  ;;  %v872_v0 = vadd.f32 %v808_v9, %v610_v18  ;;  %v548_v56 = vmul.f32 %v3053_v21, %v5152_v5  ;;  %v549_v2 = vmul.f32 %v3063_v47, %v5152_v5  ;;  %v5153_v45 = vld [vmem:[#allocation50_spill] sm:$0xff] }
 0x1ca   :  { %v1164_v12 = vmax.f32 %v1100_v17, 0.0  ;;  %v873_v44 = vadd.f32 %v809_v28, %v611_v43  ;;  %v841_v10 = vadd.f32 %v777_v42, %v579_v22  ;;  %v778_v36 = vmul.f32 %v3094_v11, %v5153_v45 }
 0x1cb   :  { %v1165_v13 = vmax.f32 %v1101_v30, 0.0  ;;  %v1134_v1 = vadd.f32 %v1070_v34, %v872_v0  ;;  %v580_v9 = vadd.f32 %v516_v39, %v3737_v29  ;;  %v612_v59 = vadd.f32 %v548_v56, %v350_v27  ;;  %v3812_v39 = vld [vmem:[%s4959_s4] ss:$0 sm:$0xff]  ;;  %v1004_v5 = vpop.permute.xlu0 %1003 }
 0x1cc   :  { %v1103_v25 = vadd.f32 %v1039_v54, %v841_v10  ;;  %v581_v17 = vadd.f32 %v517_v6, %v3744_v31  ;;  %v613_v63 = vadd.f32 %v549_v2, %v351_v37  ;;  %v779_v15 = vmul.f32 %v3096_v33, %v5153_v45 }
 0x1cd   :  { %v1166_v30 = vmax.f32 %v1102_v51, 0.0  ;;  %v1198_v62 = vmax.f32 %v1134_v1, 0.0  ;;  %v550_v29 = vmul.f32 %v3053_v21, %v5155_v4  ;;  %v551_v31 = vmul.f32 %v3063_v47, %v5155_v4 }
 0x1ce   :  { %v875_v61 = vadd.f32 %v811_v57, %v613_v63  ;;  %v1167_v18 = vmax.f32 %v1103_v25, 0.0  ;;  %v1072_v27 = vmul.f32 %v3374_v52, %v1000_v24  ;;  %v843_v6 = vadd.f32 %v779_v15, %v581_v17 }
 0x1cf   :  { %1289 = vmatmul.f32.gmra.mxu0 %v1162_v40  ;;  %1337 = vmatmul.f32.gmra.mxu2 %v1194_v58  ;;  %v1071_v40 = vmul.f32 %v3376_v16, %v996_v20  ;;  %v742_v58 = vpop.permute.xlu1 %741  ;;  %v284_v20 = vmul.f32 %v3049_v3, %v5154_v35  ;;  %v352_v21 = vadd.f32 %v3067_v23, %v283_v49 }
 0x1d0   :  { %1402 = vmatmul.f32.gmra.mxu1 %v1163_v32  ;;  %1450 = vmatmul.f32.gmra.mxu3 %v1195_v14  ;;  %v936_v32 = vpop.permute.xlu2 %935  ;;  %v810_v14 = vmul.f32 %v3094_v11, %v738_v38  ;;  %v842_v38 = vadd.f32 %v778_v36, %v580_v9  ;;  %v812_v43 = vmul.f32 %v3094_v11, %v742_v58  ;;  %v1466_v36 = vlaneseq }
 0x1d1   :  { %v1135_v19 = vadd.f32 %v1071_v40, %v873_v44  ;;  %v1040_v28 = vmul.f32 %v3374_v52, %v936_v32  ;;  %v1041_v26 = vmul.f32 %v3376_v16, %v936_v32  ;;  %v353_v42 = vadd.f32 %v3076_v48, %v284_v20 }
 0x1d2   :  { %v874_v55 = vadd.f32 %v810_v14, %v612_v59  ;;  %v813_v50 = vmul.f32 %v3096_v33, %v742_v58  ;;  %v1137_v54 = vadd.f32 %v1073_v60, %v875_v61  ;;  %v614_v44 = vadd.f32 %v550_v29, %v352_v21 }
 0x1d3   :  { %v1199_v3 = vmax.f32 %v1135_v19, 0.0  ;;  %v1104_v22 = vadd.f32 %v1040_v28, %v842_v38  ;;  %v1074_v58 = vmul.f32 %v3374_v52, %v1004_v5  ;;  %v1075_v45 = vmul.f32 %v3376_v16, %v1004_v5 }
 0x1d4   :  { %v1136_v47 = vadd.f32 %v1072_v27, %v874_v55  ;;  %v876_v34 = vadd.f32 %v812_v43, %v614_v44  ;;  %v1201_v40 = vmax.f32 %v1137_v54, 0.0  ;;  %v3828_v37 = vand.u32 127, %v1466_v36 }
 0x1d5   :  { %v1168_v53 = vmax.f32 %v1104_v22, 0.0 }
 0x1d6   :  { %v1200_v2 = vmax.f32 %v1136_v47, 0.0  ;;  %v1138_v14 = vadd.f32 %v1074_v58, %v876_v34  ;;  %vm1468_vm0 = vcmp.lt.s32.totalorder %v3828_v37, 2  ;;  %vm2302_vm2 = vcmp.eq.s32.totalorder %v3828_v37, 2 }
 0x1d7   :  { %1292 = vmatmul.f32.gmra.mxu0 %v1164_v12  ;;  %1340 = vmatmul.f32.gmra.mxu2 %v1196_v41  ;;  %v940_v0 = vpop.permute.xlu1 %939  ;;  %v1105_v41 = vadd.f32 %v1041_v26, %v843_v6 }
 0x1d8   :  { %1405 = vmatmul.f32.gmra.mxu1 %v1165_v13  ;;  %1453 = vmatmul.f32.gmra.mxu3 %v1197_v46  ;;  %v615_v46 = vadd.f32 %v551_v31, %v353_v42  ;;  %v1042_v23 = vmul.f32 %v3374_v52, %v940_v0  ;;  %v1043_v33 = vmul.f32 %v3376_v16, %v940_v0  ;;  %v1202_v19 = vmax.f32 %v1138_v14, 0.0 }
 0x1d9   :  { %v1169_v10 = vmax.f32 %v1105_v41, 0.0 }
 0x1da   :  { %v877_v48 = vadd.f32 %v813_v50, %v615_v46  ;;  %v1106_v32 = vadd.f32 %v1042_v23, %v3277_v8  ;;  %v1107_v51 = vadd.f32 %v1043_v33, %v3279_v7 }
 0x1dc   :  { %v1139_v1 = vadd.f32 %v1075_v45, %v877_v48  ;;  %v1170_v25 = vmax.f32 %v1106_v32, 0.0  ;;  %v1171_v35 = vmax.f32 %v1107_v51, 0.0 }
 0x1de   :  { %v1203_v49 = vmax.f32 %v1139_v1, 0.0 }
 0x1df   :  { %1295 = vmatmul.f32.gmra.mxu0 %v1166_v30  ;;  %1343 = vmatmul.f32.gmra.mxu2 %v1198_v62 }
 0x1e0   :  { %1408 = vmatmul.f32.gmra.mxu1 %v1167_v18  ;;  %1456 = vmatmul.f32.gmra.mxu3 %v1199_v3 }
 0x1e2   :  { %v1305_v12 = vpop.f32.mrf.mxu2 }
 0x1e3   :  { %v1306_v13 = vadd.f32 %v3812_v39, %v1305_v12  ;;  %v1418_v56 = vpop.f32.mrf.mxu3 }
 0x1e5   :  { %v3821_v11 = vadd.f32 %v1418_v56, %v1306_v13 }
 0x1e7   :  { %1298 = vmatmul.f32.gmra.mxu0 %v1168_v53  ;;  %1346 = vmatmul.f32.gmra.mxu2 %v1200_v2 }
 0x1e8   :  { %1411 = vmatmul.f32.gmra.mxu1 %v1169_v10  ;;  %1459 = vmatmul.f32.gmra.mxu3 %v1201_v40 }
 0x1ed   :  { %v1257_v24 = vpop.f32.mrf.mxu0  ;;  %v1370_v57 = vpop.f32.mrf.mxu1 }
 0x1ee   :  { %v1258_v52 = vadd.f32 %v3812_v39, %v1257_v24 }
 0x1ef   :  { %1301 = vmatmul.f32.gmra.mxu0 %v1170_v25  ;;  %1349 = vmatmul.f32.gmra.mxu2 %v1202_v19 }
 0x1f0   :  { %v3831_v16 = vadd.f32 %v1370_v57, %v1258_v52  ;;  %1414 = vmatmul.f32.gmra.mxu1 %v1171_v35  ;;  %1462 = vmatmul.f32.gmra.mxu3 %v1203_v49 }
 0x1f2   :  { %v3837_v8 = vsel %vm1468_vm0, %v3831_v16, -inf }
 0x1f3   :  { %v1502_v7 = vsel %vm1501_vm1, %v3837_v8, -inf }
 0x1f4   :  { %1503 = vmax.xlane.f32.xlu2 %v1502_v7 }
 0x1f5   :  { %v1260_v20 = vpop.f32.mrf.mxu0  ;;  %v1373_v9 = vpop.f32.mrf.mxu1 }
 0x1f6   :  { %v1261_v59 = vadd.f32 %v3812_v39, %v1260_v20 }
 0x1f8   :  { %v3842_v17 = vadd.f32 %v1373_v9, %v1261_v59 }
 0x1fa   :  { %v3847_v63 = vsel %vm1468_vm0, %v3842_v17, -inf }
 0x1fb   :  { %v1505_v15 = vsel %vm1501_vm1, %v3847_v63, -inf }
 0x1fc   :  { %1506 = vmax.xlane.f32.xlu0 %v1505_v15 }
 0x1fd   :  { %v1263_v28 = vpop.f32.mrf.mxu0  ;;  %v1376_v55 = vpop.f32.mrf.mxu1 }
 0x1fe   :  { %v1264_v38 = vadd.f32 %v3812_v39, %v1263_v28 }
 0x200   :  { %v3852_v30 = vadd.f32 %v1376_v55, %v1264_v38 }
 0x202   :  { %v1308_v62 = vpop.f32.mrf.mxu2  ;;  %v1421_v26 = vpop.f32.mrf.mxu3  ;;  %v3857_v61 = vsel %vm1468_vm0, %v3852_v30, -inf }
 0x203   :  { %v1309_v18 = vadd.f32 %v3812_v39, %v1308_v62  ;;  %v1508_v3 = vsel %vm1501_vm1, %v3857_v61, -inf }
 0x204   :  { %1509 = vmax.xlane.f32.xlu1 %v1508_v3 }
 0x205   :  { %v3862_v4 = vadd.f32 %v1421_v26, %v1309_v18 }
 0x207   :  { %5156 = vst [vmem:[#allocation38_spill] sm:$0xff] %v3862_v4 }
 0x20a   :  { %v1311_v29 = vpop.f32.mrf.mxu2  ;;  %v1424_v31 = vpop.f32.mrf.mxu3 }
 0x20b   :  { %v1312_v27 = vadd.f32 %v3812_v39, %v1311_v29 }
 0x20c   :  { %v1266_v6 = vpop.f32.mrf.mxu0 }
 0x20d   :  { %v3865_v60 = vadd.f32 %v1424_v31, %v1312_v27  ;;  %v1267_v22 = vadd.f32 %v3812_v39, %v1266_v6  ;;  %v1379_v21 = vpop.f32.mrf.mxu1 }
 0x20f   :  { %5157 = vst [vmem:[#allocation37_spill] sm:$0xff] %v3865_v60  ;;  %v3868_v43 = vadd.f32 %v1379_v21, %v1267_v22 }
 0x211   :  { %v3873_v47 = vsel %vm1468_vm0, %v3868_v43, -inf }
 0x212   :  { %v1314_v42 = vpop.f32.mrf.mxu2  ;;  %v1511_v50 = vsel %vm1501_vm1, %v3873_v47, -inf }
 0x213   :  { %v1315_v0 = vadd.f32 %v3812_v39, %v1314_v42  ;;  %v1427_v12 = vpop.f32.mrf.mxu3  ;;  %1512 = vmax.xlane.f32.xlu2 %v1511_v50 }
 0x214   :  { %v1269_v41 = vpop.f32.mrf.mxu0 }
 0x215   :  { %v3878_v54 = vadd.f32 %v1427_v12, %v1315_v0  ;;  %v1270_v44 = vadd.f32 %v3812_v39, %v1269_v41  ;;  %v1382_v13 = vpop.f32.mrf.mxu1 }
 0x217   :  { %5158 = vst [vmem:[#allocation18_spill] sm:$0xff] %v3878_v54  ;;  %v3881_v46 = vadd.f32 %v1382_v13, %v1270_v44 }
 0x219   :  { %v3886_v5 = vsel %vm1468_vm0, %v3881_v46, -inf }
 0x21a   :  { %v3888_v56 = vpop.f32.mrf.mxu2  ;;  %v1514_v53 = vsel %vm1501_vm1, %v3886_v5, -inf }
 0x21b   :  { %1515 = vmax.xlane.f32.xlu2 %v1514_v53  ;;  %v3892_v23 = vpop.f32.mrf.mxu3 }
 0x21c   :  { %v1272_v34 = vpop.f32.mrf.mxu0 }
 0x21d   :  { %v1273_v2 = vadd.f32 %v3812_v39, %v1272_v34  ;;  %v1385_v48 = vpop.f32.mrf.mxu1 }
 0x21f   :  { %v3895_v33 = vadd.f32 %v1385_v48, %v1273_v2 }
 0x221   :  { %v3900_v10 = vsel %vm1468_vm0, %v3895_v33, -inf }
 0x222   :  { %v3902_v40 = vpop.f32.mrf.mxu2  ;;  %v1517_v58 = vsel %vm1501_vm1, %v3900_v10, -inf }
 0x223   :  { %1518 = vmax.xlane.f32.xlu0 %v1517_v58  ;;  %v3907_v14 = vpop.f32.mrf.mxu3 }
 0x224   :  { %v1275_v45 = vpop.f32.mrf.mxu0 }
 0x225   :  { %v1276_v36 = vadd.f32 %v3812_v39, %v1275_v45  ;;  %v1388_v32 = vpop.f32.mrf.mxu1 }
 0x227   :  { %v3909_v51 = vadd.f32 %v1388_v32, %v1276_v36 }
 0x229   :  { %v3914_v1 = vsel %vm1468_vm0, %v3909_v51, -inf }
 0x22a   :  { %v1520_v24 = vsel %vm1501_vm1, %v3914_v1, -inf  ;;  %v3918_v57 = vpop.f32.mrf.mxu2 }
 0x22b   :  { %1521 = vmax.xlane.f32.xlu1 %v1520_v24  ;;  %v3923_v49 = vpop.f32.mrf.mxu3 }
 0x22c   :  { %v1278_v25 = vpop.f32.mrf.mxu0 }
 0x22d   :  { %v1279_v19 = vadd.f32 %v3812_v39, %v1278_v25  ;;  %v1391_v52 = vpop.f32.mrf.mxu1 }
 0x22f   :  { %v3921_v35 = vadd.f32 %v1391_v52, %v1279_v19 }
 0x231   :  { %v3928_v7 = vsel %vm1468_vm0, %v3921_v35, -inf }
 0x232   :  { %v1523_v20 = vsel %vm1501_vm1, %v3928_v7, -inf  ;;  %v3932_v59 = vpop.f32.mrf.mxu2 }
 0x233   :  { %1524 = vmax.xlane.f32.xlu2 %v1523_v20  ;;  %v3944_v26 = vpop.f32.mrf.mxu3 }
 0x234   :  { %v1281_v9 = vpop.f32.mrf.mxu0 }
 0x235   :  { %v1282_v15 = vadd.f32 %v3812_v39, %v1281_v9  ;;  %v1394_v28 = vpop.f32.mrf.mxu1 }
 0x237   :  { %v3935_v38 = vadd.f32 %v1394_v28, %v1282_v15 }
 0x239   :  { %v3940_v55 = vsel %vm1468_vm0, %v3935_v38, -inf }
 0x23a   :  { %v1526_v62 = vsel %vm1501_vm1, %v3940_v55, -inf  ;;  %v3947_v31 = vpop.f32.mrf.mxu2 }
 0x23b   :  { %1527 = vmax.xlane.f32.xlu0 %v1526_v62  ;;  %v3958_v42 = vpop.f32.mrf.mxu3 }
 0x23c   :  { %v1284_v18 = vpop.f32.mrf.mxu0 }
 0x23d   :  { %v1285_v3 = vadd.f32 %v3812_v39, %v1284_v18  ;;  %v1397_v29 = vpop.f32.mrf.mxu1 }
 0x23f   :  { %v3949_v27 = vadd.f32 %v1397_v29, %v1285_v3 }
 0x241   :  { %v3954_v6 = vsel %vm1468_vm0, %v3949_v27, -inf }
 0x242   :  { %v1529_v22 = vsel %vm1501_vm1, %v3954_v6, -inf  ;;  %v3963_v41 = vpop.f32.mrf.mxu2 }
 0x243   :  { %1530 = vmax.xlane.f32.xlu1 %v1529_v22  ;;  %v3973_v48 = vpop.f32.mrf.mxu3 }
 0x244   :  { %v1287_v21 = vpop.f32.mrf.mxu0 }
 0x245   :  { %v1288_v50 = vadd.f32 %v3812_v39, %v1287_v21  ;;  %v1400_v0 = vpop.f32.mrf.mxu1 }
 0x247   :  { %v3961_v12 = vadd.f32 %v1400_v0, %v1288_v50 }
 0x249   :  { %v3968_v44 = vsel %vm1468_vm0, %v3961_v12, -inf }
 0x24a   :  { %v1532_v13 = vsel %vm1501_vm1, %v3968_v44, -inf  ;;  %v3984_v32 = vpop.f32.mrf.mxu2 }
 0x24b   :  { %1533 = vmax.xlane.f32.xlu2 %v1532_v13  ;;  %v3989_v20 = vpop.f32.mrf.mxu3 }
 0x24c   :  { %v1290_v53 = vpop.f32.mrf.mxu0 }
 0x24d   :  { %v1291_v34 = vadd.f32 %v3812_v39, %v1290_v53  ;;  %v1403_v2 = vpop.f32.mrf.mxu1 }
 0x24f   :  { %v3975_v58 = vadd.f32 %v1403_v2, %v1291_v34  ;;  %v4016_v34 = vsel %vm1468_vm0, %v3821_v11, -inf }
 0x251   :  { %v3980_v45 = vsel %vm1468_vm0, %v3975_v58, -inf }
 0x252   :  { %v1535_v36 = vsel %vm1501_vm1, %v3980_v45, -inf  ;;  %v3998_v62 = vpop.f32.mrf.mxu2 }
 0x253   :  { %1536 = vmax.xlane.f32.xlu0 %v1535_v36  ;;  %v4010_v50 = vpop.f32.mrf.mxu3 }
 0x254   :  { %v1293_v24 = vpop.f32.mrf.mxu0 }
 0x255   :  { %v1294_v25 = vadd.f32 %v3812_v39, %v1293_v24  ;;  %v1406_v19 = vpop.f32.mrf.mxu1 }
 0x257   :  { %v3987_v52 = vadd.f32 %v1406_v19, %v1294_v25  ;;  %v1550_v19 = vsel %vm1501_vm1, %v4016_v34, -inf }
 0x259   :  { %v3994_v9 = vsel %vm1468_vm0, %v3987_v52, -inf }
 0x25a   :  { %v1538_v15 = vsel %vm1501_vm1, %v3994_v9, -inf  ;;  %v1341_v2 = vpop.f32.mrf.mxu2 }
 0x25b   :  { %1539 = vmax.xlane.f32.xlu1 %v1538_v15 }
 0x25c   :  { %v1296_v28 = vpop.f32.mrf.mxu0 }
 0x25d   :  { %v1297_v18 = vadd.f32 %v3812_v39, %v1296_v28  ;;  %v1409_v3 = vpop.f32.mrf.mxu1  ;;  %v1454_v28 = vpop.f32.mrf.mxu3 }
 0x25f   :  { %v4001_v29 = vadd.f32 %v1409_v3, %v1297_v18 }
 0x261   :  { %v4006_v22 = vsel %vm1468_vm0, %v4001_v29, -inf }
 0x262   :  { %v1541_v21 = vsel %vm1501_vm1, %v4006_v22, -inf }
 0x263   :  { %1542 = vmax.xlane.f32.xlu2 %v1541_v21  ;;  %v1318_v21 = vadd.f32 %v3812_v39, %v3888_v56 }
 0x264   :  { %v1299_v0 = vpop.f32.mrf.mxu0 }
 0x265   :  { %v1300_v13 = vadd.f32 %v3812_v39, %v1299_v0  ;;  %v1412_v53 = vpop.f32.mrf.mxu1 }
 0x267   :  { %v4018_v36 = vadd.f32 %v1412_v53, %v1300_v13  ;;  %v4037_v13 = vsel %vm1468_vm0, %v3862_v4, -inf  ;;  %v4042_v53 = vsel %vm1468_vm0, %v3878_v54, -inf  ;;  %v1321_v54 = vadd.f32 %v3812_v39, %v3902_v40 }
 0x269   :  { %5159 = vst [vmem:[#allocation25_spill] sm:$0xff] %v4018_v36  ;;  %v4023_v24 = vsel %vm1468_vm0, %v4018_v36, -inf }
 0x26a   :  { %v1544_v25 = vsel %vm1501_vm1, %v4023_v24, -inf }
 0x26b   :  { %1545 = vmax.xlane.f32.xlu0 %v1544_v25  ;;  %1551 = vmax.xlane.f32.xlu2 %v1550_v19  ;;  %v1324_v25 = vadd.f32 %v3812_v39, %v3918_v57  ;;  %v1344_v19 = vpop.f32.mrf.mxu2  ;;  %v1559_v57 = vsel %vm1501_vm1, %v4042_v53, -inf }
 0x26c   :  { %v1302_v15 = vpop.f32.mrf.mxu0 }
 0x26d   :  { %v1303_v18 = vadd.f32 %v3812_v39, %v1302_v15  ;;  %v1415_v3 = vpop.f32.mrf.mxu1  ;;  %v4061_v4 = vadd.f32 %v3923_v49, %v1324_v25  ;;  %v1333_v25 = vadd.f32 %v3812_v39, %v3963_v41 }
 0x26f   :  { %v4032_v0 = vadd.f32 %v1415_v3, %v1303_v18  ;;  %v1553_v18 = vsel %vm1501_vm1, %v4037_v13, -inf  ;;  %v4056_v3 = vadd.f32 %v3892_v23, %v1318_v21  ;;  %5162 = vst [vmem:[#allocation8_spill] sm:$0xff] %v4061_v4  ;;  %v1327_v23 = vadd.f32 %v3812_v39, %v3932_v59  ;;  %v1457_v21 = vpop.f32.mrf.mxu3 }
 0x270   :  { %v4080_v49 = vsel %vm1468_vm0, %v4061_v4, -inf  ;;  %v4097_v41 = vadd.f32 %v3973_v48, %v1333_v25  ;;  %v1330_v4 = vadd.f32 %v3812_v39, %v3947_v31  ;;  %v1342_v31 = vadd.f32 %v3812_v39, %v1341_v2 }
 0x271   :  { %5160 = vst [vmem:[#allocation40_spill] sm:$0xff] %v4032_v0  ;;  %v4049_v56 = vsel %vm1468_vm0, %v4032_v0, -inf  ;;  %v4066_v0 = vsel %vm1468_vm0, %v3865_v60, -inf }
 0x272   :  { %v1547_v15 = vsel %vm1501_vm1, %v4049_v56, -inf  ;;  %5161 = vst [vmem:[#allocation45_spill] sm:$0xff] %v4056_v3  ;;  %v1556_v40 = vsel %vm1501_vm1, %v4066_v0, -inf  ;;  %v4116_v48 = vsel %vm1468_vm0, %v4097_v41, -inf  ;;  %v4120_v25 = vadd.f32 %v3958_v42, %v1330_v4 }
 0x273   :  { %1548 = vmax.xlane.f32.xlu1 %v1547_v15  ;;  %1554 = vmax.xlane.f32.xlu0 %v1553_v18  ;;  %v4075_v15 = vsel %vm1468_vm0, %v4056_v3, -inf  ;;  %v4089_v18 = vadd.f32 %v3907_v14, %v1321_v54  ;;  %v1347_v60 = vpop.f32.mrf.mxu2  ;;  %v1568_v3 = vsel %vm1501_vm1, %v4080_v49, -inf  ;;  %5165 = vst [vmem:[#allocation46_spill] sm:$0xff] %v4097_v41  ;;  %v1336_v14 = vadd.f32 %v3812_v39, %v3984_v32 }
 0x274   :  { %1560 = vmax.xlane.f32.xlu2 %v1559_v57  ;;  %v1562_v59 = vsel %vm1501_vm1, %v4075_v15, -inf  ;;  %v4092_v57 = vadd.f32 %v3944_v26, %v1327_v23  ;;  %5166 = vst [vmem:[#allocation54_spill] sm:$0xff] %v4120_v25  ;;  %v4131_v2 = vadd.f32 %v1454_v28, %v1342_v31  ;;  %v4136_v42 = vsel %vm1468_vm0, %v4120_v25, -inf }
 0x275   :  { %5163 = vst [vmem:[#allocation23_spill] sm:$0xff] %v4089_v18  ;;  %v4104_v54 = vsel %vm1468_vm0, %v4089_v18, -inf  ;;  %v1577_v18 = vsel %vm1501_vm1, %v4116_v48, -inf  ;;  %v1345_v28 = vadd.f32 %v3812_v39, %v1344_v19  ;;  %v1574_v25 = vsel %vm1501_vm1, %v4136_v42, -inf }
 0x276   :  { %5164 = vst [vmem:[#allocation30_spill] sm:$0xff] %v4092_v57  ;;  %v4111_v26 = vsel %vm1468_vm0, %v4092_v57, -inf  ;;  %v1565_v32 = vsel %vm1501_vm1, %v4104_v54, -inf  ;;  %v4151_v31 = vsel %vm1468_vm0, %v4131_v2, -inf }
 0x277   :  { %v1460_v23 = vpop.f32.mrf.mxu3  ;;  %5168 = vst [vmem:[#allocation33_spill] sm:$0xff] %v4131_v2  ;;  %v1510_v57 = vpop.xlane.xlu1 %1509 }
 0x27b   :  { %1557 = vmax.xlane.f32.xlu1 %v1556_v40  ;;  %1563 = vmax.xlane.f32.xlu0 %v1562_v59  ;;  %v1571_v40 = vsel %vm1501_vm1, %v4111_v26, -inf  ;;  %v4127_v59 = vadd.f32 %v3989_v20, %v1336_v14  ;;  %v1350_v4 = vpop.f32.mrf.mxu2  ;;  %v1339_v14 = vadd.f32 %v3812_v39, %v3998_v62 }
 0x27c   :  { %1569 = vmax.xlane.f32.xlu2 %v1568_v3  ;;  %v1504_v3 = vpop.xlane.xlu2 %1503 }
 0x27d   :  { %5167 = vst [vmem:[#allocation15_spill] sm:$0xff] %v4127_v59  ;;  %v1598_v41 = vsub.f32 %v3837_v8, %v1504_v3  ;;  %v4142_v20 = vsel %vm1468_vm0, %v4127_v59, -inf  ;;  %v4159_v19 = vadd.f32 %v4010_v50, %v1339_v14 }
 0x27e   :  { %v1580_v62 = vsel %vm1501_vm1, %v4142_v20, -inf }
 0x27f   :  { %v1630_v3 = vmul.f32 1.442695, %v1598_v41  ;;  %5169 = vst [vmem:[#allocation7_spill] sm:$0xff] %v4159_v19  ;;  %v4172_v50 = vsel %vm1468_vm0, %v4159_v19, -inf }
 0x281   :  { %2422 = vpow2.f32 %v1630_v3 }
 0x283   :  { %1566 = vmax.xlane.f32.xlu1 %v1565_v32  ;;  %1572 = vmax.xlane.f32.xlu0 %v1571_v40  ;;  %v1351_v32 = vadd.f32 %v3812_v39, %v1350_v4  ;;  %v1507_v40 = vpop.xlane.xlu0 %1506  ;;  %v1586_v4 = vsel %vm1501_vm1, %v4151_v31, -inf }
 0x284   :  { %1578 = vmax.xlane.f32.xlu2 %v1577_v18  ;;  %v1600_v18 = vsub.f32 %v3857_v61, %v1510_v57  ;;  %v4161_v61 = vadd.f32 %v1457_v21, %v1345_v28  ;;  %v1463_v57 = vpop.f32.mrf.mxu3  ;;  %v1599_v2 = vsub.f32 %v3847_v63, %v1507_v40  ;;  %v1583_v28 = vsel %vm1501_vm1, %v4172_v50, -inf }
 0x285   :  { %v4165_v41 = vadd.f32 %v1463_v57, %v1351_v32 }
 0x286   :  { %v1513_v8 = vpop.xlane.xlu2 %1512  ;;  %5170 = vst [vmem:[#allocation14_spill] sm:$0xff] %v4161_v61  ;;  %v1634_v59 = vmul.f32 1.442695, %v1600_v18  ;;  %v4177_v21 = vsel %vm1468_vm0, %v4161_v61, -inf  ;;  %v1632_v14 = vmul.f32 1.442695, %v1599_v2 }
 0x287   :  { %5171 = vst [vmem:[#allocation2_spill] sm:$0xff] %v4165_v41  ;;  %v1601_v36 = vsub.f32 %v3873_v47, %v1513_v8  ;;  %v4183_v63 = vsel %vm1468_vm0, %v4165_v41, -inf  ;;  %v1589_v18 = vsel %vm1501_vm1, %v4177_v21, -inf }
 0x288   :  { %2424 = vpow2.f32 %v1634_v59 }
 0x289   :  { %v1636_v47 = vmul.f32 1.442695, %v1601_v36  ;;  %2426 = vpow2.f32 %v1632_v14 }
 0x28b   :  { %1575 = vmax.xlane.f32.xlu1 %v1574_v25  ;;  %1581 = vmax.xlane.f32.xlu0 %v1580_v62  ;;  %v1348_v25 = vadd.f32 %v3812_v39, %v1347_v60  ;;  %v1595_v39 = vsel %vm1501_vm1, %v4183_v63, -inf  ;;  %v2423_v60 = vpop.eup %2422  ;;  %2428 = vpow2.f32 %v1636_v47 }
 0x28c   :  { %1587 = vmax.xlane.f32.xlu2 %v1586_v4  ;;  %v4202_v40 = vsel %vm1468_vm0, %v2423_v60, 0.0 }
 0x28d   :  { %v4189_v32 = vadd.f32 %v1460_v23, %v1348_v25 }
 0x28e   :  { %v1516_v8 = vpop.xlane.xlu2 %1515  ;;  %v2425_v59 = vpop.eup %2424 }
 0x28f   :  { %5172 = vst [vmem:[#allocation34_spill] sm:$0xff] %v4189_v32  ;;  %v1602_v36 = vsub.f32 %v3886_v5, %v1516_v8  ;;  %v4197_v3 = vsel %vm1468_vm0, %v4189_v32, -inf  ;;  %v4206_v62 = vsel %vm1468_vm0, %v2425_v59, 0.0  ;;  %v1726_v5 = vsel %vm1501_vm1, %v4202_v40, 0.0  ;;  %v2427_v14 = vpop.eup %2426 }
 0x290   :  { %v1592_v25 = vsel %vm1501_vm1, %v4197_v3, -inf }
 0x291   :  { %v1638_v4 = vmul.f32 1.442695, %v1602_v36  ;;  %v2429_v47 = vpop.eup %2428 }
 0x292   :  { %v4217_v8 = vsel %vm1468_vm0, %v2429_v47, 0.0 }
 0x293   :  { %1584 = vmax.xlane.f32.xlu1 %v1583_v28  ;;  %1590 = vmax.xlane.f32.xlu0 %v1589_v18  ;;  %v1735_v36 = vsel %vm1501_vm1, %v4217_v8, 0.0 }
 0x294   :  { %1596 = vmax.xlane.f32.xlu2 %v1595_v39  ;;  %v4221_v39 = vsel %vm1468_vm0, %v2427_v14, 0.0 }
 0x296   :  { %v1519_v2 = vpop.xlane.xlu0 %1518 }
 0x297   :  { %v1603_v23 = vsub.f32 %v3900_v10, %v1519_v2  ;;  %v1732_v10 = vsel %vm1501_vm1, %v4206_v62, 0.0  ;;  %v1729_v2 = vsel %vm1501_vm1, %v4221_v39, 0.0 }
 0x299   :  { %v1640_v57 = vmul.f32 1.442695, %v1603_v23 }
 0x29b   :  { %2430 = vpow2.f32 %v1640_v57  ;;  %1727 = vadd.xlane.f32.xlu0 %v1726_v5  ;;  %1593 = vmax.xlane.f32.xlu1 %v1592_v25 }
 0x29c   :  { %1733 = vadd.xlane.f32.xlu2 %v1732_v10  ;;  %2432 = vpow2.f32 %v1638_v4 }
 0x29e   :  { %v1522_v28 = vpop.xlane.xlu1 %1521 }
 0x29f   :  { %v1604_v18 = vsub.f32 %v3914_v1, %v1522_v28 }
 0x2a1   :  { %v2431_v60 = vpop.eup %2430  ;;  %v1642_v59 = vmul.f32 1.442695, %v1604_v18 }
 0x2a2   :  { %v4229_v23 = vsel %vm1468_vm0, %v2431_v60, 0.0  ;;  %v2433_v57 = vpop.eup %2432 }
 0x2a3   :  { %2434 = vpow2.f32 %v1642_v59  ;;  %1736 = vadd.xlane.f32.xlu0 %v1735_v36  ;;  %1730 = vadd.xlane.f32.xlu1 %v1729_v2  ;;  %v1741_v1 = vsel %vm1501_vm1, %v4229_v23, 0.0  ;;  %v4236_v25 = vsel %vm1468_vm0, %v2433_v57, 0.0 }
 0x2a4   :  { %1742 = vadd.xlane.f32.xlu2 %v1741_v1  ;;  %v1738_v47 = vsel %vm1501_vm1, %v4236_v25, 0.0 }
 0x2a6   :  { %v1525_v4 = vpop.xlane.xlu2 %1524 }
 0x2a7   :  { %v1605_v5 = vsub.f32 %v3928_v7, %v1525_v4 }
 0x2a9   :  { %v2435_v14 = vpop.eup %2434  ;;  %v1644_v10 = vmul.f32 1.442695, %v1605_v5 }
 0x2aa   :  { %v4242_v28 = vsel %vm1468_vm0, %v2435_v14, 0.0 }
 0x2ab   :  { %2436 = vpow2.f32 %v1644_v10  ;;  %1739 = vadd.xlane.f32.xlu1 %v1738_v47  ;;  %v1744_v18 = vsel %vm1501_vm1, %v4242_v28, 0.0 }
 0x2ac   :  { %1745 = vadd.xlane.f32.xlu0 %v1744_v18 }
 0x2ae   :  { %v1528_v7 = vpop.xlane.xlu0 %1527 }
 0x2af   :  { %v1606_v60 = vsub.f32 %v3940_v55, %v1528_v7 }
 0x2b1   :  { %v2437_v59 = vpop.eup %2436  ;;  %v1646_v36 = vmul.f32 1.442695, %v1606_v60 }
 0x2b2   :  { %v4249_v2 = vsel %vm1468_vm0, %v2437_v59, 0.0 }
 0x2b3   :  { %2438 = vpow2.f32 %v1646_v36  ;;  %v1747_v1 = vsel %vm1501_vm1, %v4249_v2, 0.0 }
 0x2b4   :  { %1748 = vadd.xlane.f32.xlu1 %v1747_v1 }
 0x2b6   :  { %v1531_v57 = vpop.xlane.xlu1 %1530 }
 0x2b7   :  { %v1607_v4 = vsub.f32 %v3954_v6, %v1531_v57 }
 0x2b9   :  { %v2439_v5 = vpop.eup %2438  ;;  %v1648_v14 = vmul.f32 1.442695, %v1607_v4 }
 0x2ba   :  { %v4256_v10 = vsel %vm1468_vm0, %v2439_v5, 0.0 }
 0x2bb   :  { %2440 = vpow2.f32 %v1648_v14  ;;  %v1750_v55 = vsel %vm1501_vm1, %v4256_v10, 0.0 }
 0x2bc   :  { %1751 = vadd.xlane.f32.xlu2 %v1750_v55 }
 0x2be   :  { %v1534_v47 = vpop.xlane.xlu2 %1533 }
 0x2bf   :  { %v1608_v18 = vsub.f32 %v3968_v44, %v1534_v47 }
 0x2c1   :  { %v2441_v7 = vpop.eup %2440  ;;  %v1650_v60 = vmul.f32 1.442695, %v1608_v18 }
 0x2c2   :  { %v4263_v59 = vsel %vm1468_vm0, %v2441_v7, 0.0 }
 0x2c3   :  { %2442 = vpow2.f32 %v1650_v60  ;;  %v1753_v6 = vsel %vm1501_vm1, %v4263_v59, 0.0 }
 0x2c4   :  { %1754 = vadd.xlane.f32.xlu0 %v1753_v6 }
 0x2c6   :  { %v1537_v36 = vpop.xlane.xlu0 %1536 }
 0x2c7   :  { %v1609_v1 = vsub.f32 %v3980_v45, %v1537_v36 }
 0x2c9   :  { %v2443_v57 = vpop.eup %2442  ;;  %v1652_v4 = vmul.f32 1.442695, %v1609_v1 }
 0x2ca   :  { %v4270_v5 = vsel %vm1468_vm0, %v2443_v57, 0.0 }
 0x2cb   :  { %2444 = vpow2.f32 %v1652_v4  ;;  %v1756_v44 = vsel %vm1501_vm1, %v4270_v5, 0.0 }
 0x2cc   :  { %1757 = vadd.xlane.f32.xlu1 %v1756_v44 }
 0x2ce   :  { %v1540_v14 = vpop.xlane.xlu1 %1539 }
 0x2cf   :  { %v1610_v55 = vsub.f32 %v3994_v9, %v1540_v14 }
 0x2d1   :  { %v2445_v47 = vpop.eup %2444  ;;  %v1654_v18 = vmul.f32 1.442695, %v1610_v55 }
 0x2d2   :  { %v4277_v7 = vsel %vm1468_vm0, %v2445_v47, 0.0 }
 0x2d3   :  { %2446 = vpow2.f32 %v1654_v18  ;;  %v1759_v45 = vsel %vm1501_vm1, %v4277_v7, 0.0 }
 0x2d4   :  { %1760 = vadd.xlane.f32.xlu2 %v1759_v45 }
 0x2d6   :  { %v1543_v60 = vpop.xlane.xlu2 %1542 }
 0x2d7   :  { %v1611_v6 = vsub.f32 %v4006_v22, %v1543_v60 }
 0x2d9   :  { %v2447_v36 = vpop.eup %2446  ;;  %v1656_v1 = vmul.f32 1.442695, %v1611_v6 }
 0x2da   :  { %v4284_v57 = vsel %vm1468_vm0, %v2447_v36, 0.0 }
 0x2db   :  { %2448 = vpow2.f32 %v1656_v1  ;;  %v1762_v9 = vsel %vm1501_vm1, %v4284_v57, 0.0 }
 0x2dc   :  { %1763 = vadd.xlane.f32.xlu0 %v1762_v9 }
 0x2de   :  { %v1552_v4 = vpop.xlane.xlu2 %1551  ;;  %v1546_v44 = vpop.xlane.xlu0 %1545 }
 0x2df   :  { %v1614_v14 = vsub.f32 %v4016_v34, %v1552_v4  ;;  %v1612_v55 = vsub.f32 %v4023_v24, %v1546_v44 }
 0x2e1   :  { %v2449_v47 = vpop.eup %2448  ;;  %v1662_v18 = vmul.f32 1.442695, %v1614_v14  ;;  %v1658_v22 = vmul.f32 1.442695, %v1612_v55 }
 0x2e2   :  { %v4292_v45 = vsel %vm1468_vm0, %v2449_v47, 0.0 }
 0x2e3   :  { %2450 = vpow2.f32 %v1662_v18  ;;  %v1765_v60 = vsel %vm1501_vm1, %v4292_v45, 0.0 }
 0x2e4   :  { %2452 = vpow2.f32 %v1658_v22  ;;  %1766 = vadd.xlane.f32.xlu1 %v1765_v60 }
 0x2e6   :  { %v1549_v6 = vpop.xlane.xlu1 %1548  ;;  %v1555_v36 = vpop.xlane.xlu0 %1554 }
 0x2e7   :  { %v1613_v1 = vsub.f32 %v4049_v56, %v1549_v6  ;;  %v1561_v34 = vpop.xlane.xlu2 %1560  ;;  %v1615_v24 = vsub.f32 %v4037_v13, %v1555_v36 }
 0x2e8   :  { %v1617_v9 = vsub.f32 %v4042_v53, %v1561_v34 }
 0x2e9   :  { %v2451_v4 = vpop.eup %2450  ;;  %v1660_v44 = vmul.f32 1.442695, %v1613_v1  ;;  %v1664_v14 = vmul.f32 1.442695, %v1615_v24 }
 0x2ea   :  { %v2453_v55 = vpop.eup %2452  ;;  %v1668_v47 = vmul.f32 1.442695, %v1617_v9  ;;  %v4301_v18 = vsel %vm1468_vm0, %v2451_v4, 0.0 }
 0x2eb   :  { %2454 = vpow2.f32 %v1660_v44  ;;  %v1774_v22 = vsel %vm1501_vm1, %v4301_v18, 0.0  ;;  %v4307_v56 = vsel %vm1468_vm0, %v2453_v55, 0.0 }
 0x2ec   :  { %2456 = vpow2.f32 %v1668_v47  ;;  %1775 = vadd.xlane.f32.xlu1 %v1774_v22  ;;  %v1768_v13 = vsel %vm1501_vm1, %v4307_v56, 0.0 }
 0x2ed   :  { %2458 = vpow2.f32 %v1664_v14  ;;  %1769 = vadd.xlane.f32.xlu2 %v1768_v13 }
 0x2ee   :  { %v1558_v53 = vpop.xlane.xlu1 %1557  ;;  %v1564_v60 = vpop.xlane.xlu0 %1563 }
 0x2ef   :  { %v1616_v6 = vsub.f32 %v4066_v0, %v1558_v53  ;;  %v1570_v36 = vpop.xlane.xlu2 %1569  ;;  %v1618_v1 = vsub.f32 %v4075_v15, %v1564_v60 }
 0x2f0   :  { %v1620_v34 = vsub.f32 %v4080_v49, %v1570_v36 }
 0x2f1   :  { %v2455_v24 = vpop.eup %2454  ;;  %v1666_v9 = vmul.f32 1.442695, %v1616_v6  ;;  %v1670_v4 = vmul.f32 1.442695, %v1618_v1 }
 0x2f2   :  { %v2457_v44 = vpop.eup %2456  ;;  %v1674_v55 = vmul.f32 1.442695, %v1620_v34  ;;  %v4316_v47 = vsel %vm1468_vm0, %v2455_v24, 0.0 }
 0x2f3   :  { %v2459_v14 = vpop.eup %2458  ;;  %2460 = vpow2.f32 %v1666_v9  ;;  %v1771_v22 = vsel %vm1501_vm1, %v4316_v47, 0.0  ;;  %v4322_v0 = vsel %vm1468_vm0, %v2457_v44, 0.0 }
 0x2f4   :  { %2462 = vpow2.f32 %v1674_v55  ;;  %1772 = vadd.xlane.f32.xlu0 %v1771_v22  ;;  %v1783_v15 = vsel %vm1501_vm1, %v4322_v0, 0.0  ;;  %v4328_v49 = vsel %vm1468_vm0, %v2459_v14, 0.0 }
 0x2f5   :  { %2464 = vpow2.f32 %v1670_v4  ;;  %1784 = vadd.xlane.f32.xlu1 %v1783_v15  ;;  %v1777_v13 = vsel %vm1501_vm1, %v4328_v49, 0.0 }
 0x2f6   :  { %1778 = vadd.xlane.f32.xlu2 %v1777_v13  ;;  %v1567_v53 = vpop.xlane.xlu1 %1566  ;;  %v1573_v60 = vpop.xlane.xlu0 %1572 }
 0x2f7   :  { %v1619_v6 = vsub.f32 %v4104_v54, %v1567_v53  ;;  %v1579_v36 = vpop.xlane.xlu2 %1578  ;;  %v1621_v1 = vsub.f32 %v4111_v26, %v1573_v60 }
 0x2f8   :  { %v1623_v34 = vsub.f32 %v4116_v48, %v1579_v36 }
 0x2f9   :  { %v2461_v24 = vpop.eup %2460  ;;  %v1672_v9 = vmul.f32 1.442695, %v1619_v6  ;;  %v1676_v44 = vmul.f32 1.442695, %v1621_v1 }
 0x2fa   :  { %v2463_v55 = vpop.eup %2462  ;;  %v1680_v14 = vmul.f32 1.442695, %v1623_v34  ;;  %v4337_v4 = vsel %vm1468_vm0, %v2461_v24, 0.0 }
 0x2fb   :  { %v2465_v22 = vpop.eup %2464  ;;  %2466 = vpow2.f32 %v1672_v9  ;;  %v1780_v15 = vsel %vm1501_vm1, %v4337_v4, 0.0  ;;  %v4343_v54 = vsel %vm1468_vm0, %v2463_v55, 0.0 }
 0x2fc   :  { %2468 = vpow2.f32 %v1680_v14  ;;  %1781 = vadd.xlane.f32.xlu0 %v1780_v15  ;;  %v1792_v26 = vsel %vm1501_vm1, %v4343_v54, 0.0  ;;  %v4349_v48 = vsel %vm1468_vm0, %v2465_v22, 0.0 }
 0x2fd   :  { %2470 = vpow2.f32 %v1676_v44  ;;  %1793 = vadd.xlane.f32.xlu1 %v1792_v26  ;;  %v1786_v13 = vsel %vm1501_vm1, %v4349_v48, 0.0 }
 0x2fe   :  { %1787 = vadd.xlane.f32.xlu2 %v1786_v13  ;;  %v1576_v53 = vpop.xlane.xlu1 %1575  ;;  %v1582_v60 = vpop.xlane.xlu0 %1581 }
 0x2ff   :  { %v1622_v6 = vsub.f32 %v4136_v42, %v1576_v53  ;;  %v1588_v36 = vpop.xlane.xlu2 %1587  ;;  %v1624_v1 = vsub.f32 %v4142_v20, %v1582_v60 }
 0x300   :  { %v1626_v34 = vsub.f32 %v4151_v31, %v1588_v36 }
 0x301   :  { %v2467_v24 = vpop.eup %2466  ;;  %v1678_v9 = vmul.f32 1.442695, %v1622_v6  ;;  %v1682_v55 = vmul.f32 1.442695, %v1624_v1 }
 0x302   :  { %v2469_v14 = vpop.eup %2468  ;;  %v1686_v22 = vmul.f32 1.442695, %v1626_v34  ;;  %v4358_v44 = vsel %vm1468_vm0, %v2467_v24, 0.0 }
 0x303   :  { %5173 = vst [vmem:[#allocation17_spill] sm:$0xff] %v4358_v44  ;;  %v2471_v15 = vpop.eup %2470  ;;  %2472 = vpow2.f32 %v1678_v9  ;;  %v1789_v26 = vsel %vm1501_vm1, %v4358_v44, 0.0  ;;  %v4364_v42 = vsel %vm1468_vm0, %v2469_v14, 0.0 }
 0x304   :  { %5174 = vst [vmem:[#allocation39_spill] sm:$0xff] %v4364_v42  ;;  %2474 = vpow2.f32 %v1686_v22  ;;  %1790 = vadd.xlane.f32.xlu0 %v1789_v26  ;;  %v1801_v20 = vsel %vm1501_vm1, %v4364_v42, 0.0  ;;  %v4370_v31 = vsel %vm1468_vm0, %v2471_v15, 0.0 }
 0x305   :  { %5175 = vst [vmem:[#allocation26_spill] sm:$0xff] %v4370_v31  ;;  %2476 = vpow2.f32 %v1682_v55  ;;  %1802 = vadd.xlane.f32.xlu1 %v1801_v20  ;;  %v1795_v13 = vsel %vm1501_vm1, %v4370_v31, 0.0 }
 0x306   :  { %1796 = vadd.xlane.f32.xlu2 %v1795_v13  ;;  %v1585_v53 = vpop.xlane.xlu1 %1584  ;;  %v1591_v60 = vpop.xlane.xlu0 %1590 }
 0x307   :  { %v1625_v6 = vsub.f32 %v4172_v50, %v1585_v53  ;;  %v1597_v36 = vpop.xlane.xlu2 %1596  ;;  %v1627_v1 = vsub.f32 %v4177_v21, %v1591_v60 }
 0x308   :  { %v1629_v34 = vsub.f32 %v4183_v63, %v1597_v36 }
 0x309   :  { %v2473_v24 = vpop.eup %2472  ;;  %v1684_v9 = vmul.f32 1.442695, %v1625_v6  ;;  %v1688_v14 = vmul.f32 1.442695, %v1627_v1 }
 0x30a   :  { %v2475_v22 = vpop.eup %2474  ;;  %v1692_v15 = vmul.f32 1.442695, %v1629_v34  ;;  %v4379_v55 = vsel %vm1468_vm0, %v2473_v24, 0.0 }
 0x30b   :  { %5176 = vst [vmem:[#allocation3_spill] sm:$0xff] %v4379_v55  ;;  %v2477_v26 = vpop.eup %2476  ;;  %2478 = vpow2.f32 %v1684_v9  ;;  %v1798_v20 = vsel %vm1501_vm1, %v4379_v55, 0.0  ;;  %v4385_v50 = vsel %vm1468_vm0, %v2475_v22, 0.0 }
 0x30c   :  { %5177 = vst [vmem:[#allocation49_spill] sm:$0xff] %v4385_v50  ;;  %2480 = vpow2.f32 %v1692_v15  ;;  %1799 = vadd.xlane.f32.xlu0 %v1798_v20  ;;  %v1810_v21 = vsel %vm1501_vm1, %v4385_v50, 0.0  ;;  %v4391_v63 = vsel %vm1468_vm0, %v2477_v26, 0.0 }
 0x30d   :  { %5178 = vst [vmem:[#allocation19_spill] sm:$0xff] %v4391_v63  ;;  %2482 = vpow2.f32 %v1688_v14  ;;  %1811 = vadd.xlane.f32.xlu1 %v1810_v21  ;;  %v1804_v13 = vsel %vm1501_vm1, %v4391_v63, 0.0 }
 0x30e   :  { %1805 = vadd.xlane.f32.xlu2 %v1804_v13  ;;  %v1594_v53 = vpop.xlane.xlu1 %1593  ;;  %v1728_v60 = vpop.xlane.xlu0 %1727 }
 0x30f   :  { %v1628_v6 = vsub.f32 %v4197_v3, %v1594_v53  ;;  %v1734_v36 = vpop.xlane.xlu2 %1733  ;;  %2484 = vrcp.f32 %v1728_v60  ;;  %vm1827_vm3 = vweird.f32 %v1728_v60 }
 0x310   :  { %2486 = vrcp.f32 %v1734_v36  ;;  %v1863_v32 = vand.u32 2147483648, %v1734_v36  ;;  %vm1857_vm5 = vweird.f32 %v1734_v36 }
 0x311   :  { %v2479_v1 = vpop.eup %2478  ;;  %v1690_v34 = vmul.f32 1.442695, %v1628_v6 }
 0x312   :  { %v2481_v24 = vpop.eup %2480  ;;  %v4398_v9 = vsel %vm1468_vm0, %v2479_v1, 0.0 }
 0x313   :  { %5179 = vst [vmem:[#allocation9_spill] sm:$0xff] %v4398_v9  ;;  %v2483_v14 = vpop.eup %2482  ;;  %2488 = vpow2.f32 %v1690_v34  ;;  %v1807_v22 = vsel %vm1501_vm1, %v4398_v9, 0.0  ;;  %v4404_v15 = vsel %vm1468_vm0, %v2481_v24, 0.0  ;;  %v1831_v24 = vand.u32 2147483647, %v1728_v60 }
 0x314   :  { %5180 = vst [vmem:[#allocation10_spill] sm:$0xff] %v4404_v15  ;;  %1808 = vadd.xlane.f32.xlu0 %v1807_v22  ;;  %v1819_v3 = vsel %vm1501_vm1, %v4404_v15, 0.0  ;;  %v4410_v26 = vsel %vm1468_vm0, %v2483_v14, 0.0  ;;  %v1861_v14 = vand.u32 2147483647, %v1734_v36  ;;  %v1864_v15 = vor.u32 1.1754944e-38, %v1863_v32 }
 0x315   :  { %5181 = vst [vmem:[#allocation16_spill] sm:$0xff] %v4410_v26  ;;  %v2485_v20 = vpop.eup %2484  ;;  %1820 = vadd.xlane.f32.xlu1 %v1819_v3  ;;  %v1813_v21 = vsel %vm1501_vm1, %v4410_v26, 0.0  ;;  %vm4424_vm7 = vcmp.eq.f32.partialorder %v1831_v24, 8.507059e+37 }
 0x316   :  { %v2487_v13 = vpop.eup %2486  ;;  %v1823_v53 = vmul.f32 %v2485_v20, %v1728_v60  ;;  %1814 = vadd.xlane.f32.xlu2 %v1813_v21  ;;  %v4414_v6 = vpop.xlane.xlu1 %1730  ;;  %v1833_v21 = vand.u32 2147483648, %v1728_v60  ;;  %vm1828_vm4 = vweird.f32 %v2485_v20  ;;  %vm4428_vm8 = vcmp.eq.f32.partialorder %v1861_v14, 8.507059e+37 }
 0x317   :  { %v4416_v1 = vpop.xlane.xlu0 %1736  ;;  %v1853_v34 = vmul.f32 %v2487_v13, %v1734_v36  ;;  %2490 = vrcp.f32 %v4414_v6  ;;  %v4419_v22 = vpop.xlane.xlu2 %1742  ;;  %vm1858_vm6 = vweird.f32 %v2487_v13  ;;  %vm1829_vm9 = vmor %vm1827_vm3, %vm1828_vm4  ;;  %vm1842_vm10 = vweird.f32 %v4414_v6 }
 0x318   :  { %v1824_v19 = vsub.f32 1.0, %v1823_v53  ;;  %2492 = vrcp.f32 %v4416_v1  ;;  %vm1859_vm11 = vmor %vm1857_vm5, %vm1858_vm6  ;;  %v1848_v32 = vand.u32 2147483648, %v4414_v6  ;;  %vm1872_vm12 = vweird.f32 %v4416_v1 }
 0x319   :  { %v2489_v3 = vpop.eup %2488  ;;  %v1854_v9 = vsub.f32 1.0, %v1853_v34  ;;  %2494 = vrcp.f32 %v4419_v22  ;;  %v1876_v31 = vand.u32 2147483647, %v4416_v1  ;;  %vm1902_vm6 = vweird.f32 %v4419_v22 }
 0x31a   :  { %v1825_v61 = vmul.f32 %v2485_v20, %v1824_v19  ;;  %v4434_v19 = vsel %vm1468_vm0, %v2489_v3, 0.0 }
 0x31b   :  { %v1855_v26 = vmul.f32 %v2487_v13, %v1854_v9  ;;  %5186 = vst [vmem:[#allocation42_spill] sm:$0xff] %v4434_v19  ;;  %v1834_v9 = vor.u32 1.1754944e-38, %v1833_v21  ;;  %v1816_v36 = vsel %vm1501_vm1, %v4434_v19, 0.0  ;;  %vm1877_vm5 = vcmp.eq.f32.partialorder %v1876_v31, 8.507059e+37 }
 0x31c   :  { %v1826_v55 = vadd.f32 %v2485_v20, %v1825_v61  ;;  %v1846_v61 = vand.u32 2147483647, %v4414_v6  ;;  %1817 = vadd.xlane.f32.xlu0 %v1816_v36 }
 0x31d   :  { %v2491_v60 = vpop.eup %2490  ;;  %v1856_v34 = vadd.f32 %v2487_v13, %v1855_v26 }
 0x31e   :  { %v2493_v24 = vpop.eup %2492  ;;  %v1830_v14 = vsel %vm1829_vm9, %v2485_v20, %v1826_v55  ;;  %v1838_v63 = vmul.f32 %v2491_v60, %v4414_v6  ;;  %v4442_v3 = vpop.xlane.xlu1 %1739  ;;  %vm1843_vm13 = vweird.f32 %v2491_v60  ;;  %vm1847_vm3 = vcmp.eq.f32.partialorder %v1846_v61, 8.507059e+37 }
 0x31f   :  { %v1860_v26 = vsel %vm1859_vm11, %v2487_v13, %v1856_v34  ;;  %v1835_v21 = vsel %vm4424_vm7, %v1834_v9, %v1830_v14  ;;  %v1868_v50 = vmul.f32 %v2493_v24, %v4416_v1  ;;  %v2495_v19 = vpop.eup %2494  ;;  %v1878_v13 = vand.u32 2147483648, %v4416_v1  ;;  %v4455_v34 = vpop.xlane.xlu0 %1745  ;;  %vm1844_vm15 = vmor %vm1842_vm10, %vm1843_vm13 }
 0x320   :  { %v1865_v55 = vsel %vm4428_vm8, %v1864_v15, %v1860_v26  ;;  %v1836_v20 = vmul.f32 %v1835_v21, %v4202_v40  ;;  %v1839_v44 = vsub.f32 1.0, %v1838_v63  ;;  %v1898_v41 = vmul.f32 %v2495_v19, %v4419_v22 }
 0x321   :  { %v1866_v36 = vmul.f32 %v1865_v55, %v4206_v62  ;;  %v1869_v42 = vsub.f32 1.0, %v1868_v50  ;;  %2496 = vrcp.f32 %v4442_v3  ;;  %vm1873_vm14 = vweird.f32 %v2493_v24 }
 0x322   :  { %v2303_v9 = vsel %vm2302_vm2, %v3831_v16, %v1836_v20  ;;  %v1840_v53 = vmul.f32 %v2491_v60, %v1839_v44  ;;  %v1899_v50 = vsub.f32 1.0, %v1898_v41  ;;  %v1849_v44 = vor.u32 1.1754944e-38, %v1848_v32  ;;  %vm1874_vm4 = vmor %vm1872_vm12, %vm1873_vm14 }
 0x323   :  { %v2305_v40 = vsel %vm2302_vm2, %v3852_v30, %v1866_v36  ;;  %2335 = vst.msk [vmem:[%s4960_s5] sm:$0xff] %vm1501_vm1, %v2303_v9  ;;  %v1870_v62 = vmul.f32 %v2493_v24, %v1869_v42  ;;  %v1908_v63 = vand.u32 2147483648, %v4419_v22  ;;  %2498 = vrcp.f32 %v4455_v34 }
 0x324   :  { %2337 = vst.msk [vmem:[%s4960_s5 + $0x10] sm:$0xff] %vm1501_vm1, %v2305_v40  ;;  %v1841_v16 = vadd.f32 %v2491_v60, %v1840_v53  ;;  %v1900_v15 = vmul.f32 %v2495_v19, %v1899_v50  ;;  %vm1903_vm0 = vweird.f32 %v2495_v19  ;;  %v1906_v42 = vand.u32 2147483647, %v4419_v22 }
 0x325   :  { %v1871_v30 = vadd.f32 %v2493_v24, %v1870_v62  ;;  %v1879_v26 = vor.u32 1.1754944e-38, %v1878_v13  ;;  %vm1904_vm7 = vmor %vm1902_vm6, %vm1903_vm0  ;;  %v1893_v53 = vand.u32 2147483648, %v4442_v3  ;;  %v1921_v40 = vand.u32 2147483647, %v4455_v34 }
 0x326   :  { %v1845_v14 = vsel %vm1844_vm15, %v2491_v60, %v1841_v16  ;;  %v1901_v55 = vadd.f32 %v2495_v19, %v1900_v15  ;;  %v1909_v60 = vor.u32 1.1754944e-38, %v1908_v63  ;;  %vm1907_vm8 = vcmp.eq.f32.partialorder %v1906_v42, 8.507059e+37 }
 0x327   :  { %v1850_v32 = vsel %vm1847_vm3, %v1849_v44, %v1845_v14  ;;  %v1875_v21 = vsel %vm1874_vm4, %v2493_v24, %v1871_v30  ;;  %v4480_v20 = vpop.xlane.xlu1 %1748  ;;  %v2497_v6 = vpop.eup %2496  ;;  %vm1887_vm10 = vweird.f32 %v4442_v3  ;;  %v1923_v16 = vand.u32 2147483648, %v4455_v34 }
 0x328   :  { %v1851_v36 = vmul.f32 %v1850_v32, %v4221_v39  ;;  %v1880_v41 = vsel %vm1877_vm5, %v1879_v26, %v1875_v21  ;;  %2500 = vrcp.f32 %v4480_v20  ;;  %v1905_v31 = vsel %vm1904_vm7, %v2495_v19, %v1901_v55 }
 0x329   :  { %v1881_v1 = vmul.f32 %v1880_v41, %v4217_v8  ;;  %v1883_v24 = vmul.f32 %v2497_v6, %v4442_v3  ;;  %v2499_v61 = vpop.eup %2498  ;;  %v1910_v13 = vsel %vm1907_vm8, %v1909_v60, %v1905_v31  ;;  %vm1888_vm9 = vweird.f32 %v2497_v6 }
 0x32a   :  { %v2304_v22 = vsel %vm2302_vm2, %v3842_v17, %v1851_v36  ;;  %v1911_v8 = vmul.f32 %v1910_v13, %v4229_v23  ;;  %v1913_v9 = vmul.f32 %v2499_v61, %v4455_v34  ;;  %v1891_v17 = vand.u32 2147483647, %v4442_v3  ;;  %vm1889_vm12 = vmor %vm1887_vm10, %vm1888_vm9 }
 0x32b   :  { %2336 = vst.msk [vmem:[%s4960_s5 + $0x8] sm:$0xff] %vm1501_vm1, %v2304_v22  ;;  %v2306_v39 = vsel %vm2302_vm2, %v3868_v43, %v1881_v1  ;;  %v1884_v19 = vsub.f32 1.0, %v1883_v24  ;;  %vm1918_vm11 = vweird.f32 %v2499_v61  ;;  %vm1917_vm14 = vweird.f32 %v4455_v34 }
 0x32c   :  { %2338 = vst.msk [vmem:[%s4960_s5 + $0x18] sm:$0xff] %vm1501_vm1, %v2306_v39  ;;  %v2308_v43 = vsel %vm2302_vm2, %v3895_v33, %v1911_v8  ;;  %v1914_v23 = vsub.f32 1.0, %v1913_v9  ;;  %vm1892_vm13 = vcmp.eq.f32.partialorder %v1891_v17, 8.507059e+37  ;;  %v1894_v33 = vor.u32 1.1754944e-38, %v1893_v53  ;;  %vm1919_vm0 = vmor %vm1917_vm14, %vm1918_vm11 }
 0x32d   :  { %v1885_v62 = vmul.f32 %v2497_v6, %v1884_v19  ;;  %2340 = vst.msk [vmem:[%s4960_s5 + $0x28] sm:$0xff] %vm1501_vm1, %v2308_v43  ;;  %vm1922_vm15 = vcmp.eq.f32.partialorder %v1921_v40, 8.507059e+37  ;;  %v1924_v3 = vor.u32 1.1754944e-38, %v1923_v16  ;;  %v1936_v21 = vand.u32 2147483647, %v4480_v20 }
 0x32e   :  { %v2501_v50 = vpop.eup %2500  ;;  %v1915_v63 = vmul.f32 %v2499_v61, %v1914_v23  ;;  %v1938_v55 = vand.u32 2147483648, %v4480_v20  ;;  %vm1932_vm4 = vweird.f32 %v4480_v20 }
 0x32f   :  { %v1886_v44 = vadd.f32 %v2497_v6, %v1885_v62  ;;  %v1928_v30 = vmul.f32 %v2501_v50, %v4480_v20  ;;  %v1752_v15 = vpop.xlane.xlu2 %1751  ;;  %vm1933_vm3 = vweird.f32 %v2501_v50  ;;  %vm1937_vm6 = vcmp.eq.f32.partialorder %v1936_v21, 8.507059e+37 }
 0x330   :  { %2502 = vrcp.f32 %v1752_v15  ;;  %v1916_v14 = vadd.f32 %v2499_v61, %v1915_v63  ;;  %vm1934_vm5 = vmor %vm1932_vm4, %vm1933_vm3  ;;  %v1953_v8 = vand.u32 2147483648, %v1752_v15  ;;  %v1951_v9 = vand.u32 2147483647, %v1752_v15 }
 0x331   :  { %v1890_v42 = vsel %vm1889_vm12, %v2497_v6, %v1886_v44  ;;  %v1929_v26 = vsub.f32 1.0, %v1928_v30  ;;  %vm1947_vm8 = vweird.f32 %v1752_v15 }
 0x332   :  { %v1895_v32 = vsel %vm1892_vm13, %v1894_v33, %v1890_v42  ;;  %v1920_v41 = vsel %vm1919_vm0, %v2499_v61, %v1916_v14  ;;  %v1954_v40 = vor.u32 1.1754944e-38, %v1953_v8  ;;  %vm1952_vm10 = vcmp.eq.f32.partialorder %v1951_v9, 8.507059e+37 }
 0x333   :  { %v1896_v36 = vmul.f32 %v1895_v32, %v4236_v25  ;;  %v1930_v60 = vmul.f32 %v2501_v50, %v1929_v26  ;;  %v1925_v1 = vsel %vm1922_vm15, %v1924_v3, %v1920_v41  ;;  %v1939_v25 = vor.u32 1.1754944e-38, %v1938_v55 }
 0x334   :  { %v1926_v6 = vmul.f32 %v1925_v1, %v4242_v28 }
 0x335   :  { %v2307_v34 = vsel %vm2302_vm2, %v3881_v46, %v1896_v36  ;;  %v1931_v31 = vadd.f32 %v2501_v50, %v1930_v60 }
 0x336   :  { %v2503_v24 = vpop.eup %2502  ;;  %2339 = vst.msk [vmem:[%s4960_s5 + $0x20] sm:$0xff] %vm1501_vm1, %v2307_v34  ;;  %v2309_v61 = vsel %vm2302_vm2, %v3909_v51, %v1926_v6 }
 0x337   :  { %v1935_v22 = vsel %vm1934_vm5, %v2501_v50, %v1931_v31  ;;  %v1943_v46 = vmul.f32 %v2503_v24, %v1752_v15  ;;  %v1755_v13 = vpop.xlane.xlu0 %1754  ;;  %2341 = vst.msk [vmem:[%s4960_s5 + $0x30] sm:$0xff] %vm1501_vm1, %v2309_v61  ;;  %vm1948_vm7 = vweird.f32 %v2503_v24 }
 0x338   :  { %v1940_v28 = vsel %vm1937_vm6, %v1939_v25, %v1935_v22  ;;  %2504 = vrcp.f32 %v1755_v13  ;;  %vm1949_vm9 = vmor %vm1947_vm8, %vm1948_vm7  ;;  %v1968_v16 = vand.u32 2147483648, %v1755_v13  ;;  %v1966_v30 = vand.u32 2147483647, %v1755_v13 }
 0x339   :  { %v1941_v20 = vmul.f32 %v1940_v28, %v4249_v2  ;;  %v1944_v39 = vsub.f32 1.0, %v1943_v46  ;;  %vm1962_vm12 = vweird.f32 %v1755_v13 }
 0x33a   :  { %v1969_v42 = vor.u32 1.1754944e-38, %v1968_v16  ;;  %vm1967_vm14 = vcmp.eq.f32.partialorder %v1966_v30, 8.507059e+37 }
 0x33b   :  { %v2310_v19 = vsel %vm2302_vm2, %v3921_v35, %v1941_v20  ;;  %v1945_v51 = vmul.f32 %v2503_v24, %v1944_v39 }
 0x33c   :  { %2342 = vst.msk [vmem:[%s4960_s5 + $0x38] sm:$0xff] %vm1501_vm1, %v2310_v19 }
 0x33d   :  { %v1946_v17 = vadd.f32 %v2503_v24, %v1945_v51 }
 0x33e   :  { %v2505_v53 = vpop.eup %2504 }
 0x33f   :  { %v1950_v2 = vsel %vm1949_vm9, %v2503_v24, %v1946_v17  ;;  %v1958_v43 = vmul.f32 %v2505_v53, %v1755_v13  ;;  %v1758_v62 = vpop.xlane.xlu1 %1757  ;;  %vm1963_vm11 = vweird.f32 %v2505_v53 }
 0x340   :  { %v1955_v23 = vsel %vm1952_vm10, %v1954_v40, %v1950_v2  ;;  %2506 = vrcp.f32 %v1758_v62  ;;  %vm1964_vm13 = vmor %vm1962_vm12, %vm1963_vm11  ;;  %v1983_v21 = vand.u32 2147483648, %v1758_v62  ;;  %v1981_v41 = vand.u32 2147483647, %v1758_v62 }
 0x341   :  { %v1956_v35 = vmul.f32 %v1955_v23, %v4256_v10  ;;  %v1959_v50 = vsub.f32 1.0, %v1958_v43  ;;  %vm1977_vm0 = vweird.f32 %v1758_v62 }
 0x342   :  { %v1984_v34 = vor.u32 1.1754944e-38, %v1983_v21  ;;  %vm1982_vm4 = vcmp.eq.f32.partialorder %v1981_v41, 8.507059e+37 }
 0x343   :  { %v2311_v44 = vsel %vm2302_vm2, %v3935_v38, %v1956_v35  ;;  %v1960_v63 = vmul.f32 %v2505_v53, %v1959_v50 }
 0x344   :  { %2343 = vst.msk [vmem:[%s4960_s5 + $0x40] sm:$0xff] %vm1501_vm1, %v2311_v44 }
 0x345   :  { %v1961_v15 = vadd.f32 %v2505_v53, %v1960_v63 }
 0x346   :  { %v2507_v33 = vpop.eup %2506 }
 0x347   :  { %v1965_v10 = vsel %vm1964_vm13, %v2505_v53, %v1961_v15  ;;  %v1973_v14 = vmul.f32 %v2507_v33, %v1758_v62  ;;  %v1761_v26 = vpop.xlane.xlu2 %1760  ;;  %vm1978_vm15 = vweird.f32 %v2507_v33 }
 0x348   :  { %v1970_v32 = vsel %vm1967_vm14, %v1969_v42, %v1965_v10  ;;  %2508 = vrcp.f32 %v1761_v26  ;;  %vm1979_vm3 = vmor %vm1977_vm0, %vm1978_vm15  ;;  %v1998_v61 = vand.u32 2147483648, %v1761_v26  ;;  %v1996_v13 = vand.u32 2147483647, %v1761_v26 }
 0x349   :  { %v1971_v38 = vmul.f32 %v1970_v32, %v4263_v59  ;;  %v1974_v3 = vsub.f32 1.0, %v1973_v14  ;;  %vm1992_vm6 = vweird.f32 %v1761_v26 }
 0x34a   :  { %v1999_v39 = vor.u32 1.1754944e-38, %v1998_v61  ;;  %vm1997_vm8 = vcmp.eq.f32.partialorder %v1996_v13, 8.507059e+37 }
 0x34b   :  { %v2312_v55 = vsel %vm2302_vm2, %v3949_v27, %v1971_v38  ;;  %v1975_v36 = vmul.f32 %v2507_v33, %v1974_v3 }
 0x34c   :  { %2344 = vst.msk [vmem:[%s4960_s5 + $0x48] sm:$0xff] %vm1501_vm1, %v2312_v55 }
 0x34d   :  { %v1976_v60 = vadd.f32 %v2507_v33, %v1975_v36 }
 0x34e   :  { %v2509_v1 = vpop.eup %2508 }
 0x34f   :  { %v1980_v59 = vsel %vm1979_vm3, %v2507_v33, %v1976_v60  ;;  %v1988_v6 = vmul.f32 %v2509_v1, %v1761_v26  ;;  %v1764_v31 = vpop.xlane.xlu0 %1763  ;;  %vm1993_vm5 = vweird.f32 %v2509_v1 }
 0x350   :  { %v1985_v24 = vsel %vm1982_vm4, %v1984_v34, %v1980_v59  ;;  %2510 = vrcp.f32 %v1764_v31  ;;  %vm1994_vm7 = vmor %vm1992_vm6, %vm1993_vm5  ;;  %v2013_v17 = vand.u32 2147483648, %v1764_v31  ;;  %v2011_v2 = vand.u32 2147483647, %v1764_v31 }
 0x351   :  { %v1986_v27 = vmul.f32 %v1985_v24, %v4270_v5  ;;  %v1989_v25 = vsub.f32 1.0, %v1988_v6  ;;  %vm2007_vm10 = vweird.f32 %v1764_v31 }
 0x352   :  { %v2014_v23 = vor.u32 1.1754944e-38, %v2013_v17  ;;  %vm2012_vm12 = vcmp.eq.f32.partialorder %v2011_v2, 8.507059e+37 }
 0x353   :  { %v2313_v22 = vsel %vm2302_vm2, %v3961_v12, %v1986_v27  ;;  %v1990_v46 = vmul.f32 %v2509_v1, %v1989_v25 }
 0x354   :  { %2345 = vst.msk [vmem:[%s4960_s5 + $0x50] sm:$0xff] %vm1501_vm1, %v2313_v22 }
 0x355   :  { %v1991_v28 = vadd.f32 %v2509_v1, %v1990_v46 }
 0x356   :  { %v2511_v20 = vpop.eup %2510 }
 0x357   :  { %v1995_v5 = vsel %vm1994_vm7, %v2509_v1, %v1991_v28  ;;  %v2003_v8 = vmul.f32 %v2511_v20, %v1764_v31  ;;  %v1767_v19 = vpop.xlane.xlu1 %1766  ;;  %vm2008_vm9 = vweird.f32 %v2511_v20 }
 0x358   :  { %v2000_v51 = vsel %vm1997_vm8, %v1999_v39, %v1995_v5  ;;  %2512 = vrcp.f32 %v1767_v19  ;;  %vm2009_vm11 = vmor %vm2007_vm10, %vm2008_vm9  ;;  %v2028_v30 = vand.u32 2147483648, %v1767_v19  ;;  %v2026_v42 = vand.u32 2147483647, %v1767_v19 }
 0x359   :  { %v2001_v12 = vmul.f32 %v2000_v51, %v4277_v7  ;;  %v2004_v9 = vsub.f32 1.0, %v2003_v8  ;;  %vm2022_vm14 = vweird.f32 %v1767_v19 }
 0x35a   :  { %vm2027_vm0 = vcmp.eq.f32.partialorder %v2026_v42, 8.507059e+37 }
 0x35b   :  { %v2314_v53 = vsel %vm2302_vm2, %v3975_v58, %v2001_v12  ;;  %v2005_v40 = vmul.f32 %v2511_v20, %v2004_v9 }
 0x35c   :  { %2346 = vst.msk [vmem:[%s4960_s5 + $0x58] sm:$0xff] %vm1501_vm1, %v2314_v53 }
 0x35d   :  { %v2006_v43 = vadd.f32 %v2511_v20, %v2005_v40 }
 0x35e   :  { %v2513_v62 = vpop.eup %2512 }
 0x35f   :  { %v2010_v7 = vsel %vm2009_vm11, %v2511_v20, %v2006_v43  ;;  %v2018_v35 = vmul.f32 %v2513_v62, %v1767_v19  ;;  %v1776_v50 = vpop.xlane.xlu1 %1775  ;;  %vm2023_vm13 = vweird.f32 %v2513_v62 }
 0x360   :  { %v2015_v16 = vsel %vm2012_vm12, %v2014_v23, %v2010_v7  ;;  %2514 = vrcp.f32 %v1776_v50  ;;  %v1770_v58 = vpop.xlane.xlu2 %1769  ;;  %vm2024_vm15 = vmor %vm2022_vm14, %vm2023_vm13  ;;  %v2071_v3 = vand.u32 2147483647, %v1776_v50  ;;  %v2073_v55 = vand.u32 2147483648, %v1776_v50 }
 0x361   :  { %v2016_v44 = vmul.f32 %v2015_v16, %v4284_v57  ;;  %v2019_v63 = vsub.f32 1.0, %v2018_v35  ;;  %2516 = vrcp.f32 %v1770_v58  ;;  %v2029_v57 = vor.u32 1.1754944e-38, %v2028_v30 }
 0x362   :  { %v2041_v34 = vand.u32 2147483647, %v1770_v58  ;;  %v2043_v31 = vand.u32 2147483648, %v1770_v58  ;;  %vm2067_vm3 = vweird.f32 %v1776_v50  ;;  %vm4601_vm5 = vcmp.eq.f32.partialorder %v2071_v3, 8.507059e+37 }
 0x363   :  { %v2315_v15 = vsel %vm2302_vm2, %v3987_v52, %v2016_v44  ;;  %v2020_v33 = vmul.f32 %v2513_v62, %v2019_v63  ;;  %v2074_v46 = vor.u32 1.1754944e-38, %v2073_v55  ;;  %vm2037_vm7 = vweird.f32 %v1770_v58 }
 0x364   :  { %2347 = vst.msk [vmem:[%s4960_s5 + $0x60] sm:$0xff] %vm1501_vm1, %v2315_v15  ;;  %vm4606_vm8 = vcmp.eq.f32.partialorder %v2041_v34, 8.507059e+37  ;;  %v2044_v20 = vor.u32 1.1754944e-38, %v2043_v31 }
 0x365   :  { %v2021_v10 = vadd.f32 %v2513_v62, %v2020_v33 }
 0x366   :  { %v2515_v14 = vpop.eup %2514 }
 0x367   :  { %v2517_v26 = vpop.eup %2516  ;;  %v2025_v32 = vsel %vm2024_vm15, %v2513_v62, %v2021_v10  ;;  %v2063_v38 = vmul.f32 %v2515_v14, %v1776_v50  ;;  %v4584_v21 = vpop.xlane.xlu0 %1772  ;;  %vm2068_vm4 = vweird.f32 %v2515_v14 }
 0x368   :  { %v2030_v52 = vsel %vm2027_vm0, %v2029_v57, %v2025_v32  ;;  %v2033_v36 = vmul.f32 %v2517_v26, %v1770_v58  ;;  %v4586_v41 = vpop.xlane.xlu1 %1784  ;;  %2518 = vrcp.f32 %v4584_v21  ;;  %vm2038_vm6 = vweird.f32 %v2517_v26  ;;  %vm2069_vm9 = vmor %vm2067_vm3, %vm2068_vm4 }
 0x369   :  { %v2031_v60 = vmul.f32 %v2030_v52, %v4292_v45  ;;  %v2064_v1 = vsub.f32 1.0, %v2063_v38  ;;  %2520 = vrcp.f32 %v4586_v41  ;;  %v4591_v59 = vpop.xlane.xlu2 %1778  ;;  %v2116_v61 = vand.u32 2147483647, %v4586_v41  ;;  %vm2039_vm11 = vmor %vm2037_vm7, %vm2038_vm6 }
 0x36a   :  { %v2034_v6 = vsub.f32 1.0, %v2033_v36  ;;  %2522 = vrcp.f32 %v4591_v59  ;;  %vm2112_vm10 = vweird.f32 %v4586_v41  ;;  %v2118_v39 = vand.u32 2147483648, %v4586_v41 }
 0x36b   :  { %v2316_v24 = vsel %vm2302_vm2, %v4001_v29, %v2031_v60  ;;  %v2065_v27 = vmul.f32 %v2515_v14, %v2064_v1  ;;  %vm2082_vm12 = vweird.f32 %v4591_v59  ;;  %v2086_v19 = vand.u32 2147483647, %v4591_v59  ;;  %v5200_v29 = vld [vmem:[#allocation18_spill] sm:$0xff] }
 0x36c   :  { %2348 = vst.msk [vmem:[%s4960_s5 + $0x68] sm:$0xff] %vm1501_vm1, %v2316_v24  ;;  %v2035_v25 = vmul.f32 %v2517_v26, %v2034_v6  ;;  %vm4621_vm13 = vcmp.eq.f32.partialorder %v2116_v61, 8.507059e+37  ;;  %v2088_v2 = vand.u32 2147483648, %v4591_v59  ;;  %v2056_v35 = vand.u32 2147483647, %v4584_v21 }
 0x36d   :  { %v2066_v22 = vadd.f32 %v2515_v14, %v2065_v27  ;;  %v2058_v44 = vand.u32 2147483648, %v4584_v21  ;;  %vm2052_vm3 = vweird.f32 %v4584_v21  ;;  %v2119_v57 = vor.u32 1.1754944e-38, %v2118_v39 }
 0x36e   :  { %v4610_v13 = vpop.eup %2518  ;;  %v2036_v28 = vadd.f32 %v2517_v26, %v2035_v25  ;;  %vm4658_vm4 = vcmp.eq.f32.partialorder %v2086_v19, 8.507059e+37  ;;  %v2089_v36 = vor.u32 1.1754944e-38, %v2088_v2 }
 0x36f   :  { %v2521_v5 = vpop.eup %2520  ;;  %v2070_v8 = vsel %vm2069_vm9, %v2515_v14, %v2066_v22  ;;  %v2048_v51 = vmul.f32 %v4610_v13, %v4584_v21  ;;  %v4637_v30 = vpop.xlane.xlu0 %1781  ;;  %vm2053_vm14 = vweird.f32 %v4610_v13  ;;  %v2059_v21 = vor.u32 1.1754944e-38, %v2058_v44 }
 0x370   :  { %v2523_v12 = vpop.eup %2522  ;;  %v2075_v9 = vsel %vm4601_vm5, %v2074_v46, %v2070_v8  ;;  %v2040_v17 = vsel %vm2039_vm11, %v2517_v26, %v2036_v28  ;;  %v2108_v53 = vmul.f32 %v2521_v5, %v4586_v41  ;;  %v4626_v43 = vpop.xlane.xlu1 %1793  ;;  %vm2113_vm15 = vweird.f32 %v2521_v5  ;;  %vm4665_vm5 = vmor %vm2052_vm3, %vm2053_vm14 }
 0x371   :  { %v2076_v62 = vmul.f32 %v2075_v9, %v4301_v18  ;;  %v2045_v23 = vsel %vm4606_vm8, %v2044_v20, %v2040_v17  ;;  %v2078_v7 = vmul.f32 %v2523_v12, %v4591_v59  ;;  %v2049_v58 = vsub.f32 1.0, %v2048_v51  ;;  %v4635_v63 = vpop.xlane.xlu2 %1787  ;;  %vm2114_vm6 = vmor %vm2112_vm10, %vm2113_vm15 }
 0x372   :  { %v2046_v50 = vmul.f32 %v2045_v23, %v4307_v56  ;;  %v2109_v16 = vsub.f32 1.0, %v2108_v53  ;;  %2524 = vrcp.f32 %v4626_v43  ;;  %v5193_v56 = vld [vmem:[#allocation25_spill] sm:$0xff]  ;;  %vm2083_vm0 = vweird.f32 %v2523_v12 }
 0x373   :  { %v2319_v18 = vsel %vm2302_vm2, %v3821_v11, %v2076_v62  ;;  %v2079_v15 = vsub.f32 1.0, %v2078_v7  ;;  %v2050_v10 = vmul.f32 %v4610_v13, %v2049_v58  ;;  %2526 = vrcp.f32 %v4635_v63  ;;  %vm2084_vm7 = vmor %vm2082_vm12, %vm2083_vm0  ;;  %v5215_v58 = vld [vmem:[#allocation26_spill] sm:$0xff] }
 0x374   :  { %2351 = vst.msk [vmem:[%s4960_s5 + $0x80] sm:$0xff] %vm1501_vm1, %v2319_v18  ;;  %v2317_v33 = vsel %vm2302_vm2, %v5193_v56, %v2046_v50  ;;  %v2110_v42 = vmul.f32 %v2521_v5, %v2109_v16  ;;  %v2161_v52 = vand.u32 2147483647, %v4626_v43  ;;  %2528 = vrcp.f32 %v4637_v30 }
 0x375   :  { %2349 = vst.msk [vmem:[%s4960_s5 + $0x70] sm:$0xff] %vm1501_vm1, %v2317_v33  ;;  %v2080_v11 = vmul.f32 %v2523_v12, %v2079_v15  ;;  %v2051_v32 = vadd.f32 %v4610_v13, %v2050_v10  ;;  %vm2057_vm8 = vcmp.eq.f32.partialorder %v2056_v35, 8.507059e+37  ;;  %vm2157_vm9 = vweird.f32 %v4626_v43 }
 0x376   :  { %v2111_v14 = vadd.f32 %v2521_v5, %v2110_v42  ;;  %vm4689_vm10 = vcmp.eq.f32.partialorder %v2161_v52, 8.507059e+37  ;;  %v2163_v46 = vand.u32 2147483648, %v4626_v43  ;;  %vm2127_vm11 = vweird.f32 %v4635_v63 }
 0x377   :  { %v2081_v3 = vadd.f32 %v2523_v12, %v2080_v11  ;;  %v2055_v60 = vsel %vm4665_vm5, %v4610_v13, %v2051_v32  ;;  %v5201_v13 = vld [vmem:[#allocation40_spill] sm:$0xff]  ;;  %v2131_v19 = vand.u32 2147483647, %v4635_v63  ;;  %v2133_v51 = vand.u32 2147483648, %v4635_v63 }
 0x378   :  { %v2115_v55 = vsel %vm2114_vm6, %v2521_v5, %v2111_v14  ;;  %v4678_v1 = vpop.xlane.xlu1 %1802  ;;  %v2525_v41 = vpop.eup %2524  ;;  %v2060_v31 = vsel %vm2057_vm8, %v2059_v21, %v2055_v60  ;;  %v5202_v5 = vld [vmem:[#allocation38_spill] sm:$0xff]  ;;  %v2164_v2 = vor.u32 1.1754944e-38, %v2163_v46  ;;  %v2103_v62 = vand.u32 2147483648, %v4637_v30 }
 0x379   :  { %v2120_v34 = vsel %vm4621_vm13, %v2119_v57, %v2115_v55  ;;  %v2085_v6 = vsel %vm2084_vm7, %v2523_v12, %v2081_v3  ;;  %v2061_v27 = vmul.f32 %v2060_v31, %v4316_v47  ;;  %v2153_v45 = vmul.f32 %v2525_v41, %v4626_v43  ;;  %v2527_v25 = vpop.eup %2526  ;;  %v4714_v9 = vpop.xlane.xlu2 %1796  ;;  %v5207_v3 = vld [vmem:[#allocation8_spill] sm:$0xff] }
 0x37a   :  { %v2121_v24 = vmul.f32 %v2120_v34, %v4322_v0  ;;  %v2090_v59 = vsel %vm4658_vm4, %v2089_v36, %v2085_v6  ;;  %v2123_v20 = vmul.f32 %v2527_v25, %v4635_v63  ;;  %v2529_v39 = vpop.eup %2528  ;;  %v2101_v12 = vand.u32 2147483647, %v4637_v30  ;;  %v5210_v34 = vld [vmem:[#allocation45_spill] sm:$0xff] }
 0x37b   :  { %v2091_v61 = vmul.f32 %v2090_v59, %v4328_v49  ;;  %v2318_v47 = vsel %vm2302_vm2, %v5201_v13, %v2061_v27  ;;  %v2154_v28 = vsub.f32 1.0, %v2153_v45  ;;  %v4702_v49 = vpop.xlane.xlu0 %1790  ;;  %vm2158_vm12 = vweird.f32 %v2525_v41 }
 0x37c   :  { %v2322_v0 = vsel %vm2302_vm2, %v5200_v29, %v2121_v24  ;;  %v2124_v53 = vsub.f32 1.0, %v2123_v20  ;;  %v2093_v40 = vmul.f32 %v2529_v39, %v4637_v30  ;;  %2350 = vst.msk [vmem:[%s4960_s5 + $0x78] sm:$0xff] %vm1501_vm1, %v2318_v47  ;;  %vm2128_vm13 = vweird.f32 %v2527_v25  ;;  %vm2159_vm14 = vmor %vm2157_vm9, %vm2158_vm12 }
 0x37d   :  { %2354 = vst.msk [vmem:[%s4960_s5 + $0x98] sm:$0xff] %vm1501_vm1, %v2322_v0  ;;  %v2320_v8 = vsel %vm2302_vm2, %v5202_v5, %v2091_v61  ;;  %v2155_v17 = vmul.f32 %v2525_v41, %v2154_v28  ;;  %2530 = vrcp.f32 %v4678_v1  ;;  %vm4730_vm15 = vcmp.eq.f32.partialorder %v2131_v19, 8.507059e+37  ;;  %vm2129_vm5 = vmor %vm2127_vm11, %vm2128_vm13 }
 0x37e   :  { %2352 = vst.msk [vmem:[%s4960_s5 + $0x88] sm:$0xff] %vm1501_vm1, %v2320_v8  ;;  %v2125_v7 = vmul.f32 %v2527_v25, %v2124_v53  ;;  %v2094_v35 = vsub.f32 1.0, %v2093_v40  ;;  %2532 = vrcp.f32 %v4714_v9  ;;  %v2134_v16 = vor.u32 1.1754944e-38, %v2133_v51 }
 0x37f   :  { %v2156_v23 = vadd.f32 %v2525_v41, %v2155_v17  ;;  %vm2097_vm0 = vweird.f32 %v4637_v30  ;;  %vm4735_vm3 = vcmp.eq.f32.partialorder %v2101_v12, 8.507059e+37  ;;  %vm2098_vm4 = vweird.f32 %v2529_v39 }
 0x380   :  { %v2126_v18 = vadd.f32 %v2527_v25, %v2125_v7  ;;  %v2095_v15 = vmul.f32 %v2529_v39, %v2094_v35  ;;  %v4739_v56 = vpop.xlane.xlu1 %1811  ;;  %v2104_v33 = vor.u32 1.1754944e-38, %v2103_v62  ;;  %v2206_v42 = vand.u32 2147483647, %v4678_v1  ;;  %vm2099_vm6 = vmor %vm2097_vm0, %vm2098_vm4 }
 0x381   :  { %v2160_v44 = vsel %vm2159_vm14, %v2525_v41, %v2156_v23  ;;  %2534 = vrcp.f32 %v4702_v49  ;;  %v2208_v57 = vand.u32 2147483648, %v4678_v1  ;;  %vm2202_vm7 = vweird.f32 %v4678_v1  ;;  %v4780_v27 = vpop.xlane.xlu2 %1805 }
 0x382   :  { %v2165_v43 = vsel %vm4689_vm10, %v2164_v2, %v2160_v44  ;;  %v2130_v11 = vsel %vm2129_vm5, %v2527_v25, %v2126_v18  ;;  %v2096_v14 = vadd.f32 %v2529_v39, %v2095_v15  ;;  %v2176_v63 = vand.u32 2147483647, %v4714_v9  ;;  %v5216_v15 = vld [vmem:[#allocation46_spill] sm:$0xff] }
 0x383   :  { %v2166_v10 = vmul.f32 %v2165_v43, %v4343_v54  ;;  %v2531_v26 = vpop.eup %2530  ;;  %v2135_v32 = vsel %vm4730_vm15, %v2134_v16, %v2130_v11  ;;  %2536 = vrcp.f32 %v4739_v56  ;;  %v4762_v36 = vpop.xlane.xlu0 %1799  ;;  %vm4770_vm8 = vcmp.eq.f32.partialorder %v2206_v42, 8.507059e+37 }
 0x384   :  { %v2533_v38 = vpop.eup %2532  ;;  %v2136_v21 = vmul.f32 %v2135_v32, %v4349_v48  ;;  %v2100_v52 = vsel %vm2099_vm6, %v2529_v39, %v2096_v14  ;;  %v2198_v55 = vmul.f32 %v2531_v26, %v4678_v1  ;;  %v2178_v48 = vand.u32 2147483648, %v4714_v9  ;;  %v5214_v1 = vld [vmem:[#allocation39_spill] sm:$0xff] }
 0x385   :  { %v2325_v54 = vsel %vm2302_vm2, %v5207_v3, %v2166_v10  ;;  %v2105_v30 = vsel %vm4735_vm3, %v2104_v33, %v2100_v52  ;;  %v2168_v41 = vmul.f32 %v2533_v38, %v4714_v9  ;;  %v2209_v59 = vor.u32 1.1754944e-38, %v2208_v57 }
 0x386   :  { %2357 = vst.msk [vmem:[%s4960_s5 + $0xb0] sm:$0xff] %vm1501_vm1, %v2325_v54  ;;  %v2323_v6 = vsel %vm2302_vm2, %v5210_v34, %v2136_v21  ;;  %v2106_v31 = vmul.f32 %v2105_v30, %v4337_v4  ;;  %v2199_v24 = vsub.f32 1.0, %v2198_v55  ;;  %vm2172_vm9 = vweird.f32 %v4714_v9  ;;  %v5213_v4 = vld [vmem:[#allocation37_spill] sm:$0xff]  ;;  %v5219_v30 = vld [vmem:[#allocation23_spill] sm:$0xff] }
 0x387   :  { %v2535_v45 = vpop.eup %2534  ;;  %2355 = vst.msk [vmem:[%s4960_s5 + $0xa0] sm:$0xff] %vm1501_vm1, %v2323_v6  ;;  %v2169_v25 = vsub.f32 1.0, %v2168_v41  ;;  %vm4787_vm10 = vcmp.eq.f32.partialorder %v2176_v63, 8.507059e+37  ;;  %vm2142_vm11 = vweird.f32 %v4702_v49  ;;  %vm2203_vm12 = vweird.f32 %v2531_v26  ;;  %v5220_v41 = vld [vmem:[#allocation49_spill] sm:$0xff] }
 0x388   :  { %v2321_v22 = vsel %vm2302_vm2, %v5213_v4, %v2106_v31  ;;  %v2200_v46 = vmul.f32 %v2531_v26, %v2199_v24  ;;  %v2138_v29 = vmul.f32 %v2535_v45, %v4702_v49  ;;  %vm2173_vm13 = vweird.f32 %v2533_v38  ;;  %vm2204_vm14 = vmor %vm2202_vm7, %vm2203_vm12  ;;  %v4827_v11 = vpop.xlane.xlu1 %1820  ;;  %v5221_v31 = vld [vmem:[#allocation33_spill] sm:$0xff] }
 0x389   :  { %v2537_v0 = vpop.eup %2536  ;;  %2353 = vst.msk [vmem:[%s4960_s5 + $0x90] sm:$0xff] %vm1501_vm1, %v2321_v22  ;;  %v2170_v13 = vmul.f32 %v2533_v38, %v2169_v25  ;;  %v2179_v47 = vor.u32 1.1754944e-38, %v2178_v48  ;;  %2538 = vrcp.f32 %v4780_v27  ;;  %v2146_v39 = vand.u32 2147483647, %v4702_v49  ;;  %vm2174_vm0 = vmor %vm2172_vm9, %vm2173_vm13  ;;  %v4845_v55 = vpop.xlane.xlu2 %1814 }
 0x38a   :  { %v2201_v28 = vadd.f32 %v2531_v26, %v2200_v46  ;;  %v2139_v20 = vsub.f32 1.0, %v2138_v29  ;;  %v2243_v5 = vmul.f32 %v2537_v0, %v4739_v56  ;;  %vm2143_vm15 = vweird.f32 %v2535_v45 }
 0x38b   :  { %v2171_v8 = vadd.f32 %v2533_v38, %v2170_v13  ;;  %v2148_v19 = vand.u32 2147483648, %v4702_v49  ;;  %v2251_v51 = vand.u32 2147483647, %v4739_v56  ;;  %v2253_v40 = vand.u32 2147483648, %v4739_v56  ;;  %v4816_v9 = vpop.xlane.xlu0 %1808  ;;  %vm2144_vm4 = vmor %vm2142_vm11, %vm2143_vm15  ;;  %v5217_v49 = vld [vmem:[#allocation30_spill] sm:$0xff] }
 0x38c   :  { %v2205_v12 = vsel %vm2204_vm14, %v2531_v26, %v2201_v28  ;;  %v2140_v17 = vmul.f32 %v2535_v45, %v2139_v20  ;;  %v2244_v53 = vsub.f32 1.0, %v2243_v5  ;;  %vm2248_vm3 = vweird.f32 %v2537_v0  ;;  %v5218_v26 = vld [vmem:[#allocation17_spill] sm:$0xff] }
 0x38d   :  { %v2210_v2 = vsel %vm4770_vm8, %v2209_v59, %v2205_v12  ;;  %v2175_v62 = vsel %vm2174_vm0, %v2533_v38, %v2171_v8  ;;  %2540 = vrcp.f32 %v4762_v36  ;;  %vm2147_vm5 = vcmp.eq.f32.partialorder %v2146_v39, 8.507059e+37 }
 0x38e   :  { %v2211_v23 = vmul.f32 %v2210_v2, %v5214_v1  ;;  %v2180_v7 = vsel %vm4787_vm10, %v2179_v47, %v2175_v62  ;;  %v2141_v35 = vadd.f32 %v2535_v45, %v2140_v17  ;;  %v2245_v50 = vmul.f32 %v2537_v0, %v2244_v53  ;;  %v5222_v47 = vld [vmem:[#allocation19_spill] sm:$0xff] }
 0x38f   :  { %v2539_v16 = vpop.eup %2538  ;;  %v2181_v44 = vmul.f32 %v2180_v7, %v5215_v58  ;;  %v2149_v18 = vor.u32 1.1754944e-38, %v2148_v19  ;;  %vm2247_vm6 = vweird.f32 %v4739_v56  ;;  %vm2252_vm8 = vcmp.eq.f32.partialorder %v2251_v51, 8.507059e+37  ;;  %v5223_v51 = vld [vmem:[#allocation15_spill] sm:$0xff] }
 0x390   :  { %v2328_v43 = vsel %vm2302_vm2, %v5216_v15, %v2211_v23  ;;  %v2145_v33 = vsel %vm2144_vm4, %v2535_v45, %v2141_v35  ;;  %v2246_v42 = vadd.f32 %v2537_v0, %v2245_v50  ;;  %v2213_v10 = vmul.f32 %v2539_v16, %v4780_v27  ;;  %vm2249_vm7 = vmor %vm2247_vm6, %vm2248_vm3  ;;  %v5226_v1 = vld [vmem:[#allocation3_spill] sm:$0xff] }
 0x391   :  { %2360 = vst.msk [vmem:[%s4960_s5 + $0xc8] sm:$0xff] %vm1501_vm1, %v2328_v43  ;;  %v2326_v14 = vsel %vm2302_vm2, %v5217_v49, %v2181_v44  ;;  %v2150_v56 = vsel %vm2147_vm5, %v2149_v18, %v2145_v33  ;;  %v2254_v57 = vor.u32 1.1754944e-38, %v2253_v40  ;;  %v2221_v3 = vand.u32 2147483647, %v4780_v27  ;;  %v5227_v44 = vld [vmem:[#allocation54_spill] sm:$0xff] }
 0x392   :  { %2358 = vst.msk [vmem:[%s4960_s5 + $0xb8] sm:$0xff] %vm1501_vm1, %v2326_v14  ;;  %v2151_v32 = vmul.f32 %v2150_v56, %v5218_v26  ;;  %v2250_v63 = vsel %vm2249_vm7, %v2537_v0, %v2246_v42  ;;  %v2214_v38 = vsub.f32 1.0, %v2213_v10  ;;  %vm2218_vm9 = vweird.f32 %v2539_v16 }
 0x393   :  { %v2541_v54 = vpop.eup %2540  ;;  %v2255_v21 = vsel %vm2252_vm8, %v2254_v57, %v2250_v63  ;;  %v2223_v52 = vand.u32 2147483648, %v4780_v27  ;;  %2542 = vrcp.f32 %v4827_v11  ;;  %vm2217_vm10 = vweird.f32 %v4780_v27  ;;  %v4869_v46 = vpop.xlane.xlu0 %1817 }
 0x394   :  { %v2324_v60 = vsel %vm2302_vm2, %v5219_v30, %v2151_v32  ;;  %v2256_v48 = vmul.f32 %v2255_v21, %v5220_v41  ;;  %v2215_v34 = vmul.f32 %v2539_v16, %v2214_v38  ;;  %v2183_v6 = vmul.f32 %v2541_v54, %v4762_v36  ;;  %vm2219_vm11 = vmor %vm2217_vm10, %vm2218_vm9  ;;  %v5230_v38 = vld [vmem:[#allocation10_spill] sm:$0xff] }
 0x395   :  { %2356 = vst.msk [vmem:[%s4960_s5 + $0xa8] sm:$0xff] %vm1501_vm1, %v2324_v60  ;;  %2544 = vrcp.f32 %v4845_v55  ;;  %vm2222_vm12 = vcmp.eq.f32.partialorder %v2221_v3, 8.507059e+37  ;;  %v2224_v25 = vor.u32 1.1754944e-38, %v2223_v52  ;;  %v2191_v61 = vand.u32 2147483647, %v4762_v36 }
 0x396   :  { %v2331_v24 = vsel %vm2302_vm2, %v5221_v31, %v2256_v48  ;;  %v2216_v59 = vadd.f32 %v2539_v16, %v2215_v34  ;;  %v2184_v45 = vsub.f32 1.0, %v2183_v6  ;;  %v2193_v27 = vand.u32 2147483648, %v4762_v36  ;;  %v5231_v34 = vld [vmem:[#allocation2_spill] sm:$0xff] }
 0x397   :  { %2363 = vst.msk [vmem:[%s4960_s5 + $0xe0] sm:$0xff] %vm1501_vm1, %v2331_v24  ;;  %vm2188_vm13 = vweird.f32 %v2541_v54  ;;  %2546 = vrcp.f32 %v4816_v9  ;;  %v2296_v13 = vand.u32 2147483647, %v4827_v11  ;;  %vm2187_vm14 = vweird.f32 %v4762_v36  ;;  %v5232_v24 = vld [vmem:[#allocation16_spill] sm:$0xff] }
 0x398   :  { %v2220_v4 = vsel %vm2219_vm11, %v2539_v16, %v2216_v59  ;;  %v2185_v22 = vmul.f32 %v2541_v54, %v2184_v45  ;;  %vm2189_vm15 = vmor %vm2187_vm14, %vm2188_vm13  ;;  %v2194_v5 = vor.u32 1.1754944e-38, %v2193_v27  ;;  %v2298_v8 = vand.u32 2147483648, %v4827_v11  ;;  %v5233_v27 = vld [vmem:[#allocation14_spill] sm:$0xff] }
 0x399   :  { %v2543_v29 = vpop.eup %2542  ;;  %v2225_v0 = vsel %vm2222_vm12, %v2224_v25, %v2220_v4  ;;  %2548 = vrcp.f32 %v4869_v46  ;;  %vm2192_vm0 = vcmp.eq.f32.partialorder %v2191_v61, 8.507059e+37  ;;  %vm2292_vm3 = vweird.f32 %v4827_v11  ;;  %v5234_v4 = vld [vmem:[#allocation9_spill] sm:$0xff] }
 0x39a   :  { %v2226_v28 = vmul.f32 %v2225_v0, %v5222_v47  ;;  %v2186_v20 = vadd.f32 %v2541_v54, %v2185_v22  ;;  %v2288_v39 = vmul.f32 %v2543_v29, %v4827_v11  ;;  %vm4885_vm4 = vcmp.eq.f32.partialorder %v2296_v13, 8.507059e+37  ;;  %v5235_v13 = vld [vmem:[#allocation7_spill] sm:$0xff] }
 0x39b   :  { %v2545_v19 = vpop.eup %2544  ;;  %vm2293_vm5 = vweird.f32 %v2543_v29  ;;  %v2266_v35 = vand.u32 2147483647, %v4845_v55  ;;  %v2299_v50 = vor.u32 1.1754944e-38, %v2298_v8  ;;  %vm2262_vm6 = vweird.f32 %v4845_v55 }
 0x39c   :  { %v2329_v12 = vsel %vm2302_vm2, %v5223_v51, %v2226_v28  ;;  %v2190_v17 = vsel %vm2189_vm15, %v2541_v54, %v2186_v20  ;;  %v2289_v53 = vsub.f32 1.0, %v2288_v39  ;;  %v2258_v2 = vmul.f32 %v2545_v19, %v4845_v55  ;;  %vm2294_vm8 = vmor %vm2292_vm3, %vm2293_vm5  ;;  %v5236_v28 = vld [vmem:[#allocation42_spill] sm:$0xff] }
 0x39d   :  { %2361 = vst.msk [vmem:[%s4960_s5 + $0xd0] sm:$0xff] %vm1501_vm1, %v2329_v12  ;;  %v2195_v36 = vsel %vm2192_vm0, %v2194_v5, %v2190_v17  ;;  %v2547_v62 = vpop.eup %2546  ;;  %v2268_v43 = vand.u32 2147483648, %v4845_v55  ;;  %vm2232_vm7 = vweird.f32 %v4816_v9  ;;  %vm2263_vm9 = vweird.f32 %v2545_v19  ;;  %v5237_v39 = vld [vmem:[#allocation34_spill] sm:$0xff] }
 0x39e   :  { %v2196_v23 = vmul.f32 %v2195_v36, %v5226_v1  ;;  %v2290_v7 = vmul.f32 %v2543_v29, %v2289_v53  ;;  %v2259_v16 = vsub.f32 1.0, %v2258_v2  ;;  %v2228_v58 = vmul.f32 %v2547_v62, %v4816_v9  ;;  %vm2264_vm12 = vmor %vm2262_vm6, %vm2263_vm9 }
 0x39f   :  { %v2549_v33 = vpop.eup %2548  ;;  %v2238_v49 = vand.u32 2147483648, %v4816_v9  ;;  %vm4906_vm10 = vcmp.eq.f32.partialorder %v2266_v35, 8.507059e+37  ;;  %v2236_v57 = vand.u32 2147483647, %v4816_v9  ;;  %vm2233_vm11 = vweird.f32 %v2547_v62 }
 0x3a0   :  { %v2327_v18 = vsel %vm2302_vm2, %v5227_v44, %v2196_v23  ;;  %v2291_v15 = vadd.f32 %v2543_v29, %v2290_v7  ;;  %v2260_v42 = vmul.f32 %v2545_v19, %v2259_v16  ;;  %v2229_v10 = vsub.f32 1.0, %v2228_v58  ;;  %vm2234_vm13 = vmor %vm2232_vm7, %vm2233_vm11 }
 0x3a1   :  { %2359 = vst.msk [vmem:[%s4960_s5 + $0xc0] sm:$0xff] %vm1501_vm1, %v2327_v18  ;;  %v2273_v26 = vmul.f32 %v2549_v33, %v4869_v46  ;;  %v2269_v54 = vor.u32 1.1754944e-38, %v2268_v43  ;;  %v2281_v52 = vand.u32 2147483647, %v4869_v46  ;;  %v2239_v41 = vor.u32 1.1754944e-38, %v2238_v49 }
 0x3a2   :  { %v2295_v14 = vsel %vm2294_vm8, %v2543_v29, %v2291_v15  ;;  %v2261_v63 = vadd.f32 %v2545_v19, %v2260_v42  ;;  %v2230_v11 = vmul.f32 %v2547_v62, %v2229_v10  ;;  %v2283_v48 = vand.u32 2147483648, %v4869_v46 }
 0x3a3   :  { %v2300_v32 = vsel %vm4885_vm4, %v2299_v50, %v2295_v14  ;;  %v2274_v21 = vsub.f32 1.0, %v2273_v26  ;;  %vm2278_vm14 = vweird.f32 %v2549_v33  ;;  %vm2237_vm15 = vcmp.eq.f32.partialorder %v2236_v57, 8.507059e+37 }
 0x3a4   :  { %v2301_v3 = vmul.f32 %v2300_v32, %v5230_v38  ;;  %v2265_v30 = vsel %vm2264_vm12, %v2545_v19, %v2261_v63  ;;  %v2231_v60 = vadd.f32 %v2547_v62, %v2230_v11  ;;  %vm2277_vm0 = vweird.f32 %v4869_v46 }
 0x3a5   :  { %v2270_v31 = vsel %vm4906_vm10, %v2269_v54, %v2265_v30  ;;  %v2275_v55 = vmul.f32 %v2549_v33, %v2274_v21  ;;  %vm2279_vm3 = vmor %vm2277_vm0, %vm2278_vm14  ;;  %v2284_v29 = vor.u32 1.1754944e-38, %v2283_v48  ;;  %vm2282_vm4 = vcmp.eq.f32.partialorder %v2281_v52, 8.507059e+37 }
 0x3a6   :  { %v2334_v6 = vsel %vm2302_vm2, %v5231_v34, %v2301_v3  ;;  %v2271_v59 = vmul.f32 %v2270_v31, %v5232_v24  ;;  %v2235_v45 = vsel %vm2234_vm13, %v2547_v62, %v2231_v60 }
 0x3a7   :  { %2366 = vst.msk [vmem:[%s4960_s5 + $0xf8] sm:$0xff] %vm1501_vm1, %v2334_v6  ;;  %v2240_v25 = vsel %vm2237_vm15, %v2239_v41, %v2235_v45  ;;  %v2276_v61 = vadd.f32 %v2549_v33, %v2275_v55 }
 0x3a8   :  { %v2332_v9 = vsel %vm2302_vm2, %v5233_v27, %v2271_v59  ;;  %v2241_v22 = vmul.f32 %v2240_v25, %v5234_v4 }
 0x3a9   :  { %2364 = vst.msk [vmem:[%s4960_s5 + $0xe8] sm:$0xff] %vm1501_vm1, %v2332_v9  ;;  %v2280_v0 = vsel %vm2279_vm3, %v2549_v33, %v2276_v61 }
 0x3aa   :  { %v2330_v47 = vsel %vm2302_vm2, %v5235_v13, %v2241_v22  ;;  %v2285_v46 = vsel %vm2282_vm4, %v2284_v29, %v2280_v0 }
 0x3ab   :  { %2362 = vst.msk [vmem:[%s4960_s5 + $0xd8] sm:$0xff] %vm1501_vm1, %v2330_v47  ;;  %v2286_v20 = vmul.f32 %v2285_v46, %v5236_v28 }
 0x3ad   :  { %v2333_v5 = vsel %vm2302_vm2, %v5237_v39, %v2286_v20 }
 0x3ae   :  { %2365 = vst.msk [vmem:[%s4960_s5 + $0xf0] sm:$0xff] %vm1501_vm1, %v2333_v5 }

</bundles_post_ra>
